<compile_context>
chip_gen: v7x
topology: tpu7x:2x2x1
jax: 0.10.0
libtpu: 0.0.40
codegen_flags: <defaults>
</compile_context>

<pallas_src>
import functools

import jax
import jax.numpy as jnp
from jax.experimental import pallas as pl
from jax.experimental.pallas import tpu as pltpu


# --------------------------------- fused kernel --------------------------------

def _group_kernel(x_ref, wconv_ref, bconv_ref, wd_ref, wu_ref, bd_ref,
                  wp_ref, bp_ref, o_ref,
                  out_s, h_s, xp_s, col_s, *, k, row_chunk):
    """One RCAB block per grid step (axis 1), one batch sample per axis-0 index.

    Activations stay VMEM-resident across the whole group (out_s scratch); per-block
    weights are streamed along the block grid axis.
    """
    _, H, W, C = x_ref.shape
    p = k // 2
    Ht = row_chunk
    KKC = k * k * C
    inv_M = 1.0 / float(H * W)                                      # host-side reciprocal
    b = pl.program_id(1)
    n_blocks = pl.num_programs(1)
    conv_dtype = col_s.dtype

    def conv(act3, w_mat, b_row, dst_ref, relu):
        """ReflectionPad2d(p) + Conv2d(k, bias) (+ optional fused ReLU).

        act3: (H, W, C) f32 value; w_mat: (KKC, C) conv_dtype; b_row: (1, C) f32.
        Result is written chunk-by-chunk into dst_ref (H, W, C) f32.
        """
        # ---- reflection pad: column reflection built in value domain (f32), one
        #      dense wide store per row band, single cast to conv_dtype at the store.
        if p == 0:
            mid = act3
        elif p == 1:
            mid = jnp.concatenate(
                [act3[:, 1:2, :], act3, act3[:, W - 2:W - 1, :]], axis=1)
        else:
            left = jnp.concatenate(
                [act3[:, j:j + 1, :] for j in range(p, 0, -1)], axis=1)
            right = jnp.concatenate(
                [act3[:, W - 1 - j:W - j, :] for j in range(1, p + 1)], axis=1)
            mid = jnp.concatenate([left, act3, right], axis=1)      # (H, W+2p, C)
        midc = mid.astype(conv_dtype)
        xp_s[p:p + H, :, :] = midc                                  # interior rows (+ col pad)
        for i in range(1, p + 1):                                   # top/bottom bands: dense
            xp_s[p - i:p - i + 1, :, :] = midc[i:i + 1, :, :]       # (1, W+2p, C) slab stores
            xp_s[p + H - 1 + i:p + H + i, :, :] = midc[H - 1 - i:H - i, :, :]

        # ---- im2col + matmul, chunked over rows so the col buffer stays small.
        @pl.loop(0, H // Ht)
        def _(r):
            r0 = pl.multiple_of(r * Ht, Ht)
            for dy in range(k):
                for dx in range(k):
                    t = dy * k + dx
                    col_s[:, :, t * C:(t + 1) * C] = (
                        xp_s[pl.ds(r0 + dy, Ht), dx:dx + W, :])     # no per-tap reshape copy
            col = col_s[...].reshape(Ht * W, KKC)                   # layout-clean (W % 8 == 0)
            y = jnp.dot(col, w_mat, preferred_element_type=jnp.float32) + b_row
            if relu:
                y = jnp.maximum(y, 0.0)                             # fused ReLU (f32 VPU)
            dst_ref[pl.ds(r0, Ht), :, :] = y.reshape(Ht, W, C)

    # ---- group-state init (first block of each sample) ----
    @pl.when(b == 0)
    def _():
        out_s[...] = x_ref[0].astype(jnp.float32)

    # ---- RCAB block b (weights for this block only are resident / double-buffered) ----
    w_blk = wconv_ref[0]                                            # (2, KKC, C) conv_dtype
    w1, w2 = w_blk[0], w_blk[1]
    b_all = bconv_ref[0].astype(jnp.float32)                        # (3, C): b1, b2, bu
    b1, b2, bu = b_all[0:1, :], b_all[1:2, :], b_all[2:3, :]
    wd = wd_ref[0].astype(jnp.float32)                              # (C, Cr)
    wu = wu_ref[0].astype(jnp.float32)                              # (Cr, C)
    bd = bd_ref[0].astype(jnp.float32)                              # (1, Cr)

    conv(out_s[...], w1, b1, h_s, relu=True)                        # conv1 + ReLU
    conv(h_s[...], w2, b2, h_s, relu=False)                         # conv2 (src captured in xp_s)

    # Channel attention (kept in f32): GAP = sum * 1/M, two tiny dense layers + sigmoid.
    h = h_s[...]
    gap = jnp.sum(h.reshape(H * W, C), axis=0, keepdims=True) * inv_M        # (1, C)
    z = jnp.maximum(jnp.dot(gap, wd, preferred_element_type=jnp.float32) + bd, 0.0)
    s = jax.nn.sigmoid(jnp.dot(z, wu, preferred_element_type=jnp.float32) + bu)
    out_s[...] = h * s.reshape(1, 1, C) + out_s[...]                # block residual

    # ---- post_conv + group residual (last block only) ----
    @pl.when(b == n_blocks - 1)
    def _():
        conv(out_s[...], wp_ref[...], bp_ref[...].astype(jnp.float32), h_s, relu=False)
        o_ref[...] = (x_ref[0].astype(jnp.float32) + h_s[...]).reshape(
            1, H, W, C).astype(o_ref.dtype)


# ----------------------------------- wrapper ------------------------------------

def residual_group(x_nchw, block_params, post_params, k, *,
                   conv_dtype=jnp.float32, row_chunk=8):
    """Full ResidualGroup forward. Input/output are NCHW (PyTorch convention).

    conv_dtype: matmul-operand dtype for the convolutions (weights / im2col buffer /
    padded activation). Use jnp.bfloat16 on v6e/v7x for 2x MXU rate and half the
    scratch VMEM; accumulation and element-wise math stay float32 either way.
    """
    N, C, H, W = x_nchw.shape
    B = len(block_params)
    Cr = block_params[0][4].shape[1]
    KKC = k * k * C
    p = k // 2

    # Row-chunk size for the im2col buffer: largest divisor of H not above row_chunk.
    Ht = max(1, min(row_chunk, H))
    while H % Ht:
        Ht -= 1

    x = jnp.transpose(x_nchw, (0, 2, 3, 1))                         # NCHW -> NHWC

    # Stack per-block params; conv weights pre-packed into im2col matmul form
    # (k*k*Cin, Cout), row index = (dy*k + dx)*Cin + ci (matches in-kernel fill),
    # and cast to conv_dtype in the wrapper (no in-kernel weight casts).
    wconv = jnp.stack([jnp.stack([pb[0].reshape(KKC, C), pb[2].reshape(KKC, C)])
                       for pb in block_params]).astype(conv_dtype)  # (B, 2, KKC, C)
    bconv = jnp.stack([jnp.stack([pb[1].reshape(C), pb[3].reshape(C), pb[7].reshape(C)])
                       for pb in block_params])                     # (B, 3, C) f32
    wd = jnp.stack([pb[4] for pb in block_params])                  # (B, C, Cr) f32
    wu = jnp.stack([pb[6] for pb in block_params])                  # (B, Cr, C) f32
    bd = jnp.stack([pb[5].reshape(1, Cr) for pb in block_params])   # (B, 1, Cr) f32
    wp = post_params[0].reshape(KKC, C).astype(conv_dtype)          # (KKC, C)
    bp = post_params[1].reshape(1, C)                               # (1, C) f32

    itemsize_c = jnp.dtype(conv_dtype).itemsize
    n_conv = 2 * B + 1
    flops = int(2 * N * H * W * KKC * C * n_conv + 4 * N * B * C * Cr)
    bytes_accessed = int(2 * x.size * x.dtype.itemsize
                         + N * (wconv.nbytes + bconv.nbytes + wd.nbytes
                                + wu.nbytes + bd.nbytes)
                         + wp.nbytes + bp.nbytes)
    cost = pl.CostEstimate(flops=flops, transcendentals=int(N * B * C),
                           bytes_accessed=bytes_accessed)

    # Scoped-VMEM budget from the actual footprint (scratch + double-buffered blocks).
    est_vmem = (
        2 * H * W * C * 4                                           # out_s + h_s (f32)
        + (H + 2 * p) * (W + 2 * p) * C * itemsize_c                # padded activation
        + Ht * W * KKC * itemsize_c                                 # im2col row chunk
        + 2 * 2 * H * W * C * x.dtype.itemsize                      # x & o blocks, double-buffered
        + 2 * (2 * KKC * C * itemsize_c + (3 * C + C * Cr + Cr * C + Cr) * 4)
        + KKC * C * itemsize_c + C * 4                              # post-conv weights
    )
    vmem_limit = max(32 << 20, min(int(est_vmem * 3 // 2) + (2 << 20), 100 << 20))

    out = pl.pallas_call(
        functools.partial(_group_kernel, k=k, row_chunk=Ht),
        out_shape=jax.ShapeDtypeStruct((N, H, W, C), x.dtype),
        grid_spec=pltpu.PrefetchScalarGridSpec(
            num_scalar_prefetch=0,
            grid=(N, B),                                            # batch x blocks (streamed)
            in_specs=[
                pl.BlockSpec((1, H, W, C), lambda n, b: (n, 0, 0, 0)),    # x: resident across b
                pl.BlockSpec((1, 2, KKC, C), lambda n, b: (b, 0, 0, 0)),  # per-block conv weights
                pl.BlockSpec((1, 3, C), lambda n, b: (b, 0, 0)),          # per-block biases
                pl.BlockSpec((1, C, Cr), lambda n, b: (b, 0, 0)),
                pl.BlockSpec((1, Cr, C), lambda n, b: (b, 0, 0)),
                pl.BlockSpec((1, 1, Cr), lambda n, b: (b, 0, 0)),
                pl.BlockSpec((KKC, C), lambda n, b: (0, 0)),              # post-conv (resident)
                pl.BlockSpec((1, C), lambda n, b: (0, 0)),
            ],
            out_specs=pl.BlockSpec((1, H, W, C), lambda n, b: (n, 0, 0, 0)),
            scratch_shapes=[
                pltpu.VMEM((H, W, C), jnp.float32),                 # out accumulator
                pltpu.VMEM((H, W, C), jnp.float32),                 # conv temp h
                pltpu.VMEM((H + 2 * p, W + 2 * p, C), conv_dtype),  # padded activation
                pltpu.VMEM((Ht, W, KKC), conv_dtype),               # im2col row chunk
            ],
        ),
        compiler_params=pltpu.CompilerParams(
            dimension_semantics=("parallel", "arbitrary"),          # batch parallel, blocks serial
            vmem_limit_bytes=vmem_limit,
        ),
        cost_estimate=cost,
    )(x, wconv, bconv, wd, wu, bd, wp, bp)
    return jnp.transpose(out, (0, 3, 1, 2))                         # NHWC -> NCHW


# ---------------------------- parameter construction ----------------------------

def init_params(key, n_resblocks, n_feat, k, reduction):
    cr = max(n_feat // reduction, 1)
    block_params = []
    for _ in range(n_resblocks):
        key, *ks = jax.random.split(key, 9)
        w1 = jax.random.normal(ks[0], (k, k, n_feat, n_feat), jnp.float32) * 0.1
        b1 = jax.random.normal(ks[1], (1, n_feat), jnp.float32) * 0.1
        w2 = jax.random.normal(ks[2], (k, k, n_feat, n_feat), jnp.float32) * 0.1
        b2 = jax.random.normal(ks[3], (1, n_feat), jnp.float32) * 0.1
        wd = jax.random.normal(ks[4], (n_feat, cr), jnp.float32) * 0.1
        bd = jax.random.normal(ks[5], (1, cr), jnp.float32) * 0.1
        wu = jax.random.normal(ks[6], (cr, n_feat), jnp.float32) * 0.1
        bu = jax.random.normal(ks[7], (1, n_feat), jnp.float32) * 0.1
        block_params.append((w1, b1, w2, b2, wd, bd, wu, bu))
    key, k1, k2 = jax.random.split(key, 3)
    wp = jax.random.normal(k1, (k, k, n_feat, n_feat), jnp.float32) * 0.1
    bp = jax.random.normal(k2, (1, n_feat), jnp.float32) * 0.1
    return block_params, (wp, bp)


# ------------------------------ pure-JAX reference -------------------------------

def _conv_ref(x, w, b, k):
    p = k // 2
    xp = jnp.pad(x, ((0, 0), (p, p), (p, p), (0, 0)), mode="reflect")
    y = jax.lax.conv_general_dilated(xp, w, (1, 1), "VALID",
                                     dimension_numbers=("NHWC", "HWIO", "NHWC"))
    return y + b.reshape(1, 1, 1, -1)


def _group_ref(x_nchw, block_params, post_params, k):
    x = jnp.transpose(x_nchw, (0, 2, 3, 1))
    out = x
    for (w1, b1, w2, b2, wd, bd, wu, bu) in block_params:
        h = jnp.maximum(_conv_ref(out, w1, b1, k), 0.0)
        h = _conv_ref(h, w2, b2, k)
        gap = jnp.mean(h, axis=(1, 2))
        z = jnp.maximum(gap @ wd + bd, 0.0)
        s = jax.nn.sigmoid(z @ wu + bu)
        out = h * s[:, None, None, :] + out
    out = _conv_ref(out, post_params[0], post_params[1], k) + x
    return jnp.transpose(out, (0, 3, 1, 2))


# ------------------------------------- main --------------------------------------

if __name__ == "__main__":
    # Module config: n_resblocks=2, n_feat=4, kernel_size=3, reduction=2, act=ReLU, norm=False
    N, C, H, W = 2, 4, 16, 16
    K = 3
    N_RESBLOCKS = 2
    REDUCTION = 2

    key = jax.random.PRNGKey(0)
    key, kx, kp = jax.random.split(key, 3)
    x = jax.random.normal(kx, (N, C, H, W), jnp.float32)             # PyTorch NCHW input
    block_params, post_params = init_params(kp, N_RESBLOCKS, C, K, REDUCTION)

    ref = _group_ref(x, block_params, post_params, K)

    # f32 conv operands (exact-path check vs the f32 reference).
    out_f32 = jax.block_until_ready(
        residual_group(x, block_params, post_params, K, conv_dtype=jnp.float32))
    assert out_f32.shape == (N, C, H, W)
    assert jnp.allclose(out_f32, ref, atol=1e-4, rtol=1e-4), "f32 mismatch vs reference"

    # bf16 conv operands (v6e/v7x recommended config); accumulation + elementwise stay f32,
    # so only matmul-operand rounding differs -> loose tolerance vs the f32 reference.
    out_bf16 = jax.block_until_ready(
        residual_group(x, block_params, post_params, K, conv_dtype=jnp.bfloat16))
    assert jnp.allclose(out_bf16, ref, atol=5e-2, rtol=5e-2), "bf16 mismatch vs reference"

    print("KERNEL_OK")
</pallas_src>

<mosaic_0001>
module attributes {stable_mosaic.version = 11 : i64} {
  func.func @_group_kernel(%arg0: i32, %arg1: i32, %arg2: memref<1x16x16x4xf32, #tpu.memory_space<vmem>>, %arg3: memref<1x2x36x4xf32, #tpu.memory_space<vmem>>, %arg4: memref<1x3x4xf32, #tpu.memory_space<vmem>>, %arg5: memref<1x4x2xf32, #tpu.memory_space<vmem>>, %arg6: memref<1x2x4xf32, #tpu.memory_space<vmem>>, %arg7: memref<1x1x2xf32, #tpu.memory_space<vmem>>, %arg8: memref<36x4xf32, #tpu.memory_space<vmem>>, %arg9: memref<1x4xf32, #tpu.memory_space<vmem>>, %arg10: memref<1x16x16x4xf32, #tpu.memory_space<vmem>>, %arg11: memref<16x16x4xf32, #tpu.memory_space<vmem>>, %arg12: memref<16x16x4xf32, #tpu.memory_space<vmem>>, %arg13: memref<18x18x4xf32, #tpu.memory_space<vmem>>, %arg14: memref<8x16x36xf32, #tpu.memory_space<vmem>>) attributes {dimension_semantics = [#tpu.dimension_semantics<parallel>, #tpu.dimension_semantics<arbitrary>], iteration_bounds = array<i64: 2, 2>, scalar_prefetch = 0 : i64, scratch_operands = 4 : i64, tpu.core_type = #tpu.core_type<tc>, window_params = [{transform_indices = @transform_0, window_bounds = array<i64: 1, 16, 16, 4>}, {transform_indices = @transform_1, window_bounds = array<i64: 1, 2, 36, 4>}, {transform_indices = @transform_2, window_bounds = array<i64: 1, 3, 4>}, {transform_indices = @transform_3, window_bounds = array<i64: 1, 4, 2>}, {transform_indices = @transform_4, window_bounds = array<i64: 1, 2, 4>}, {transform_indices = @transform_5, window_bounds = array<i64: 1, 1, 2>}, {pipeline_mode = #tpu.pipeline_mode<synchronous>, transform_indices = @transform_6, window_bounds = array<i64: 36, 4>}, {pipeline_mode = #tpu.pipeline_mode<synchronous>, transform_indices = @transform_7, window_bounds = array<i64: 1, 4>}, {transform_indices = @transform_8, window_bounds = array<i64: 1, 16, 16, 4>}]} {
    %c0_i32 = arith.constant 0 : i32
    %0 = arith.cmpi eq, %arg1, %c0_i32 : i32
    %1 = arith.extui %0 : i1 to i32
    %c0_i32_0 = arith.constant 0 : i32
    %2 = arith.cmpi ne, %1, %c0_i32_0 : i32
    scf.if %2 {
      %c0_60 = arith.constant 0 : index
      %c0_61 = arith.constant 0 : index
      %c0_62 = arith.constant 0 : index
      %c0_63 = arith.constant 0 : index
      %66 = vector.load %arg2[%c0_60, %c0_61, %c0_62, %c0_63] : memref<1x16x16x4xf32, #tpu.memory_space<vmem>>, vector<1x16x16x4xf32>
      %67 = vector.shape_cast %66 : vector<1x16x16x4xf32> to vector<16x16x4xf32>
      %c0_64 = arith.constant 0 : index
      %c0_65 = arith.constant 0 : index
      %c0_66 = arith.constant 0 : index
      %68 = vector.load %arg11[%c0_64, %c0_65, %c0_66] : memref<16x16x4xf32, #tpu.memory_space<vmem>>, vector<16x16x4xf32>
      tpu.vector_store %arg11[%c0_64, %c0_65, %c0_66], %67 {strides = array<i32>} : memref<16x16x4xf32, #tpu.memory_space<vmem>>, vector<16x16x4xf32>,
    } else {
    }
    %c0 = arith.constant 0 : index
    %c0_1 = arith.constant 0 : index
    %c0_2 = arith.constant 0 : index
    %c0_3 = arith.constant 0 : index
    %3 = vector.load %arg3[%c0, %c0_1, %c0_2, %c0_3] : memref<1x2x36x4xf32, #tpu.memory_space<vmem>>, vector<1x2x36x4xf32>
    %4 = vector.shape_cast %3 : vector<1x2x36x4xf32> to vector<2x36x4xf32>
    %5 = vector.extract_strided_slice %4 {offsets = [0, 0, 0], sizes = [1, 36, 4], strides = [1, 1, 1]} : vector<2x36x4xf32> to vector<1x36x4xf32>
    %6 = vector.shape_cast %5 : vector<1x36x4xf32> to vector<36x4xf32>
    %7 = vector.extract_strided_slice %4 {offsets = [1, 0, 0], sizes = [1, 36, 4], strides = [1, 1, 1]} : vector<2x36x4xf32> to vector<1x36x4xf32>
    %8 = vector.shape_cast %7 : vector<1x36x4xf32> to vector<36x4xf32>
    %c0_4 = arith.constant 0 : index
    %c0_5 = arith.constant 0 : index
    %c0_6 = arith.constant 0 : index
    %9 = vector.load %arg4[%c0_4, %c0_5, %c0_6] : memref<1x3x4xf32, #tpu.memory_space<vmem>>, vector<1x3x4xf32>
    %10 = vector.shape_cast %9 : vector<1x3x4xf32> to vector<3x4xf32>
    %11 = vector.extract_strided_slice %10 {offsets = [0, 0], sizes = [1, 4], strides = [1, 1]} : vector<3x4xf32> to vector<1x4xf32>
    %12 = vector.extract_strided_slice %10 {offsets = [1, 0], sizes = [1, 4], strides = [1, 1]} : vector<3x4xf32> to vector<1x4xf32>
    %13 = vector.extract_strided_slice %10 {offsets = [2, 0], sizes = [1, 4], strides = [1, 1]} : vector<3x4xf32> to vector<1x4xf32>
    %c0_7 = arith.constant 0 : index
    %c0_8 = arith.constant 0 : index
    %c0_9 = arith.constant 0 : index
    %14 = vector.load %arg5[%c0_7, %c0_8, %c0_9] : memref<1x4x2xf32, #tpu.memory_space<vmem>>, vector<1x4x2xf32>
    %15 = vector.shape_cast %14 : vector<1x4x2xf32> to vector<4x2xf32>
    %c0_10 = arith.constant 0 : index
    %c0_11 = arith.constant 0 : index
    %c0_12 = arith.constant 0 : index
    %16 = vector.load %arg6[%c0_10, %c0_11, %c0_12] : memref<1x2x4xf32, #tpu.memory_space<vmem>>, vector<1x2x4xf32>
    %17 = vector.shape_cast %16 : vector<1x2x4xf32> to vector<2x4xf32>
    %c0_13 = arith.constant 0 : index
    %c0_14 = arith.constant 0 : index
    %c0_15 = arith.constant 0 : index
    %18 = vector.load %arg7[%c0_13, %c0_14, %c0_15] : memref<1x1x2xf32, #tpu.memory_space<vmem>>, vector<1x1x2xf32>
    %19 = vector.shape_cast %18 : vector<1x1x2xf32> to vector<1x2xf32>
    %c0_16 = arith.constant 0 : index
    %c0_17 = arith.constant 0 : index
    %c0_18 = arith.constant 0 : index
    %20 = vector.load %arg11[%c0_16, %c0_17, %c0_18] : memref<16x16x4xf32, #tpu.memory_space<vmem>>, vector<16x16x4xf32>
    %21 = vector.extract_strided_slice %20 {offsets = [0, 1, 0], sizes = [16, 1, 4], strides = [1, 1, 1]} : vector<16x16x4xf32> to vector<16x1x4xf32>
    %22 = vector.extract_strided_slice %20 {offsets = [0, 14, 0], sizes = [16, 1, 4], strides = [1, 1, 1]} : vector<16x16x4xf32> to vector<16x1x4xf32>
    %23 = tpu.concatenate %21, %20, %22 in 1 : vector<16x1x4xf32>, vector<16x16x4xf32>, vector<16x1x4xf32> -> vector<16x18x4xf32>
    %c1 = arith.constant 1 : index
    %c0_19 = arith.constant 0 : index
    %c0_20 = arith.constant 0 : index
    %24 = vector.load %arg13[%c1, %c0_19, %c0_20] : memref<18x18x4xf32, #tpu.memory_space<vmem>>, vector<16x18x4xf32>
    tpu.vector_store %arg13[%c1, %c0_19, %c0_20], %23 {strides = array<i32>} : memref<18x18x4xf32, #tpu.memory_space<vmem>>, vector<16x18x4xf32>,
    %25 = vector.extract_strided_slice %23 {offsets = [1, 0, 0], sizes = [1, 18, 4], strides = [1, 1, 1]} : vector<16x18x4xf32> to vector<1x18x4xf32>
    %c0_21 = arith.constant 0 : index
    %c0_22 = arith.constant 0 : index
    %c0_23 = arith.constant 0 : index
    %26 = vector.load %arg13[%c0_21, %c0_22, %c0_23] : memref<18x18x4xf32, #tpu.memory_space<vmem>>, vector<1x18x4xf32>
    tpu.vector_store %arg13[%c0_21, %c0_22, %c0_23], %25 {strides = array<i32>} : memref<18x18x4xf32, #tpu.memory_space<vmem>>, vector<1x18x4xf32>,
    %27 = vector.extract_strided_slice %23 {offsets = [14, 0, 0], sizes = [1, 18, 4], strides = [1, 1, 1]} : vector<16x18x4xf32> to vector<1x18x4xf32>
    %c17 = arith.constant 17 : index
    %c0_24 = arith.constant 0 : index
    %c0_25 = arith.constant 0 : index
    %28 = vector.load %arg13[%c17, %c0_24, %c0_25] : memref<18x18x4xf32, #tpu.memory_space<vmem>>, vector<1x18x4xf32>
    tpu.vector_store %arg13[%c17, %c0_24, %c0_25], %27 {strides = array<i32>} : memref<18x18x4xf32, #tpu.memory_space<vmem>>, vector<1x18x4xf32>,
    %c0_i32_26 = arith.constant 0 : i32
    %c2_i32 = arith.constant 2 : i32
    %29 = arith.addi %c0_i32_26, %c2_i32 : i32
    %c1_i32 = arith.constant 1 : i32
    scf.for %arg15 = %c0_i32_26 to %29 step %c1_i32  : i32 {
      %c1_i32_60 = arith.constant 1 : i32
      %66 = arith.muli %arg15, %c1_i32_60 : i32
      %c0_i32_61 = arith.constant 0 : i32
      %67 = arith.addi %c0_i32_61, %66 : i32
      %c8_i32 = arith.constant 8 : i32
      %68 = arith.muli %67, %c8_i32 : i32
      %69 = tpu.assume_multiple %68, 8 : i32
      %c0_i32_62 = arith.constant 0 : i32
      %70 = arith.addi %69, %c0_i32_62 : i32
      %71 = arith.index_cast %70 : i32 to index
      %c0_63 = arith.constant 0 : index
      %c0_64 = arith.constant 0 : index
      %72 = vector.load %arg13[%71, %c0_63, %c0_64] : memref<18x18x4xf32, #tpu.memory_space<vmem>>, vector<8x16x4xf32>
      %c0_65 = arith.constant 0 : index
      %c0_66 = arith.constant 0 : index
      %c0_67 = arith.constant 0 : index
      %73 = vector.load %arg14[%c0_65, %c0_66, %c0_67] : memref<8x16x36xf32, #tpu.memory_space<vmem>>, vector<8x16x4xf32>
      tpu.vector_store %arg14[%c0_65, %c0_66, %c0_67], %72 {strides = array<i32>} : memref<8x16x36xf32, #tpu.memory_space<vmem>>, vector<8x16x4xf32>,
      %c0_i32_68 = arith.constant 0 : i32
      %74 = arith.addi %69, %c0_i32_68 : i32
      %75 = arith.index_cast %74 : i32 to index
      %c1_69 = arith.constant 1 : index
      %c0_70 = arith.constant 0 : index
      %76 = vector.load %arg13[%75, %c1_69, %c0_70] : memref<18x18x4xf32, #tpu.memory_space<vmem>>, vector<8x16x4xf32>
      %c0_71 = arith.constant 0 : index
      %c0_72 = arith.constant 0 : index
      %c4 = arith.constant 4 : index
      %77 = vector.load %arg14[%c0_71, %c0_72, %c4] : memref<8x16x36xf32, #tpu.memory_space<vmem>>, vector<8x16x4xf32>
      tpu.vector_store %arg14[%c0_71, %c0_72, %c4], %76 {strides = array<i32>} : memref<8x16x36xf32, #tpu.memory_space<vmem>>, vector<8x16x4xf32>,
      %c0_i32_73 = arith.constant 0 : i32
      %78 = arith.addi %69, %c0_i32_73 : i32
      %79 = arith.index_cast %78 : i32 to index
      %c2 = arith.constant 2 : index
      %c0_74 = arith.constant 0 : index
      %80 = vector.load %arg13[%79, %c2, %c0_74] : memref<18x18x4xf32, #tpu.memory_space<vmem>>, vector<8x16x4xf32>
      %c0_75 = arith.constant 0 : index
      %c0_76 = arith.constant 0 : index
      %c8 = arith.constant 8 : index
      %81 = vector.load %arg14[%c0_75, %c0_76, %c8] : memref<8x16x36xf32, #tpu.memory_space<vmem>>, vector<8x16x4xf32>
      tpu.vector_store %arg14[%c0_75, %c0_76, %c8], %80 {strides = array<i32>} : memref<8x16x36xf32, #tpu.memory_space<vmem>>, vector<8x16x4xf32>,
      %c1_i32_77 = arith.constant 1 : i32
      %82 = arith.addi %69, %c1_i32_77 : i32
      %83 = arith.index_cast %82 : i32 to index
      %c0_78 = arith.constant 0 : index
      %c0_79 = arith.constant 0 : index
      %84 = vector.load %arg13[%83, %c0_78, %c0_79] : memref<18x18x4xf32, #tpu.memory_space<vmem>>, vector<8x16x4xf32>
      %c0_80 = arith.constant 0 : index
      %c0_81 = arith.constant 0 : index
      %c12 = arith.constant 12 : index
      %85 = vector.load %arg14[%c0_80, %c0_81, %c12] : memref<8x16x36xf32, #tpu.memory_space<vmem>>, vector<8x16x4xf32>
      tpu.vector_store %arg14[%c0_80, %c0_81, %c12], %84 {strides = array<i32>} : memref<8x16x36xf32, #tpu.memory_space<vmem>>, vector<8x16x4xf32>,
      %c1_i32_82 = arith.constant 1 : i32
      %86 = arith.addi %69, %c1_i32_82 : i32
      %87 = arith.index_cast %86 : i32 to index
      %c1_83 = arith.constant 1 : index
      %c0_84 = arith.constant 0 : index
      %88 = vector.load %arg13[%87, %c1_83, %c0_84] : memref<18x18x4xf32, #tpu.memory_space<vmem>>, vector<8x16x4xf32>
      %c0_85 = arith.constant 0 : index
      %c0_86 = arith.constant 0 : index
      %c16 = arith.constant 16 : index
      %89 = vector.load %arg14[%c0_85, %c0_86, %c16] : memref<8x16x36xf32, #tpu.memory_space<vmem>>, vector<8x16x4xf32>
      tpu.vector_store %arg14[%c0_85, %c0_86, %c16], %88 {strides = array<i32>} : memref<8x16x36xf32, #tpu.memory_space<vmem>>, vector<8x16x4xf32>,
      %c1_i32_87 = arith.constant 1 : i32
      %90 = arith.addi %69, %c1_i32_87 : i32
      %91 = arith.index_cast %90 : i32 to index
      %c2_88 = arith.constant 2 : index
      %c0_89 = arith.constant 0 : index
      %92 = vector.load %arg13[%91, %c2_88, %c0_89] : memref<18x18x4xf32, #tpu.memory_space<vmem>>, vector<8x16x4xf32>
      %c0_90 = arith.constant 0 : index
      %c0_91 = arith.constant 0 : index
      %c20 = arith.constant 20 : index
      %93 = vector.load %arg14[%c0_90, %c0_91, %c20] : memref<8x16x36xf32, #tpu.memory_space<vmem>>, vector<8x16x4xf32>
      tpu.vector_store %arg14[%c0_90, %c0_91, %c20], %92 {strides = array<i32>} : memref<8x16x36xf32, #tpu.memory_space<vmem>>, vector<8x16x4xf32>,
      %c2_i32_92 = arith.constant 2 : i32
      %94 = arith.addi %69, %c2_i32_92 : i32
      %95 = arith.index_cast %94 : i32 to index
      %c0_93 = arith.constant 0 : index
      %c0_94 = arith.constant 0 : index
      %96 = vector.load %arg13[%95, %c0_93, %c0_94] : memref<18x18x4xf32, #tpu.memory_space<vmem>>, vector<8x16x4xf32>
      %c0_95 = arith.constant 0 : index
      %c0_96 = arith.constant 0 : index
      %c24 = arith.constant 24 : index
      %97 = vector.load %arg14[%c0_95, %c0_96, %c24] : memref<8x16x36xf32, #tpu.memory_space<vmem>>, vector<8x16x4xf32>
      tpu.vector_store %arg14[%c0_95, %c0_96, %c24], %96 {strides = array<i32>} : memref<8x16x36xf32, #tpu.memory_space<vmem>>, vector<8x16x4xf32>,
      %c2_i32_97 = arith.constant 2 : i32
      %98 = arith.addi %69, %c2_i32_97 : i32
      %99 = arith.index_cast %98 : i32 to index
      %c1_98 = arith.constant 1 : index
      %c0_99 = arith.constant 0 : index
      %100 = vector.load %arg13[%99, %c1_98, %c0_99] : memref<18x18x4xf32, #tpu.memory_space<vmem>>, vector<8x16x4xf32>
      %c0_100 = arith.constant 0 : index
      %c0_101 = arith.constant 0 : index
      %c28 = arith.constant 28 : index
      %101 = vector.load %arg14[%c0_100, %c0_101, %c28] : memref<8x16x36xf32, #tpu.memory_space<vmem>>, vector<8x16x4xf32>
      tpu.vector_store %arg14[%c0_100, %c0_101, %c28], %100 {strides = array<i32>} : memref<8x16x36xf32, #tpu.memory_space<vmem>>, vector<8x16x4xf32>,
      %c2_i32_102 = arith.constant 2 : i32
      %102 = arith.addi %69, %c2_i32_102 : i32
      %103 = arith.index_cast %102 : i32 to index
      %c2_103 = arith.constant 2 : index
      %c0_104 = arith.constant 0 : index
      %104 = vector.load %arg13[%103, %c2_103, %c0_104] : memref<18x18x4xf32, #tpu.memory_space<vmem>>, vector<8x16x4xf32>
      %c0_105 = arith.constant 0 : index
      %c0_106 = arith.constant 0 : index
      %c32 = arith.constant 32 : index
      %105 = vector.load %arg14[%c0_105, %c0_106, %c32] : memref<8x16x36xf32, #tpu.memory_space<vmem>>, vector<8x16x4xf32>
      tpu.vector_store %arg14[%c0_105, %c0_106, %c32], %104 {strides = array<i32>} : memref<8x16x36xf32, #tpu.memory_space<vmem>>, vector<8x16x4xf32>,
      %c0_107 = arith.constant 0 : index
      %c0_108 = arith.constant 0 : index
      %c0_109 = arith.constant 0 : index
      %106 = vector.load %arg14[%c0_107, %c0_108, %c0_109] : memref<8x16x36xf32, #tpu.memory_space<vmem>>, vector<8x16x36xf32>
      %107 = vector.shape_cast %106 : vector<8x16x36xf32> to vector<128x36xf32>
      %cst_110 = arith.constant dense<0.000000e+00> : vector<128x4xf32>
      %108 = tpu.matmul %107, %6, %cst_110 {dimension_numbers = #tpu.dot_dimension_numbers<[1], [0], [0], [1], [0, 0, 1, 1], [], []>} : vector<128x36xf32>, vector<36x4xf32>, vector<128x4xf32> -> vector<128x4xf32>
      %109 = vector.broadcast %11 : vector<1x4xf32> to vector<128x4xf32>
      %110 = arith.addf %108, %109 : vector<128x4xf32>
      %cst_111 = arith.constant 0.000000e+00 : f32
      %111 = vector.broadcast %cst_111 : f32 to vector<128x4xf32>
      %112 = arith.maximumf %110, %111 : vector<128x4xf32>
      %113 = vector.shape_cast %112 : vector<128x4xf32> to vector<8x16x4xf32>
      %114 = arith.index_cast %69 : i32 to index
      %c0_112 = arith.constant 0 : index
      %c0_113 = arith.constant 0 : index
      %115 = vector.load %arg12[%114, %c0_112, %c0_113] : memref<16x16x4xf32, #tpu.memory_space<vmem>>, vector<8x16x4xf32>
      tpu.vector_store %arg12[%114, %c0_112, %c0_113], %113 {strides = array<i32>} : memref<16x16x4xf32, #tpu.memory_space<vmem>>, vector<8x16x4xf32>,
    }
    %c2_i32_27 = arith.constant 2 : i32
    %c0_28 = arith.constant 0 : index
    %c0_29 = arith.constant 0 : index
    %c0_30 = arith.constant 0 : index
    %30 = vector.load %arg12[%c0_28, %c0_29, %c0_30] : memref<16x16x4xf32, #tpu.memory_space<vmem>>, vector<16x16x4xf32>
    %31 = vector.extract_strided_slice %30 {offsets = [0, 1, 0], sizes = [16, 1, 4], strides = [1, 1, 1]} : vector<16x16x4xf32> to vector<16x1x4xf32>
    %32 = vector.extract_strided_slice %30 {offsets = [0, 14, 0], sizes = [16, 1, 4], strides = [1, 1, 1]} : vector<16x16x4xf32> to vector<16x1x4xf32>
    %33 = tpu.concatenate %31, %30, %32 in 1 : vector<16x1x4xf32>, vector<16x16x4xf32>, vector<16x1x4xf32> -> vector<16x18x4xf32>
    %c1_31 = arith.constant 1 : index
    %c0_32 = arith.constant 0 : index
    %c0_33 = arith.constant 0 : index
    %34 = vector.load %arg13[%c1_31, %c0_32, %c0_33] : memref<18x18x4xf32, #tpu.memory_space<vmem>>, vector<16x18x4xf32>
    tpu.vector_store %arg13[%c1_31, %c0_32, %c0_33], %33 {strides = array<i32>} : memref<18x18x4xf32, #tpu.memory_space<vmem>>, vector<16x18x4xf32>,
    %35 = vector.extract_strided_slice %33 {offsets = [1, 0, 0], sizes = [1, 18, 4], strides = [1, 1, 1]} : vector<16x18x4xf32> to vector<1x18x4xf32>
    %c0_34 = arith.constant 0 : index
    %c0_35 = arith.constant 0 : index
    %c0_36 = arith.constant 0 : index
    %36 = vector.load %arg13[%c0_34, %c0_35, %c0_36] : memref<18x18x4xf32, #tpu.memory_space<vmem>>, vector<1x18x4xf32>
    tpu.vector_store %arg13[%c0_34, %c0_35, %c0_36], %35 {strides = array<i32>} : memref<18x18x4xf32, #tpu.memory_space<vmem>>, vector<1x18x4xf32>,
    %37 = vector.extract_strided_slice %33 {offsets = [14, 0, 0], sizes = [1, 18, 4], strides = [1, 1, 1]} : vector<16x18x4xf32> to vector<1x18x4xf32>
    %c17_37 = arith.constant 17 : index
    %c0_38 = arith.constant 0 : index
    %c0_39 = arith.constant 0 : index
    %38 = vector.load %arg13[%c17_37, %c0_38, %c0_39] : memref<18x18x4xf32, #tpu.memory_space<vmem>>, vector<1x18x4xf32>
    tpu.vector_store %arg13[%c17_37, %c0_38, %c0_39], %37 {strides = array<i32>} : memref<18x18x4xf32, #tpu.memory_space<vmem>>, vector<1x18x4xf32>,
    %c0_i32_40 = arith.constant 0 : i32
    %c2_i32_41 = arith.constant 2 : i32
    %39 = arith.addi %c0_i32_40, %c2_i32_41 : i32
    %c1_i32_42 = arith.constant 1 : i32
    scf.for %arg15 = %c0_i32_40 to %39 step %c1_i32_42  : i32 {
      %c1_i32_60 = arith.constant 1 : i32
      %66 = arith.muli %arg15, %c1_i32_60 : i32
      %c0_i32_61 = arith.constant 0 : i32
      %67 = arith.addi %c0_i32_61, %66 : i32
      %c8_i32 = arith.constant 8 : i32
      %68 = arith.muli %67, %c8_i32 : i32
      %69 = tpu.assume_multiple %68, 8 : i32
      %c0_i32_62 = arith.constant 0 : i32
      %70 = arith.addi %69, %c0_i32_62 : i32
      %71 = arith.index_cast %70 : i32 to index
      %c0_63 = arith.constant 0 : index
      %c0_64 = arith.constant 0 : index
      %72 = vector.load %arg13[%71, %c0_63, %c0_64] : memref<18x18x4xf32, #tpu.memory_space<vmem>>, vector<8x16x4xf32>
      %c0_65 = arith.constant 0 : index
      %c0_66 = arith.constant 0 : index
      %c0_67 = arith.constant 0 : index
      %73 = vector.load %arg14[%c0_65, %c0_66, %c0_67] : memref<8x16x36xf32, #tpu.memory_space<vmem>>, vector<8x16x4xf32>
      tpu.vector_store %arg14[%c0_65, %c0_66, %c0_67], %72 {strides = array<i32>} : memref<8x16x36xf32, #tpu.memory_space<vmem>>, vector<8x16x4xf32>,
      %c0_i32_68 = arith.constant 0 : i32
      %74 = arith.addi %69, %c0_i32_68 : i32
      %75 = arith.index_cast %74 : i32 to index
      %c1_69 = arith.constant 1 : index
      %c0_70 = arith.constant 0 : index
      %76 = vector.load %arg13[%75, %c1_69, %c0_70] : memref<18x18x4xf32, #tpu.memory_space<vmem>>, vector<8x16x4xf32>
      %c0_71 = arith.constant 0 : index
      %c0_72 = arith.constant 0 : index
      %c4 = arith.constant 4 : index
      %77 = vector.load %arg14[%c0_71, %c0_72, %c4] : memref<8x16x36xf32, #tpu.memory_space<vmem>>, vector<8x16x4xf32>
      tpu.vector_store %arg14[%c0_71, %c0_72, %c4], %76 {strides = array<i32>} : memref<8x16x36xf32, #tpu.memory_space<vmem>>, vector<8x16x4xf32>,
      %c0_i32_73 = arith.constant 0 : i32
      %78 = arith.addi %69, %c0_i32_73 : i32
      %79 = arith.index_cast %78 : i32 to index
      %c2 = arith.constant 2 : index
      %c0_74 = arith.constant 0 : index
      %80 = vector.load %arg13[%79, %c2, %c0_74] : memref<18x18x4xf32, #tpu.memory_space<vmem>>, vector<8x16x4xf32>
      %c0_75 = arith.constant 0 : index
      %c0_76 = arith.constant 0 : index
      %c8 = arith.constant 8 : index
      %81 = vector.load %arg14[%c0_75, %c0_76, %c8] : memref<8x16x36xf32, #tpu.memory_space<vmem>>, vector<8x16x4xf32>
      tpu.vector_store %arg14[%c0_75, %c0_76, %c8], %80 {strides = array<i32>} : memref<8x16x36xf32, #tpu.memory_space<vmem>>, vector<8x16x4xf32>,
      %c1_i32_77 = arith.constant 1 : i32
      %82 = arith.addi %69, %c1_i32_77 : i32
      %83 = arith.index_cast %82 : i32 to index
      %c0_78 = arith.constant 0 : index
      %c0_79 = arith.constant 0 : index
      %84 = vector.load %arg13[%83, %c0_78, %c0_79] : memref<18x18x4xf32, #tpu.memory_space<vmem>>, vector<8x16x4xf32>
      %c0_80 = arith.constant 0 : index
      %c0_81 = arith.constant 0 : index
      %c12 = arith.constant 12 : index
      %85 = vector.load %arg14[%c0_80, %c0_81, %c12] : memref<8x16x36xf32, #tpu.memory_space<vmem>>, vector<8x16x4xf32>
      tpu.vector_store %arg14[%c0_80, %c0_81, %c12], %84 {strides = array<i32>} : memref<8x16x36xf32, #tpu.memory_space<vmem>>, vector<8x16x4xf32>,
      %c1_i32_82 = arith.constant 1 : i32
      %86 = arith.addi %69, %c1_i32_82 : i32
      %87 = arith.index_cast %86 : i32 to index
      %c1_83 = arith.constant 1 : index
      %c0_84 = arith.constant 0 : index
      %88 = vector.load %arg13[%87, %c1_83, %c0_84] : memref<18x18x4xf32, #tpu.memory_space<vmem>>, vector<8x16x4xf32>
      %c0_85 = arith.constant 0 : index
      %c0_86 = arith.constant 0 : index
      %c16 = arith.constant 16 : index
      %89 = vector.load %arg14[%c0_85, %c0_86, %c16] : memref<8x16x36xf32, #tpu.memory_space<vmem>>, vector<8x16x4xf32>
      tpu.vector_store %arg14[%c0_85, %c0_86, %c16], %88 {strides = array<i32>} : memref<8x16x36xf32, #tpu.memory_space<vmem>>, vector<8x16x4xf32>,
      %c1_i32_87 = arith.constant 1 : i32
      %90 = arith.addi %69, %c1_i32_87 : i32
      %91 = arith.index_cast %90 : i32 to index
      %c2_88 = arith.constant 2 : index
      %c0_89 = arith.constant 0 : index
      %92 = vector.load %arg13[%91, %c2_88, %c0_89] : memref<18x18x4xf32, #tpu.memory_space<vmem>>, vector<8x16x4xf32>
      %c0_90 = arith.constant 0 : index
      %c0_91 = arith.constant 0 : index
      %c20 = arith.constant 20 : index
      %93 = vector.load %arg14[%c0_90, %c0_91, %c20] : memref<8x16x36xf32, #tpu.memory_space<vmem>>, vector<8x16x4xf32>
      tpu.vector_store %arg14[%c0_90, %c0_91, %c20], %92 {strides = array<i32>} : memref<8x16x36xf32, #tpu.memory_space<vmem>>, vector<8x16x4xf32>,
      %c2_i32_92 = arith.constant 2 : i32
      %94 = arith.addi %69, %c2_i32_92 : i32
      %95 = arith.index_cast %94 : i32 to index
      %c0_93 = arith.constant 0 : index
      %c0_94 = arith.constant 0 : index
      %96 = vector.load %arg13[%95, %c0_93, %c0_94] : memref<18x18x4xf32, #tpu.memory_space<vmem>>, vector<8x16x4xf32>
      %c0_95 = arith.constant 0 : index
      %c0_96 = arith.constant 0 : index
      %c24 = arith.constant 24 : index
      %97 = vector.load %arg14[%c0_95, %c0_96, %c24] : memref<8x16x36xf32, #tpu.memory_space<vmem>>, vector<8x16x4xf32>
      tpu.vector_store %arg14[%c0_95, %c0_96, %c24], %96 {strides = array<i32>} : memref<8x16x36xf32, #tpu.memory_space<vmem>>, vector<8x16x4xf32>,
      %c2_i32_97 = arith.constant 2 : i32
      %98 = arith.addi %69, %c2_i32_97 : i32
      %99 = arith.index_cast %98 : i32 to index
      %c1_98 = arith.constant 1 : index
      %c0_99 = arith.constant 0 : index
      %100 = vector.load %arg13[%99, %c1_98, %c0_99] : memref<18x18x4xf32, #tpu.memory_space<vmem>>, vector<8x16x4xf32>
      %c0_100 = arith.constant 0 : index
      %c0_101 = arith.constant 0 : index
      %c28 = arith.constant 28 : index
      %101 = vector.load %arg14[%c0_100, %c0_101, %c28] : memref<8x16x36xf32, #tpu.memory_space<vmem>>, vector<8x16x4xf32>
      tpu.vector_store %arg14[%c0_100, %c0_101, %c28], %100 {strides = array<i32>} : memref<8x16x36xf32, #tpu.memory_space<vmem>>, vector<8x16x4xf32>,
      %c2_i32_102 = arith.constant 2 : i32
      %102 = arith.addi %69, %c2_i32_102 : i32
      %103 = arith.index_cast %102 : i32 to index
      %c2_103 = arith.constant 2 : index
      %c0_104 = arith.constant 0 : index
      %104 = vector.load %arg13[%103, %c2_103, %c0_104] : memref<18x18x4xf32, #tpu.memory_space<vmem>>, vector<8x16x4xf32>
      %c0_105 = arith.constant 0 : index
      %c0_106 = arith.constant 0 : index
      %c32 = arith.constant 32 : index
      %105 = vector.load %arg14[%c0_105, %c0_106, %c32] : memref<8x16x36xf32, #tpu.memory_space<vmem>>, vector<8x16x4xf32>
      tpu.vector_store %arg14[%c0_105, %c0_106, %c32], %104 {strides = array<i32>} : memref<8x16x36xf32, #tpu.memory_space<vmem>>, vector<8x16x4xf32>,
      %c0_107 = arith.constant 0 : index
      %c0_108 = arith.constant 0 : index
      %c0_109 = arith.constant 0 : index
      %106 = vector.load %arg14[%c0_107, %c0_108, %c0_109] : memref<8x16x36xf32, #tpu.memory_space<vmem>>, vector<8x16x36xf32>
      %107 = vector.shape_cast %106 : vector<8x16x36xf32> to vector<128x36xf32>
      %cst_110 = arith.constant dense<0.000000e+00> : vector<128x4xf32>
      %108 = tpu.matmul %107, %8, %cst_110 {dimension_numbers = #tpu.dot_dimension_numbers<[1], [0], [0], [1], [0, 0, 1, 1], [], []>} : vector<128x36xf32>, vector<36x4xf32>, vector<128x4xf32> -> vector<128x4xf32>
      %109 = vector.broadcast %12 : vector<1x4xf32> to vector<128x4xf32>
      %110 = arith.addf %108, %109 : vector<128x4xf32>
      %111 = vector.shape_cast %110 : vector<128x4xf32> to vector<8x16x4xf32>
      %112 = arith.index_cast %69 : i32 to index
      %c0_111 = arith.constant 0 : index
      %c0_112 = arith.constant 0 : index
      %113 = vector.load %arg12[%112, %c0_111, %c0_112] : memref<16x16x4xf32, #tpu.memory_space<vmem>>, vector<8x16x4xf32>
      tpu.vector_store %arg12[%112, %c0_111, %c0_112], %111 {strides = array<i32>} : memref<16x16x4xf32, #tpu.memory_space<vmem>>, vector<8x16x4xf32>,
    }
    %c2_i32_43 = arith.constant 2 : i32
    %c0_44 = arith.constant 0 : index
    %c0_45 = arith.constant 0 : index
    %c0_46 = arith.constant 0 : index
    %40 = vector.load %arg12[%c0_44, %c0_45, %c0_46] : memref<16x16x4xf32, #tpu.memory_space<vmem>>, vector<16x16x4xf32>
    %41 = vector.shape_cast %40 : vector<16x16x4xf32> to vector<256x4xf32>
    %cst = arith.constant dense<0.000000e+00> : vector<4xf32>
    %42 = vector.multi_reduction <add>, %41, %cst [0] : vector<256x4xf32> to vector<4xf32>
    %43 = vector.shape_cast %42 : vector<4xf32> to vector<1x4xf32>
    %cst_47 = arith.constant 3.906250e-03 : f32
    %44 = vector.broadcast %cst_47 : f32 to vector<1x4xf32>
    %45 = arith.mulf %43, %44 : vector<1x4xf32>
    %cst_48 = arith.constant dense<0.000000e+00> : vector<1x2xf32>
    %46 = tpu.matmul %45, %15, %cst_48 {dimension_numbers = #tpu.dot_dimension_numbers<[1], [0], [0], [1], [0, 0, 1, 1], [], []>} : vector<1x4xf32>, vector<4x2xf32>, vector<1x2xf32> -> vector<1x2xf32>
    %47 = arith.addf %46, %19 : vector<1x2xf32>
    %cst_49 = arith.constant 0.000000e+00 : f32
    %48 = vector.broadcast %cst_49 : f32 to vector<1x2xf32>
    %49 = arith.maximumf %47, %48 : vector<1x2xf32>
    %cst_50 = arith.constant dense<0.000000e+00> : vector<1x4xf32>
    %50 = tpu.matmul %49, %17, %cst_50 {dimension_numbers = #tpu.dot_dimension_numbers<[1], [0], [0], [1], [0, 0, 1, 1], [], []>} : vector<1x2xf32>, vector<2x4xf32>, vector<1x4xf32> -> vector<1x4xf32>
    %51 = arith.addf %50, %13 : vector<1x4xf32>
    %52 = arith.negf %51 : vector<1x4xf32>
    %53 = math.exp %52 : vector<1x4xf32>
    %cst_51 = arith.constant 1.000000e+00 : f32
    %54 = vector.broadcast %cst_51 : f32 to vector<1x4xf32>
    %55 = arith.addf %54, %53 : vector<1x4xf32>
    %56 = arith.divf %54, %55 : vector<1x4xf32>
    %57 = vector.shape_cast %56 : vector<1x4xf32> to vector<1x1x4xf32>
    %58 = vector.broadcast %57 : vector<1x1x4xf32> to vector<16x16x4xf32>
    %59 = arith.mulf %40, %58 : vector<16x16x4xf32>
    %c0_52 = arith.constant 0 : index
    %c0_53 = arith.constant 0 : index
    %c0_54 = arith.constant 0 : index
    %60 = vector.load %arg11[%c0_52, %c0_53, %c0_54] : memref<16x16x4xf32, #tpu.memory_space<vmem>>, vector<16x16x4xf32>
    %61 = arith.addf %59, %60 : vector<16x16x4xf32>
    %c0_55 = arith.constant 0 : index
    %c0_56 = arith.constant 0 : index
    %c0_57 = arith.constant 0 : index
    %62 = vector.load %arg11[%c0_55, %c0_56, %c0_57] : memref<16x16x4xf32, #tpu.memory_space<vmem>>, vector<16x16x4xf32>
    tpu.vector_store %arg11[%c0_55, %c0_56, %c0_57], %61 {strides = array<i32>} : memref<16x16x4xf32, #tpu.memory_space<vmem>>, vector<16x16x4xf32>,
    %c1_i32_58 = arith.constant 1 : i32
    %63 = arith.cmpi eq, %arg1, %c1_i32_58 : i32
    %64 = arith.extui %63 : i1 to i32
    %c0_i32_59 = arith.constant 0 : i32
    %65 = arith.cmpi ne, %64, %c0_i32_59 : i32
    scf.if %65 {
      %c0_60 = arith.constant 0 : index
      %c0_61 = arith.constant 0 : index
      %c0_62 = arith.constant 0 : index
      %66 = vector.load %arg11[%c0_60, %c0_61, %c0_62] : memref<16x16x4xf32, #tpu.memory_space<vmem>>, vector<16x16x4xf32>
      %c0_63 = arith.constant 0 : index
      %c0_64 = arith.constant 0 : index
      %67 = vector.load %arg8[%c0_63, %c0_64] : memref<36x4xf32, #tpu.memory_space<vmem>>, vector<36x4xf32>
      %c0_65 = arith.constant 0 : index
      %c0_66 = arith.constant 0 : index
      %68 = vector.load %arg9[%c0_65, %c0_66] : memref<1x4xf32, #tpu.memory_space<vmem>>, vector<1x4xf32>
      %69 = vector.extract_strided_slice %66 {offsets = [0, 1, 0], sizes = [16, 1, 4], strides = [1, 1, 1]} : vector<16x16x4xf32> to vector<16x1x4xf32>
      %70 = vector.extract_strided_slice %66 {offsets = [0, 14, 0], sizes = [16, 1, 4], strides = [1, 1, 1]} : vector<16x16x4xf32> to vector<16x1x4xf32>
      %71 = tpu.concatenate %69, %66, %70 in 1 : vector<16x1x4xf32>, vector<16x16x4xf32>, vector<16x1x4xf32> -> vector<16x18x4xf32>
      %c1_67 = arith.constant 1 : index
      %c0_68 = arith.constant 0 : index
      %c0_69 = arith.constant 0 : index
      %72 = vector.load %arg13[%c1_67, %c0_68, %c0_69] : memref<18x18x4xf32, #tpu.memory_space<vmem>>, vector<16x18x4xf32>
      tpu.vector_store %arg13[%c1_67, %c0_68, %c0_69], %71 {strides = array<i32>} : memref<18x18x4xf32, #tpu.memory_space<vmem>>, vector<16x18x4xf32>,
      %73 = vector.extract_strided_slice %71 {offsets = [1, 0, 0], sizes = [1, 18, 4], strides = [1, 1, 1]} : vector<16x18x4xf32> to vector<1x18x4xf32>
      %c0_70 = arith.constant 0 : index
      %c0_71 = arith.constant 0 : index
      %c0_72 = arith.constant 0 : index
      %74 = vector.load %arg13[%c0_70, %c0_71, %c0_72] : memref<18x18x4xf32, #tpu.memory_space<vmem>>, vector<1x18x4xf32>
      tpu.vector_store %arg13[%c0_70, %c0_71, %c0_72], %73 {strides = array<i32>} : memref<18x18x4xf32, #tpu.memory_space<vmem>>, vector<1x18x4xf32>,
      %75 = vector.extract_strided_slice %71 {offsets = [14, 0, 0], sizes = [1, 18, 4], strides = [1, 1, 1]} : vector<16x18x4xf32> to vector<1x18x4xf32>
      %c17_73 = arith.constant 17 : index
      %c0_74 = arith.constant 0 : index
      %c0_75 = arith.constant 0 : index
      %76 = vector.load %arg13[%c17_73, %c0_74, %c0_75] : memref<18x18x4xf32, #tpu.memory_space<vmem>>, vector<1x18x4xf32>
      tpu.vector_store %arg13[%c17_73, %c0_74, %c0_75], %75 {strides = array<i32>} : memref<18x18x4xf32, #tpu.memory_space<vmem>>, vector<1x18x4xf32>,
      %c0_i32_76 = arith.constant 0 : i32
      %c2_i32_77 = arith.constant 2 : i32
      %77 = arith.addi %c0_i32_76, %c2_i32_77 : i32
      %c1_i32_78 = arith.constant 1 : i32
      scf.for %arg15 = %c0_i32_76 to %77 step %c1_i32_78  : i32 {
        %c1_i32_91 = arith.constant 1 : i32
        %84 = arith.muli %arg15, %c1_i32_91 : i32
        %c0_i32_92 = arith.constant 0 : i32
        %85 = arith.addi %c0_i32_92, %84 : i32
        %c8_i32 = arith.constant 8 : i32
        %86 = arith.muli %85, %c8_i32 : i32
        %87 = tpu.assume_multiple %86, 8 : i32
        %c0_i32_93 = arith.constant 0 : i32
        %88 = arith.addi %87, %c0_i32_93 : i32
        %89 = arith.index_cast %88 : i32 to index
        %c0_94 = arith.constant 0 : index
        %c0_95 = arith.constant 0 : index
        %90 = vector.load %arg13[%89, %c0_94, %c0_95] : memref<18x18x4xf32, #tpu.memory_space<vmem>>, vector<8x16x4xf32>
        %c0_96 = arith.constant 0 : index
        %c0_97 = arith.constant 0 : index
        %c0_98 = arith.constant 0 : index
        %91 = vector.load %arg14[%c0_96, %c0_97, %c0_98] : memref<8x16x36xf32, #tpu.memory_space<vmem>>, vector<8x16x4xf32>
        tpu.vector_store %arg14[%c0_96, %c0_97, %c0_98], %90 {strides = array<i32>} : memref<8x16x36xf32, #tpu.memory_space<vmem>>, vector<8x16x4xf32>,
        %c0_i32_99 = arith.constant 0 : i32
        %92 = arith.addi %87, %c0_i32_99 : i32
        %93 = arith.index_cast %92 : i32 to index
        %c1_100 = arith.constant 1 : index
        %c0_101 = arith.constant 0 : index
        %94 = vector.load %arg13[%93, %c1_100, %c0_101] : memref<18x18x4xf32, #tpu.memory_space<vmem>>, vector<8x16x4xf32>
        %c0_102 = arith.constant 0 : index
        %c0_103 = arith.constant 0 : index
        %c4 = arith.constant 4 : index
        %95 = vector.load %arg14[%c0_102, %c0_103, %c4] : memref<8x16x36xf32, #tpu.memory_space<vmem>>, vector<8x16x4xf32>
        tpu.vector_store %arg14[%c0_102, %c0_103, %c4], %94 {strides = array<i32>} : memref<8x16x36xf32, #tpu.memory_space<vmem>>, vector<8x16x4xf32>,
        %c0_i32_104 = arith.constant 0 : i32
        %96 = arith.addi %87, %c0_i32_104 : i32
        %97 = arith.index_cast %96 : i32 to index
        %c2 = arith.constant 2 : index
        %c0_105 = arith.constant 0 : index
        %98 = vector.load %arg13[%97, %c2, %c0_105] : memref<18x18x4xf32, #tpu.memory_space<vmem>>, vector<8x16x4xf32>
        %c0_106 = arith.constant 0 : index
        %c0_107 = arith.constant 0 : index
        %c8 = arith.constant 8 : index
        %99 = vector.load %arg14[%c0_106, %c0_107, %c8] : memref<8x16x36xf32, #tpu.memory_space<vmem>>, vector<8x16x4xf32>
        tpu.vector_store %arg14[%c0_106, %c0_107, %c8], %98 {strides = array<i32>} : memref<8x16x36xf32, #tpu.memory_space<vmem>>, vector<8x16x4xf32>,
        %c1_i32_108 = arith.constant 1 : i32
        %100 = arith.addi %87, %c1_i32_108 : i32
        %101 = arith.index_cast %100 : i32 to index
        %c0_109 = arith.constant 0 : index
        %c0_110 = arith.constant 0 : index
        %102 = vector.load %arg13[%101, %c0_109, %c0_110] : memref<18x18x4xf32, #tpu.memory_space<vmem>>, vector<8x16x4xf32>
        %c0_111 = arith.constant 0 : index
        %c0_112 = arith.constant 0 : index
        %c12 = arith.constant 12 : index
        %103 = vector.load %arg14[%c0_111, %c0_112, %c12] : memref<8x16x36xf32, #tpu.memory_space<vmem>>, vector<8x16x4xf32>
        tpu.vector_store %arg14[%c0_111, %c0_112, %c12], %102 {strides = array<i32>} : memref<8x16x36xf32, #tpu.memory_space<vmem>>, vector<8x16x4xf32>,
        %c1_i32_113 = arith.constant 1 : i32
        %104 = arith.addi %87, %c1_i32_113 : i32
        %105 = arith.index_cast %104 : i32 to index
        %c1_114 = arith.constant 1 : index
        %c0_115 = arith.constant 0 : index
        %106 = vector.load %arg13[%105, %c1_114, %c0_115] : memref<18x18x4xf32, #tpu.memory_space<vmem>>, vector<8x16x4xf32>
        %c0_116 = arith.constant 0 : index
        %c0_117 = arith.constant 0 : index
        %c16 = arith.constant 16 : index
        %107 = vector.load %arg14[%c0_116, %c0_117, %c16] : memref<8x16x36xf32, #tpu.memory_space<vmem>>, vector<8x16x4xf32>
        tpu.vector_store %arg14[%c0_116, %c0_117, %c16], %106 {strides = array<i32>} : memref<8x16x36xf32, #tpu.memory_space<vmem>>, vector<8x16x4xf32>,
        %c1_i32_118 = arith.constant 1 : i32
        %108 = arith.addi %87, %c1_i32_118 : i32
        %109 = arith.index_cast %108 : i32 to index
        %c2_119 = arith.constant 2 : index
        %c0_120 = arith.constant 0 : index
        %110 = vector.load %arg13[%109, %c2_119, %c0_120] : memref<18x18x4xf32, #tpu.memory_space<vmem>>, vector<8x16x4xf32>
        %c0_121 = arith.constant 0 : index
        %c0_122 = arith.constant 0 : index
        %c20 = arith.constant 20 : index
        %111 = vector.load %arg14[%c0_121, %c0_122, %c20] : memref<8x16x36xf32, #tpu.memory_space<vmem>>, vector<8x16x4xf32>
        tpu.vector_store %arg14[%c0_121, %c0_122, %c20], %110 {strides = array<i32>} : memref<8x16x36xf32, #tpu.memory_space<vmem>>, vector<8x16x4xf32>,
        %c2_i32_123 = arith.constant 2 : i32
        %112 = arith.addi %87, %c2_i32_123 : i32
        %113 = arith.index_cast %112 : i32 to index
        %c0_124 = arith.constant 0 : index
        %c0_125 = arith.constant 0 : index
        %114 = vector.load %arg13[%113, %c0_124, %c0_125] : memref<18x18x4xf32, #tpu.memory_space<vmem>>, vector<8x16x4xf32>
        %c0_126 = arith.constant 0 : index
        %c0_127 = arith.constant 0 : index
        %c24 = arith.constant 24 : index
        %115 = vector.load %arg14[%c0_126, %c0_127, %c24] : memref<8x16x36xf32, #tpu.memory_space<vmem>>, vector<8x16x4xf32>
        tpu.vector_store %arg14[%c0_126, %c0_127, %c24], %114 {strides = array<i32>} : memref<8x16x36xf32, #tpu.memory_space<vmem>>, vector<8x16x4xf32>,
        %c2_i32_128 = arith.constant 2 : i32
        %116 = arith.addi %87, %c2_i32_128 : i32
        %117 = arith.index_cast %116 : i32 to index
        %c1_129 = arith.constant 1 : index
        %c0_130 = arith.constant 0 : index
        %118 = vector.load %arg13[%117, %c1_129, %c0_130] : memref<18x18x4xf32, #tpu.memory_space<vmem>>, vector<8x16x4xf32>
        %c0_131 = arith.constant 0 : index
        %c0_132 = arith.constant 0 : index
        %c28 = arith.constant 28 : index
        %119 = vector.load %arg14[%c0_131, %c0_132, %c28] : memref<8x16x36xf32, #tpu.memory_space<vmem>>, vector<8x16x4xf32>
        tpu.vector_store %arg14[%c0_131, %c0_132, %c28], %118 {strides = array<i32>} : memref<8x16x36xf32, #tpu.memory_space<vmem>>, vector<8x16x4xf32>,
        %c2_i32_133 = arith.constant 2 : i32
        %120 = arith.addi %87, %c2_i32_133 : i32
        %121 = arith.index_cast %120 : i32 to index
        %c2_134 = arith.constant 2 : index
        %c0_135 = arith.constant 0 : index
        %122 = vector.load %arg13[%121, %c2_134, %c0_135] : memref<18x18x4xf32, #tpu.memory_space<vmem>>, vector<8x16x4xf32>
        %c0_136 = arith.constant 0 : index
        %c0_137 = arith.constant 0 : index
        %c32 = arith.constant 32 : index
        %123 = vector.load %arg14[%c0_136, %c0_137, %c32] : memref<8x16x36xf32, #tpu.memory_space<vmem>>, vector<8x16x4xf32>
        tpu.vector_store %arg14[%c0_136, %c0_137, %c32], %122 {strides = array<i32>} : memref<8x16x36xf32, #tpu.memory_space<vmem>>, vector<8x16x4xf32>,
        %c0_138 = arith.constant 0 : index
        %c0_139 = arith.constant 0 : index
        %c0_140 = arith.constant 0 : index
        %124 = vector.load %arg14[%c0_138, %c0_139, %c0_140] : memref<8x16x36xf32, #tpu.memory_space<vmem>>, vector<8x16x36xf32>
        %125 = vector.shape_cast %124 : vector<8x16x36xf32> to vector<128x36xf32>
        %cst_141 = arith.constant dense<0.000000e+00> : vector<128x4xf32>
        %126 = tpu.matmul %125, %67, %cst_141 {dimension_numbers = #tpu.dot_dimension_numbers<[1], [0], [0], [1], [0, 0, 1, 1], [], []>} : vector<128x36xf32>, vector<36x4xf32>, vector<128x4xf32> -> vector<128x4xf32>
        %127 = vector.broadcast %68 : vector<1x4xf32> to vector<128x4xf32>
        %128 = arith.addf %126, %127 : vector<128x4xf32>
        %129 = vector.shape_cast %128 : vector<128x4xf32> to vector<8x16x4xf32>
        %130 = arith.index_cast %87 : i32 to index
        %c0_142 = arith.constant 0 : index
        %c0_143 = arith.constant 0 : index
        %131 = vector.load %arg12[%130, %c0_142, %c0_143] : memref<16x16x4xf32, #tpu.memory_space<vmem>>, vector<8x16x4xf32>
        tpu.vector_store %arg12[%130, %c0_142, %c0_143], %129 {strides = array<i32>} : memref<16x16x4xf32, #tpu.memory_space<vmem>>, vector<8x16x4xf32>,
      }
      %c2_i32_79 = arith.constant 2 : i32
      %c0_80 = arith.constant 0 : index
      %c0_81 = arith.constant 0 : index
      %c0_82 = arith.constant 0 : index
      %c0_83 = arith.constant 0 : index
      %78 = vector.load %arg2[%c0_80, %c0_81, %c0_82, %c0_83] : memref<1x16x16x4xf32, #tpu.memory_space<vmem>>, vector<1x16x16x4xf32>
      %79 = vector.shape_cast %78 : vector<1x16x16x4xf32> to vector<16x16x4xf32>
      %c0_84 = arith.constant 0 : index
      %c0_85 = arith.constant 0 : index
      %c0_86 = arith.constant 0 : index
      %80 = vector.load %arg12[%c0_84, %c0_85, %c0_86] : memref<16x16x4xf32, #tpu.memory_space<vmem>>, vector<16x16x4xf32>
      %81 = arith.addf %79, %80 : vector<16x16x4xf32>
      %82 = vector.shape_cast %81 : vector<16x16x4xf32> to vector<1x16x16x4xf32>
      %c0_87 = arith.constant 0 : index
      %c0_88 = arith.constant 0 : index
      %c0_89 = arith.constant 0 : index
      %c0_90 = arith.constant 0 : index
      %83 = vector.load %arg10[%c0_87, %c0_88, %c0_89, %c0_90] : memref<1x16x16x4xf32, #tpu.memory_space<vmem>>, vector<1x16x16x4xf32>
      tpu.vector_store %arg10[%c0_87, %c0_88, %c0_89, %c0_90], %82 {strides = array<i32>} : memref<1x16x16x4xf32, #tpu.memory_space<vmem>>, vector<1x16x16x4xf32>,
    } else {
    }
    return
  }
  func.func @transform_0(%arg0: i32, %arg1: i32) -> (i32, i32, i32, i32) {
    %c0_i32 = arith.constant 0 : i32
    %c0_i32_0 = arith.constant 0 : i32
    %c0_i32_1 = arith.constant 0 : i32
    %c0_i32_2 = arith.constant 0 : i32
    return %arg0, %c0_i32, %c0_i32_0, %c0_i32_1 : i32, i32, i32, i32
  }
  func.func @transform_1(%arg0: i32, %arg1: i32) -> (i32, i32, i32, i32) {
    %c0_i32 = arith.constant 0 : i32
    %c0_i32_0 = arith.constant 0 : i32
    %c0_i32_1 = arith.constant 0 : i32
    %c0_i32_2 = arith.constant 0 : i32
    return %arg1, %c0_i32, %c0_i32_0, %c0_i32_1 : i32, i32, i32, i32
  }
  func.func @transform_2(%arg0: i32, %arg1: i32) -> (i32, i32, i32) {
    %c0_i32 = arith.constant 0 : i32
    %c0_i32_0 = arith.constant 0 : i32
    %c0_i32_1 = arith.constant 0 : i32
    return %arg1, %c0_i32, %c0_i32_0 : i32, i32, i32
  }
  func.func @transform_3(%arg0: i32, %arg1: i32) -> (i32, i32, i32) {
    %c0_i32 = arith.constant 0 : i32
    %c0_i32_0 = arith.constant 0 : i32
    %c0_i32_1 = arith.constant 0 : i32
    return %arg1, %c0_i32, %c0_i32_0 : i32, i32, i32
  }
  func.func @transform_4(%arg0: i32, %arg1: i32) -> (i32, i32, i32) {
    %c0_i32 = arith.constant 0 : i32
    %c0_i32_0 = arith.constant 0 : i32
    %c0_i32_1 = arith.constant 0 : i32
    return %arg1, %c0_i32, %c0_i32_0 : i32, i32, i32
  }
  func.func @transform_5(%arg0: i32, %arg1: i32) -> (i32, i32, i32) {
    %c0_i32 = arith.constant 0 : i32
    %c0_i32_0 = arith.constant 0 : i32
    %c0_i32_1 = arith.constant 0 : i32
    return %arg1, %c0_i32, %c0_i32_0 : i32, i32, i32
  }
  func.func @transform_6(%arg0: i32, %arg1: i32) -> (i32, i32) {
    %c0_i32 = arith.constant 0 : i32
    %c0_i32_0 = arith.constant 0 : i32
    %c0_i32_1 = arith.constant 0 : i32
    return %c0_i32, %c0_i32_0 : i32, i32
  }
  func.func @transform_7(%arg0: i32, %arg1: i32) -> (i32, i32) {
    %c0_i32 = arith.constant 0 : i32
    %c0_i32_0 = arith.constant 0 : i32
    %c0_i32_1 = arith.constant 0 : i32
    return %c0_i32, %c0_i32_0 : i32, i32
  }
  func.func @transform_8(%arg0: i32, %arg1: i32) -> (i32, i32, i32, i32) {
    %c0_i32 = arith.constant 0 : i32
    %c0_i32_0 = arith.constant 0 : i32
    %c0_i32_1 = arith.constant 0 : i32
    %c0_i32_2 = arith.constant 0 : i32
    return %arg0, %c0_i32, %c0_i32_0, %c0_i32_1 : i32, i32, i32, i32
  }
}

</mosaic_0001>

<bundles_post_ra>
// kernel: tpu_custom_call.1
= control target key start
LH: loop header
LB: loop body
LE: loop exit
PB: predicated region body
PF: predicated region fallthrough
CT: control target
= control target key end

     0   :  { %s6165_s27 = smov 0   ;;  %s6167_s28 = smov 0   ;;  %s8599_s0 = inlined_call_operand.vmem [shape: f32[2,16,16,4], index: 0, kind: input, shape index: {}]   ;;  %s8600_s1 = inlined_call_operand.vmem [shape: f32[2,2,36,4], index: 1, kind: input, shape index: {}]   ;;  %s8601_s2 = inlined_call_operand.vmem [shape: f32[2,3,4], index: 2, kind: input, shape index: {}]   ;;  %s8602_s3 = inlined_call_operand.vmem [shape: f32[2,4,2], index: 3, kind: input, shape index: {}]   ;;  %s8603_s4 = inlined_call_operand.vmem [shape: f32[2,2,4], index: 4, kind: input, shape index: {}]   ;;  %s8604_s5 = inlined_call_operand.vmem [shape: f32[2,1,2], index: 5, kind: input, shape index: {}]   ;;  %s8605_s6 = inlined_call_operand.vmem [shape: f32[36,4], index: 6, kind: input, shape index: {}]   ;;  %s8606_s7 = inlined_call_operand.vmem [shape: f32[1,4], index: 7, kind: input, shape index: {}]   ;;  %s8607_s8 = inlined_call_operand.vmem [shape: f32[2,16,16,4], index: 8, kind: output, shape index: {}]  }
   0x1   :  { %8609 = sst [smem:[#allocation15_spill]] %s8599_s0  ;;  %s6169_s29 = smov 0  }
   0x2   :  { %s6171_s30 = smov 0   ;;  %s6173_s9 = smov 0  }
   0x3 LB: > { %8610 = sst [smem:[#allocation6_spill]] %s6076_s30  ;;  %s27_s10 = sadd.s32 1, %s6072_s29  ;;  %s6080_s9 = sphi %s6173_s9, %s18_s9   ;;  %s6076_s30 = sphi %s6171_s30, %s8628_s30   ;;  %s6072_s29 = sphi %s6169_s29, %s8630_s29   ;;  %s6068_s28 = sphi %s6167_s28, %s8626_s28   ;;  %s6064_s27 = sphi %s6165_s27, %s8629_s27  }
   0x4   : > { %s30_s11 = sadd.s32 1, %s6076_s30  ;;  %p28_p0 = scmp.ge.s32.totalorder %s27_s10, 2 }
   0x5   : > { %p5330_p1 = scmp.ge.s32.totalorder %s6080_s9, 1  ;;  %p319_p2 = scmp.lt.s32.totalorder %s6080_s9, 5 }
   0x6   : > { %s8632_s10 = smov (%p28_p0, %s27_s10), 0  ;;  %s8634_s11 = smov (!%p28_p0, %s30_s11), %s6076_s30 }
   0x7   : > { %8611 = sst [smem:[#allocation7_spill]] %s8632_s10  ;;  %p320_p3 = pnand %p5330_p1, %p319_p2 }
   0x8   : > { %p32_p4 = scmp.ge.s32.totalorder %s8634_s11, 2 }
   0x9   : > { %323 = sbr.rel (%p320_p3) target bundleno = 2544 (0x9f0), region = 52 }
   0xa   : > { %s8636_s11 = smov (%p32_p4, %s8634_s11), 0 }
   0xb   : > { %8612 = sst [smem:[#allocation8_spill]] %s8636_s11 }
  0x10   : > { %p373_p5 = scmp.lt.s32.totalorder %s6068_s28, 1  ;;  %p378_p6 = scmp.lt.s32.totalorder %s6064_s27, 1 }
  0x11   : > { %s8613_s0 = sld [smem:[#allocation15_spill]]  ;;  %p5339_p7 = scmp.ne.s32.totalorder %s6064_s27, 0 }
  0x12   : > { %s8638_s28 = smov (!%p373_p5, %s6068_s28), 1  ;;  %vm439_vm0 = vcmask (!%p5339_p7), 31744  }
  0x13   : > { %s6199_s12 = scalar_select %p378_p6, %s6064_s27, 1 }
  0x14   : > { %s5709_s13 = sshll.u32 %s8638_s28, 8  ;;  %406 = sbr.rel (%p5339_p7) target bundleno = 41 (0x29), region = 56 }
  0x15   : > { %s5935_s17 = smul.u32 80, %s6199_s12  ;;  %s5334_s18 = sshll.u32 %s6199_s12, 2 }
  0x16   : > { %s5336_s19 = sshll.u32 %s6199_s12, 1  ;;  %s6217_s25 = scalar_lea.vmem %s8601_s2, %s5334_s18 }
  0x17   : > { %s6204_s16 = scalar_lea.vmem %s8613_s0, %s5709_s13  ;;  %s6212_s22 = scalar_lea.vmem %s8600_s1, %s5935_s17 }
  0x18   : > { %s6222_s11 = scalar_lea.vmem %s8602_s3, %s5334_s18  ;;  %s6227_s0 = scalar_lea.vmem %s8603_s4, %s5336_s19  ;;  %v407_v0 = vld [vmem:[%s6204_s16] sm:$0xff] (!%p5339_p7)  ;;  %v408_v1 = vld [vmem:[%s6204_s16 + $0x8] sm:$0xff] (!%p5339_p7)  ;;  %v409_v2 = vld [vmem:[%s6204_s16 + $0x10] sm:$0xff] (!%p5339_p7) }
  0x19   : > { %s397_s17 = scalar_lea.vmem %s8604_s5, %s6199_s12  ;;  %s6236_s23 = scalar_lea.vmem %s8607_s8, %s5709_s13  ;;  %440 = vst.msk [vmem:[#allocation2] sm:$0xff] (!%p5339_p7), %vm439_vm0, %v407_v0  ;;  %441 = vst.msk [vmem:[#allocation2 + $0x8] sm:$0xff] (!%p5339_p7), %vm439_vm0, %v408_v1  ;;  %v410_v3 = vld [vmem:[%s6204_s16 + $0x18] sm:$0xff] (!%p5339_p7)  ;;  %v411_v4 = vld [vmem:[%s6204_s16 + $0x20] sm:$0xff] (!%p5339_p7) }
  0x1a   : > { %442 = vst.msk [vmem:[#allocation2 + $0x10] sm:$0xff] (!%p5339_p7), %vm439_vm0, %v409_v2  ;;  %v412_v5 = vld [vmem:[%s6204_s16 + $0x28] sm:$0xff] (!%p5339_p7)  ;;  %443 = vst.msk [vmem:[#allocation2 + $0x18] sm:$0xff] (!%p5339_p7), %vm439_vm0, %v410_v3  ;;  %v413_v6 = vld [vmem:[%s6204_s16 + $0x30] sm:$0xff] (!%p5339_p7) }
  0x1b   : > { %444 = vst.msk [vmem:[#allocation2 + $0x20] sm:$0xff] %vm439_vm0, %v411_v4  ;;  %445 = vst.msk [vmem:[#allocation2 + $0x28] sm:$0xff] %vm439_vm0, %v412_v5  ;;  %v414_v7 = vld [vmem:[%s6204_s16 + $0x38] sm:$0xff]  ;;  %v415_v8 = vld [vmem:[%s6204_s16 + $0x40] sm:$0xff] }
  0x1c   : > { %446 = vst.msk [vmem:[#allocation2 + $0x30] sm:$0xff] %vm439_vm0, %v413_v6  ;;  %447 = vst.msk [vmem:[#allocation2 + $0x38] sm:$0xff] %vm439_vm0, %v414_v7  ;;  %v416_v9 = vld [vmem:[%s6204_s16 + $0x48] sm:$0xff]  ;;  %v417_v10 = vld [vmem:[%s6204_s16 + $0x50] sm:$0xff] }
  0x1d   : > { %448 = vst.msk [vmem:[#allocation2 + $0x40] sm:$0xff] %vm439_vm0, %v415_v8  ;;  %v418_v11 = vld [vmem:[%s6204_s16 + $0x58] sm:$0xff]  ;;  %449 = vst.msk [vmem:[#allocation2 + $0x48] sm:$0xff] %vm439_vm0, %v416_v9  ;;  %v419_v12 = vld [vmem:[%s6204_s16 + $0x60] sm:$0xff] }
  0x1e   : > { %450 = vst.msk [vmem:[#allocation2 + $0x50] sm:$0xff] %vm439_vm0, %v417_v10  ;;  %451 = vst.msk [vmem:[#allocation2 + $0x58] sm:$0xff] %vm439_vm0, %v418_v11  ;;  %v420_v13 = vld [vmem:[%s6204_s16 + $0x68] sm:$0xff]  ;;  %v421_v14 = vld [vmem:[%s6204_s16 + $0x70] sm:$0xff] }
  0x1f   : > { %452 = vst.msk [vmem:[#allocation2 + $0x60] sm:$0xff] %vm439_vm0, %v419_v12  ;;  %453 = vst.msk [vmem:[#allocation2 + $0x68] sm:$0xff] %vm439_vm0, %v420_v13  ;;  %v422_v15 = vld [vmem:[%s6204_s16 + $0x78] sm:$0xff]  ;;  %v423_v16 = vld [vmem:[%s6204_s16 + $0x80] sm:$0xff] }
  0x20   : > { %454 = vst.msk [vmem:[#allocation2 + $0x70] sm:$0xff] %vm439_vm0, %v421_v14  ;;  %v424_v17 = vld [vmem:[%s6204_s16 + $0x88] sm:$0xff]  ;;  %455 = vst.msk [vmem:[#allocation2 + $0x78] sm:$0xff] %vm439_vm0, %v422_v15  ;;  %v425_v18 = vld [vmem:[%s6204_s16 + $0x90] sm:$0xff] }
  0x21   : > { %456 = vst.msk [vmem:[#allocation2 + $0x80] sm:$0xff] %vm439_vm0, %v423_v16  ;;  %457 = vst.msk [vmem:[#allocation2 + $0x88] sm:$0xff] %vm439_vm0, %v424_v17  ;;  %v426_v19 = vld [vmem:[%s6204_s16 + $0x98] sm:$0xff]  ;;  %v427_v20 = vld [vmem:[%s6204_s16 + $0xa0] sm:$0xff] }
  0x22   : > { %458 = vst.msk [vmem:[#allocation2 + $0x90] sm:$0xff] %vm439_vm0, %v425_v18  ;;  %459 = vst.msk [vmem:[#allocation2 + $0x98] sm:$0xff] %vm439_vm0, %v426_v19  ;;  %v428_v21 = vld [vmem:[%s6204_s16 + $0xa8] sm:$0xff]  ;;  %v429_v22 = vld [vmem:[%s6204_s16 + $0xb0] sm:$0xff] }
  0x23   : > { %460 = vst.msk [vmem:[#allocation2 + $0xa0] sm:$0xff] %vm439_vm0, %v427_v20  ;;  %v430_v23 = vld [vmem:[%s6204_s16 + $0xb8] sm:$0xff]  ;;  %461 = vst.msk [vmem:[#allocation2 + $0xa8] sm:$0xff] %vm439_vm0, %v428_v21  ;;  %v431_v24 = vld [vmem:[%s6204_s16 + $0xc0] sm:$0xff] }
  0x24   : > { %462 = vst.msk [vmem:[#allocation2 + $0xb0] sm:$0xff] %vm439_vm0, %v429_v22  ;;  %463 = vst.msk [vmem:[#allocation2 + $0xb8] sm:$0xff] %vm439_vm0, %v430_v23  ;;  %v432_v25 = vld [vmem:[%s6204_s16 + $0xc8] sm:$0xff]  ;;  %v433_v26 = vld [vmem:[%s6204_s16 + $0xd0] sm:$0xff] }
  0x25   : > { %464 = vst.msk [vmem:[#allocation2 + $0xc0] sm:$0xff] %vm439_vm0, %v431_v24  ;;  %465 = vst.msk [vmem:[#allocation2 + $0xc8] sm:$0xff] %vm439_vm0, %v432_v25  ;;  %v434_v27 = vld [vmem:[%s6204_s16 + $0xd8] sm:$0xff]  ;;  %v435_v28 = vld [vmem:[%s6204_s16 + $0xe0] sm:$0xff] }
  0x26   : > { %466 = vst.msk [vmem:[#allocation2 + $0xd0] sm:$0xff] %vm439_vm0, %v433_v26  ;;  %v436_v29 = vld [vmem:[%s6204_s16 + $0xe8] sm:$0xff]  ;;  %467 = vst.msk [vmem:[#allocation2 + $0xd8] sm:$0xff] %vm439_vm0, %v434_v27  ;;  %v437_v30 = vld [vmem:[%s6204_s16 + $0xf0] sm:$0xff] }
  0x27   : > { %468 = vst.msk [vmem:[#allocation2 + $0xe0] sm:$0xff] %vm439_vm0, %v435_v28  ;;  %469 = vst.msk [vmem:[#allocation2 + $0xe8] sm:$0xff] %vm439_vm0, %v436_v29  ;;  %v438_v31 = vld [vmem:[%s6204_s16 + $0xf8] sm:$0xff] }
  0x28   : > { %470 = vst.msk [vmem:[#allocation2 + $0xf0] sm:$0xff] %vm439_vm0, %v437_v30  ;;  %471 = vst.msk [vmem:[#allocation2 + $0xf8] sm:$0xff] %vm439_vm0, %v438_v31 }
  0x29 PF: > { %v6304_v32 = vld [vmem:[%s6212_s22] sm:$0xff]  ;;  %v6307_v33 = vld [vmem:[%s6212_s22 + $0x8] sm:$0xff]  ;;  %v6310_v34 = vld [vmem:[%s6212_s22 + $0x10] sm:$0xff]  ;;  %vm582_vm1 = vcmask 1040384   ;;  %vm744_vm2 = vcmask 31744   ;;  %vm747_vm3 = vcmask 25600  }
  0x2a   : > { %v6313_v35 = vld [vmem:[%s6212_s22 + $0x18] sm:$0xff]  ;;  %v6316_v36 = vld [vmem:[%s6212_s22 + $0x20] sm:$0xf]  ;;  %v6319_v37 = vld [vmem:[%s6212_s22 + $0x28] sm:$0xff] }
  0x2b   : > { %v6322_v38 = vld [vmem:[%s6212_s22 + $0x30] sm:$0xff]  ;;  %v6325_v39 = vld [vmem:[%s6212_s22 + $0x38] sm:$0xff]  ;;  %v6328_v40 = vld [vmem:[%s6212_s22 + $0x40] sm:$0xff] }
  0x2c   : > { %v6331_v41 = vld [vmem:[%s6212_s22 + $0x48] sm:$0xf]  ;;  %v6334_v42 = vld [vmem:[%s6217_s25] sm:$0x7]  ;;  %v492_v62 = vld [vmem:[#allocation2 + $0x30] sm:$0xff] }
  0x2d   : > { %v6337_v43 = vld [vmem:[%s6222_s11] sm:$0xf]  ;;  %v493_v63 = vld [vmem:[#allocation2 + $0x38] sm:$0xff]  ;;  %v495_v9 = vld [vmem:[#allocation2 + $0x48] sm:$0xff]  ;;  %v537_v11 = vrot.slane %v492_v62, 1  ;;  %v592_v12 = vrot.slane %v492_v62, 7 }
  0x2e   : > { %v6340_v44 = vld [vmem:[%s6227_s0] sm:$0x3]  ;;  %v487_v49 = vld [vmem:[#allocation2 + $0x8] sm:$0xff]  ;;  %v593_v13 = vrot.slane %v493_v63, 7  ;;  %v496_v14 = vld [vmem:[#allocation2 + $0x50] sm:$0xff]  ;;  %v682_v17 = vrot.slane %v493_v63, 5 }
  0x2f   : > { %v6347_v45 = vld [vmem:[%s397_s17] sm:$0x1]  ;;  %v488_v50 = vld [vmem:[#allocation2 + $0x10] sm:$0xff]  ;;  %v489_v51 = vld [vmem:[#allocation2 + $0x18] sm:$0xff]  ;;  %v584_v52 = vrot.slane %v487_v49, 7  ;;  %v679_v53 = vrot.slane %v487_v49, 5  ;;  %v714_v20 = vsel %vm582_vm1, %v537_v11, %v592_v12 }
  0x30   : > { %v486_v46 = vld [vmem:[#allocation2] sm:$0xff]  ;;  %v535_v54 = vrot.slane %v488_v50, 1  ;;  %v586_v55 = vrot.slane %v488_v50, 7  ;;  %v491_v57 = vld [vmem:[#allocation2 + $0x28] sm:$0xff]  ;;  %v587_v59 = vrot.slane %v489_v51, 7  ;;  %v680_v60 = vrot.slane %v489_v51, 5 }
  0x31   : > { %v534_v47 = vrot.slane %v486_v46, 1  ;;  %v583_v48 = vrot.slane %v486_v46, 7  ;;  %v490_v56 = vld [vmem:[#allocation2 + $0x20] sm:$0xff]  ;;  %v727_v1 = vsel %vm582_vm1, %v584_v52, %v679_v53  ;;  %v590_v7 = vrot.slane %v491_v57, 7  ;;  %v497_v19 = vld [vmem:[#allocation2 + $0x58] sm:$0xff]  ;;  %755 = vst.msk [vmem:[#allocation4 + $0x60] sm:$0xff] %vm744_vm2, %v714_v20 }
  0x32   : > { %v536_v61 = vrot.slane %v490_v56, 1  ;;  %v712_v2 = vsel %vm582_vm1, %v535_v54, %v586_v55  ;;  %v589_v3 = vrot.slane %v490_v56, 7  ;;  %v494_v4 = vld [vmem:[#allocation2 + $0x40] sm:$0xff]  ;;  %748 = vst.msk [vmem:[#allocation4 + $0x28] sm:$0x3] %vm747_vm3, %v727_v1  ;;  %v588_v5 = vsel %vm582_vm1, %v586_v55, %v587_v59  ;;  %v499_v29 = vld [vmem:[#allocation2 + $0x68] sm:$0xff] }
  0x33   : > { %v711_v58 = vsel %vm582_vm1, %v534_v47, %v583_v48  ;;  %v585_v0 = vsel %vm582_vm1, %v583_v48, %v584_v52  ;;  %749 = vst.msk [vmem:[#allocation4 + $0x30] sm:$0xff] %vm744_vm2, %v712_v2  ;;  %794 = vst.msk [vmem:[#allocation4] sm:$0xff] %vm744_vm2, %v712_v2  ;;  %v728_v6 = vsel %vm582_vm1, %v587_v59, %v680_v60  ;;  %v681_v8 = vrot.slane %v491_v57, 5  ;;  %v498_v24 = vld [vmem:[#allocation2 + $0x60] sm:$0xff]  ;;  %v500_v48 = vld [vmem:[#allocation2 + $0x70] sm:$0xff]  ;;  %s6451_s0 = smov 0  }
  0x34   : > { %745 = vst.msk [vmem:[#allocation4 + $0x18] sm:$0xff] %vm744_vm2, %v711_v58  ;;  %746 = vst.msk [vmem:[#allocation4 + $0x20] sm:$0xff] %vm744_vm2, %v585_v0  ;;  %v713_v10 = vsel %vm582_vm1, %v536_v61, %v589_v3  ;;  %v591_v15 = vsel %vm582_vm1, %v589_v3, %v590_v7  ;;  %v538_v18 = vrot.slane %v494_v4, 1  ;;  %v594_v21 = vsel %vm582_vm1, %v592_v12, %v593_v13  ;;  %v501_v49 = vld [vmem:[#allocation2 + $0x78] sm:$0xff]  ;;  %v502_v54 = vld [vmem:[#allocation2 + $0x80] sm:$0xff] }
  0x35   : > { %750 = vst.msk [vmem:[#allocation4 + $0x38] sm:$0xff] %vm744_vm2, %v588_v5  ;;  %795 = vst.msk [vmem:[#allocation4 + $0x8] sm:$0xff] %vm744_vm2, %v588_v5  ;;  %v729_v16 = vsel %vm582_vm1, %v590_v7, %v681_v8  ;;  %v595_v22 = vrot.slane %v494_v4, 7  ;;  %v596_v23 = vrot.slane %v495_v9, 7  ;;  %v730_v25 = vsel %vm582_vm1, %v593_v13, %v682_v17  ;;  %v503_v59 = vld [vmem:[#allocation2 + $0x88] sm:$0xff]  ;;  %v504_v0 = vld [vmem:[#allocation2 + $0x90] sm:$0xff] }
  0x36   : > { %751 = vst.msk [vmem:[#allocation4 + $0x40] sm:$0x3] %vm747_vm3, %v728_v6  ;;  %796 = vst.msk [vmem:[#allocation4 + $0x10] sm:$0x3] %vm747_vm3, %v728_v6  ;;  %v683_v26 = vrot.slane %v495_v9, 5  ;;  %v539_v27 = vrot.slane %v496_v14, 1 }
  0x37   : > { %752 = vst.msk [vmem:[#allocation4 + $0x48] sm:$0xff] %vm744_vm2, %v713_v10  ;;  %753 = vst.msk [vmem:[#allocation4 + $0x50] sm:$0xff] %vm744_vm2, %v591_v15  ;;  %v598_v28 = vrot.slane %v496_v14, 7  ;;  %v715_v30 = vsel %vm582_vm1, %v538_v18, %v595_v22  ;;  %v597_v31 = vsel %vm582_vm1, %v595_v22, %v596_v23  ;;  %v599_v46 = vrot.slane %v497_v19, 7  ;;  %v505_v5 = vld [vmem:[#allocation2 + $0x98] sm:$0xff]  ;;  %v506_v10 = vld [vmem:[#allocation2 + $0xa0] sm:$0xff] }
  0x38   : > { %754 = vst.msk [vmem:[#allocation4 + $0x58] sm:$0x3] %vm747_vm3, %v729_v16  ;;  %757 = vst.msk [vmem:[#allocation4 + $0x70] sm:$0x3] %vm747_vm3, %v730_v25  ;;  %v684_v47 = vrot.slane %v497_v19, 5  ;;  %v731_v50 = vsel %vm582_vm1, %v596_v23, %v683_v26  ;;  %v540_v52 = vrot.slane %v498_v24, 1 }
  0x39   : > { %756 = vst.msk [vmem:[#allocation4 + $0x68] sm:$0xff] %vm744_vm2, %v594_v21  ;;  %758 = vst.msk [vmem:[#allocation4 + $0x78] sm:$0xff] %vm744_vm2, %v715_v30  ;;  %v716_v51 = vsel %vm582_vm1, %v539_v27, %v598_v28  ;;  %v601_v53 = vrot.slane %v498_v24, 7  ;;  %v600_v55 = vsel %vm582_vm1, %v598_v28, %v599_v46  ;;  %v602_v57 = vrot.slane %v499_v29, 7  ;;  %v507_v15 = vld [vmem:[#allocation2 + $0xa8] sm:$0xff]  ;;  %v508_v20 = vld [vmem:[#allocation2 + $0xb0] sm:$0xff] }
  0x3a   : > { %759 = vst.msk [vmem:[#allocation4 + $0x80] sm:$0xff] %vm744_vm2, %v597_v31  ;;  %761 = vst.msk [vmem:[#allocation4 + $0x90] sm:$0xff] %vm744_vm2, %v716_v51  ;;  %v732_v56 = vsel %vm582_vm1, %v599_v46, %v684_v47  ;;  %v685_v58 = vrot.slane %v499_v29, 5  ;;  %v541_v61 = vrot.slane %v500_v48, 1  ;;  %v604_v62 = vrot.slane %v500_v48, 7  ;;  %v509_v21 = vld [vmem:[#allocation2 + $0xb8] sm:$0xff] }
  0x3b   : > { %760 = vst.msk [vmem:[#allocation4 + $0x88] sm:$0x3] %vm747_vm3, %v731_v50  ;;  %763 = vst.msk [vmem:[#allocation4 + $0xa0] sm:$0x3] %vm747_vm3, %v732_v56  ;;  %v717_v60 = vsel %vm582_vm1, %v540_v52, %v601_v53  ;;  %v605_v63 = vrot.slane %v501_v49, 7  ;;  %v603_v1 = vsel %vm582_vm1, %v601_v53, %v602_v57  ;;  %v686_v3 = vrot.slane %v501_v49, 5 }
  0x3c   : > { %762 = vst.msk [vmem:[#allocation4 + $0x98] sm:$0xff] %vm744_vm2, %v600_v55  ;;  %764 = vst.msk [vmem:[#allocation4 + $0xa8] sm:$0xff] %vm744_vm2, %v717_v60  ;;  %v733_v2 = vsel %vm582_vm1, %v602_v57, %v685_v58  ;;  %v542_v4 = vrot.slane %v502_v54, 1  ;;  %v718_v6 = vsel %vm582_vm1, %v541_v61, %v604_v62  ;;  %v607_v8 = vrot.slane %v502_v54, 7  ;;  %v510_v26 = vld [vmem:[#allocation2 + $0xc0] sm:$0xff]  ;;  %v511_v31 = vld [vmem:[#allocation2 + $0xc8] sm:$0xff] }
  0x3d   : > { %765 = vst.msk [vmem:[#allocation4 + $0xb0] sm:$0xff] %vm744_vm2, %v603_v1  ;;  %v606_v7 = vsel %vm582_vm1, %v604_v62, %v605_v63  ;;  %v608_v9 = vrot.slane %v503_v59, 7  ;;  %767 = vst.msk [vmem:[#allocation4 + $0xc0] sm:$0xff] %vm744_vm2, %v718_v6  ;;  %v734_v11 = vsel %vm582_vm1, %v605_v63, %v686_v3  ;;  %v687_v12 = vrot.slane %v503_v59, 5  ;;  %v512_v50 = vld [vmem:[#allocation2 + $0xd0] sm:$0xff]  ;;  %v513_v55 = vld [vmem:[#allocation2 + $0xd8] sm:$0xff] }
  0x3e   : > { %766 = vst.msk [vmem:[#allocation4 + $0xb8] sm:$0x3] %vm747_vm3, %v733_v2  ;;  %v543_v13 = vrot.slane %v504_v0, 1  ;;  %v610_v14 = vrot.slane %v504_v0, 7  ;;  %769 = vst.msk [vmem:[#allocation4 + $0xd0] sm:$0x3] %vm747_vm3, %v734_v11  ;;  %v719_v16 = vsel %vm582_vm1, %v542_v4, %v607_v8 }
  0x3f   : > { %768 = vst.msk [vmem:[#allocation4 + $0xc8] sm:$0xff] %vm744_vm2, %v606_v7  ;;  %v609_v17 = vsel %vm582_vm1, %v607_v8, %v608_v9  ;;  %v611_v18 = vrot.slane %v505_v5, 7  ;;  %v688_v19 = vrot.slane %v505_v5, 5  ;;  %770 = vst.msk [vmem:[#allocation4 + $0xd8] sm:$0xff] %vm744_vm2, %v719_v16  ;;  %v735_v22 = vsel %vm582_vm1, %v608_v9, %v687_v12  ;;  %v514_v60 = vld [vmem:[#allocation2 + $0xe0] sm:$0xff]  ;;  %v515_v1 = vld [vmem:[#allocation2 + $0xe8] sm:$0xff] }
  0x40   : > { %771 = vst.msk [vmem:[#allocation4 + $0xe0] sm:$0xff] %vm744_vm2, %v609_v17  ;;  %v720_v23 = vsel %vm582_vm1, %v543_v13, %v610_v14  ;;  %v544_v24 = vrot.slane %v506_v10, 1  ;;  %v613_v25 = vrot.slane %v506_v10, 7  ;;  %v614_v29 = vrot.slane %v507_v15, 7  ;;  %v516_v6 = vld [vmem:[#allocation2 + $0xf0] sm:$0xff]  ;;  %v517_v7 = vld [vmem:[#allocation2 + $0xf8] sm:$0xff] }
  0x41   : > { %772 = vst.msk [vmem:[#allocation4 + $0xe8] sm:$0x3] %vm747_vm3, %v735_v22  ;;  %v612_v27 = vsel %vm582_vm1, %v610_v14, %v611_v18  ;;  %v736_v28 = vsel %vm582_vm1, %v611_v18, %v688_v19  ;;  %v689_v30 = vrot.slane %v507_v15, 5  ;;  %v545_v47 = vrot.slane %v508_v20, 1 }
  0x42   : > { %773 = vst.msk [vmem:[#allocation4 + $0xf0] sm:$0xff] %vm744_vm2, %v720_v23  ;;  %774 = vst.msk [vmem:[#allocation4 + $0xf8] sm:$0xff] %vm744_vm2, %v612_v27  ;;  %v721_v46 = vsel %vm582_vm1, %v544_v24, %v613_v25  ;;  %v616_v48 = vrot.slane %v508_v20, 7  ;;  %v617_v49 = vrot.slane %v509_v21, 7  ;;  %v615_v51 = vsel %vm582_vm1, %v613_v25, %v614_v29 }
  0x43   : > { %775 = vst.msk [vmem:[#allocation4 + $0x100] sm:$0x3] %vm747_vm3, %v736_v28  ;;  %v737_v52 = vsel %vm582_vm1, %v614_v29, %v689_v30  ;;  %v690_v53 = vrot.slane %v509_v21, 5  ;;  %v546_v54 = vrot.slane %v510_v26, 1  ;;  %v619_v58 = vrot.slane %v510_v26, 7 }
  0x44   : > { %776 = vst.msk [vmem:[#allocation4 + $0x108] sm:$0xff] %vm744_vm2, %v721_v46  ;;  %777 = vst.msk [vmem:[#allocation4 + $0x110] sm:$0xff] %vm744_vm2, %v615_v51  ;;  %v722_v56 = vsel %vm582_vm1, %v545_v47, %v616_v48  ;;  %v618_v57 = vsel %vm582_vm1, %v616_v48, %v617_v49  ;;  %v620_v59 = vrot.slane %v511_v31, 7  ;;  %v691_v62 = vrot.slane %v511_v31, 5 }
  0x45   : > { %778 = vst.msk [vmem:[#allocation4 + $0x118] sm:$0x3] %vm747_vm3, %v737_v52  ;;  %v738_v61 = vsel %vm582_vm1, %v617_v49, %v690_v53  ;;  %v547_v63 = vrot.slane %v512_v50, 1  ;;  %v622_v0 = vrot.slane %v512_v50, 7  ;;  %v723_v2 = vsel %vm582_vm1, %v546_v54, %v619_v58 }
  0x46   : > { %779 = vst.msk [vmem:[#allocation4 + $0x120] sm:$0xff] %vm744_vm2, %v722_v56  ;;  %780 = vst.msk [vmem:[#allocation4 + $0x128] sm:$0xff] %vm744_vm2, %v618_v57  ;;  %v621_v3 = vsel %vm582_vm1, %v619_v58, %v620_v59  ;;  %v623_v4 = vrot.slane %v513_v55, 7  ;;  %v692_v5 = vrot.slane %v513_v55, 5  ;;  %v739_v8 = vsel %vm582_vm1, %v620_v59, %v691_v62 }
  0x47   : > { %781 = vst.msk [vmem:[#allocation4 + $0x130] sm:$0x3] %vm747_vm3, %v738_v61  ;;  %v724_v9 = vsel %vm582_vm1, %v547_v63, %v622_v0  ;;  %v548_v10 = vrot.slane %v514_v60, 1  ;;  %v625_v11 = vrot.slane %v514_v60, 7  ;;  %784 = vst.msk [vmem:[#allocation4 + $0x148] sm:$0x3] %vm747_vm3, %v739_v8 }
  0x48   : > { %782 = vst.msk [vmem:[#allocation4 + $0x138] sm:$0xff] %vm744_vm2, %v723_v2  ;;  %783 = vst.msk [vmem:[#allocation4 + $0x140] sm:$0xff] %vm744_vm2, %v621_v3  ;;  %v624_v12 = vsel %vm582_vm1, %v622_v0, %v623_v4  ;;  %v740_v13 = vsel %vm582_vm1, %v623_v4, %v692_v5  ;;  %v626_v14 = vrot.slane %v515_v1, 7  ;;  %v693_v15 = vrot.slane %v515_v1, 5 }
  0x49   : > { %785 = vst.msk [vmem:[#allocation4 + $0x150] sm:$0xff] %vm744_vm2, %v724_v9  ;;  %786 = vst.msk [vmem:[#allocation4 + $0x158] sm:$0xff] %vm744_vm2, %v624_v12  ;;  %v725_v16 = vsel %vm582_vm1, %v548_v10, %v625_v11  ;;  %v549_v17 = vrot.slane %v516_v6, 1  ;;  %v628_v18 = vrot.slane %v516_v6, 7  ;;  %v629_v19 = vrot.slane %v517_v7, 7 }
  0x4a   : > { %787 = vst.msk [vmem:[#allocation4 + $0x160] sm:$0x3] %vm747_vm3, %v740_v13  ;;  %v627_v20 = vsel %vm582_vm1, %v625_v11, %v626_v14  ;;  %v741_v21 = vsel %vm582_vm1, %v626_v14, %v693_v15  ;;  %v694_v22 = vrot.slane %v517_v7, 5 }
  0x4b   : > { %788 = vst.msk [vmem:[#allocation4 + $0x168] sm:$0xff] %vm744_vm2, %v725_v16  ;;  %798 = vst.msk [vmem:[#allocation4 + $0x198] sm:$0xff] %vm744_vm2, %v725_v16  ;;  %v726_v23 = vsel %vm582_vm1, %v549_v17, %v628_v18  ;;  %v630_v24 = vsel %vm582_vm1, %v628_v18, %v629_v19 }
  0x4c   : > { %789 = vst.msk [vmem:[#allocation4 + $0x170] sm:$0xff] %vm744_vm2, %v627_v20  ;;  %799 = vst.msk [vmem:[#allocation4 + $0x1a0] sm:$0xff] %vm744_vm2, %v627_v20  ;;  %v742_v25 = vsel %vm582_vm1, %v629_v19, %v694_v22 }
  0x4d   : > { %790 = vst.msk [vmem:[#allocation4 + $0x178] sm:$0x3] %vm747_vm3, %v741_v21  ;;  %800 = vst.msk [vmem:[#allocation4 + $0x1a8] sm:$0x3] %vm747_vm3, %v741_v21 }
  0x4e   : > { %791 = vst.msk [vmem:[#allocation4 + $0x180] sm:$0xff] %vm744_vm2, %v726_v23  ;;  %792 = vst.msk [vmem:[#allocation4 + $0x188] sm:$0xff] %vm744_vm2, %v630_v24 }
  0x4f   : > { %793 = vst.msk [vmem:[#allocation4 + $0x190] sm:$0x3] %vm747_vm3, %v742_v25 }
  0x50 LB: >> { %s5341_s11 = smul.u32 192, %s6084_s0  ;;  %s6094_s13 = smov 4   ;;  %v5893_v14 = vpack.c.bf16 %v6307_v33, %v6304_v32  ;;  %v5897_v15 = vpack.c.bf16 %v6313_v35, %v6310_v34  ;;  %vm1693_vm4 = vcmask 1043456   ;;  %vm922_vm5 = vcmask 64544   ;;  %s6084_s0 = sphi %s6451_s0, %s806_s0  }
  0x51   : >> { %s6095_s18 = smov 8   ;;  %s6096_s19 = smov 12   ;;  %vm1019_vm6 = vcmask 97344   ;;  %vm1119_vm7 = vcmask 130144   ;;  %vm1216_vm8 = vcmask 162944   ;;  %vm1313_vm9 = vcmask 195744  }
  0x52   : >> { %s6457_s12 = scalar_lea.vmem [#allocation4], %s5341_s11  ;;  %s6097_s22 = smov 16   ;;  %5894 = vmatprep.subr.bf16.mxu0 %v5893_v14  ;;  %5917 = vmatprep.subr.bf16.mxu1 %v5893_v14  ;;  %vm1413_vm10 = vcmask 228544   ;;  %vm1510_vm11 = vcmask 261344   ;;  %vm1607_vm12 = vcmask 294144   ;;  %vm1644_vm13 = vcmask 293888  }
  0x53   : >> { %s6098_s24 = smov 20   ;;  %s6099_s25 = smov 24   ;;  %5896 = vmatpush3.bf16.msra.mxu0 %v5893_v14  ;;  %5920 = vmatpush3.bf16.msra.mxu1 %v5893_v14 }
  0x54   : >> { %s6100_s26 = smov 28   ;;  %s6101_s28 = smov 32   ;;  %5898 = vmatprep.subr.bf16.mxu0 %v5897_v15  ;;  %5918 = vmatprep.subr.bf16.mxu1 %v5897_v15 }
  0x55   : >> { %s5711_s14 = sshll.u32 %s6084_s0, 7  ;;  %s806_s0 = sadd.s32 1, %s6084_s0  }
  0x56   : >> { %v843_v26 = vld [vmem:[%s6457_s12 + $0x9] sm:$0xff]  ;;  %v842_v27 = vld [vmem:[%s6457_s12 + $0x1] sm:$0xff]  ;;  %v6470_v30 = vld [vmem:[%s6457_s12 + $0x78] sm:$0xff]  ;;  %s6926_s15 = scalar_lea.vmem [#allocation3], %s5711_s14  ;;  %p803_p8 = scmp.ge.s32.totalorder %s806_s0, 2  }
  0x57   : >> { %876 = vrot.lane.b32.xlu1 %v843_v26, %s6094_s13  ;;  %874 = vrot.lane.b32.xlu0 %v842_v27, %s6094_s13  ;;  %v6464_v28 = vld [vmem:[%s6457_s12 + $0x69] sm:$0xff]  ;;  %v6467_v29 = vld [vmem:[%s6457_s12 + $0x61] sm:$0xff]  ;;  %836 = vst.msk [vmem:[#allocation5 + $0x50] sm:$0xff] %vm744_vm2, %v6470_v30  ;;  %s7065_s17 = smov (%p803_p8), 0  }
  0x58   : >> { %v5344_v31 = vld [vmem:[%s6457_s12 + $0x18] sm:$0xff]  ;;  %v6474_v46 = vld [vmem:[%s6457_s12 + $0x80] sm:$0xff]  ;;  %v6492_v50 = vld [vmem:[%s6457_s12 + $0x90] sm:$0xff]  ;;  %5900 = vmatpush3.bf16.msra.mxu0 %v5897_v15  ;;  %5921 = vmatpush3.bf16.msra.mxu1 %v5897_v15 }
  0x59   : >> { %v5345_v47 = vld [vmem:[%s6457_s12 + $0x20] sm:$0xff]  ;;  %828 = vst.msk [vmem:[#allocation5 + $0x10] sm:$0xff] %vm744_vm2, %v5344_v31  ;;  %837 = vst.msk [vmem:[#allocation5 + $0x58] sm:$0xff] %vm744_vm2, %v6474_v46  ;;  %v6495_v51 = vld [vmem:[%s6457_s12 + $0x30] sm:$0xff]  ;;  %5789 = vmatprep.subr.msk.mxu0 %vm1693_vm4, %v6316_v36  ;;  %5919 = vmatprep.subr.msk.mxu1 %vm1693_vm4, %v6316_v36 }
  0x5a   : >> { %829 = vst.msk [vmem:[#allocation5 + $0x18] sm:$0xff] %vm744_vm2, %v5345_v47  ;;  %v6488_v48 = vld [vmem:[%s6457_s12 + $0x62] sm:$0xff]  ;;  %v6498_v52 = vld [vmem:[%s6457_s12 + $0x98] sm:$0xff]  ;;  %838 = vst.msk [vmem:[#allocation5 + $0x60] sm:$0xff] %vm744_vm2, %v6492_v50 }
  0x5b   : >> { %892 = vrot.lane.b32.xlu1 %v6464_v28, %s6094_s13  ;;  %890 = vrot.lane.b32.xlu0 %v6467_v29, %s6094_s13  ;;  %v939_v49 = vld [vmem:[%s6457_s12 + $0x2] sm:$0xff]  ;;  %v6501_v53 = vld [vmem:[%s6457_s12 + $0x38] sm:$0xff]  ;;  %830 = vst.msk [vmem:[#allocation5 + $0x20] sm:$0xff] %vm744_vm2, %v6495_v51  ;;  %839 = vst.msk [vmem:[#allocation5 + $0x68] sm:$0xff] %vm744_vm2, %v6498_v52 }
  0x5c   : >> { %831 = vst.msk [vmem:[#allocation5 + $0x28] sm:$0xff] %vm744_vm2, %v6501_v53  ;;  %v6515_v54 = vld [vmem:[%s6457_s12 + $0x6a] sm:$0xff]  ;;  %v810_v57 = vld [vmem:[%s6457_s12] sm:$0xff]  ;;  %v5434_v12 = vld [vmem:[%s6457_s12 + $0x92] sm:$0xff]  ;;  %5790 = vmatpush3.msk.msra.mxu0 %vm1693_vm4, %v6316_v36  ;;  %5922 = vmatpush3.msk.msra.mxu1 %vm1693_vm4, %v6316_v36 }
  0x5d   : >> { %v940_v55 = vld [vmem:[%s6457_s12 + $0xa] sm:$0xff]  ;;  %826 = vst.msk [vmem:[#allocation5] sm:$0xff] %vm744_vm2, %v810_v57  ;;  %v6535_v61 = vld [vmem:[%s6457_s12 + $0x60] sm:$0xff]  ;;  %v5426_v13 = vld [vmem:[%s6457_s12 + $0x32] sm:$0xff] }
  0x5e   : >> { %v811_v56 = vld [vmem:[%s6457_s12 + $0x8] sm:$0xff]  ;;  %834 = vst.msk [vmem:[#allocation5 + $0x40] sm:$0xff] %vm744_vm2, %v6535_v61  ;;  %v6546_v62 = vld [vmem:[%s6457_s12 + $0xb0] sm:$0xff]  ;;  %v6562_v0 = vld [vmem:[%s6457_s12 + $0x79] sm:$0xff] }
  0x5f   : >> { %987 = vrot.lane.b32.xlu1 %v6488_v48, %s6095_s18  ;;  %971 = vrot.lane.b32.xlu0 %v939_v49, %s6095_s18  ;;  %827 = vst.msk [vmem:[#allocation5 + $0x8] sm:$0xff] %vm744_vm2, %v811_v56  ;;  %v6522_v58 = vld [vmem:[%s6457_s12 + $0xa8] sm:$0xff]  ;;  %v6549_v63 = vld [vmem:[%s6457_s12 + $0x50] sm:$0xff]  ;;  %841 = vst.msk [vmem:[#allocation5 + $0x78] sm:$0xff] %vm744_vm2, %v6546_v62 }
  0x60   : >> { %v6525_v59 = vld [vmem:[%s6457_s12 + $0x48] sm:$0xff]  ;;  %840 = vst.msk [vmem:[#allocation5 + $0x70] sm:$0xff] %vm744_vm2, %v6522_v58  ;;  %833 = vst.msk [vmem:[#allocation5 + $0x38] sm:$0xff] %vm744_vm2, %v6549_v63  ;;  %v5360_v1 = vld [vmem:[%s6457_s12 + $0x19] sm:$0xff] }
  0x61   : >> { %v6532_v60 = vld [vmem:[%s6457_s12 + $0x68] sm:$0xff]  ;;  %832 = vst.msk [vmem:[#allocation5 + $0x30] sm:$0xff] %vm744_vm2, %v6525_v59  ;;  %v6579_v4 = vld [vmem:[%s6457_s12 + $0x7a] sm:$0xff]  ;;  %v5418_v8 = vld [vmem:[%s6457_s12 + $0x91] sm:$0xff] }
  0x62   : >> { %835 = vst.msk [vmem:[#allocation5 + $0x48] sm:$0xff] %vm744_vm2, %v6532_v60  ;;  %v6572_v2 = vld [vmem:[%s6457_s12 + $0x81] sm:$0xff]  ;;  %v5410_v9 = vld [vmem:[%s6457_s12 + $0x31] sm:$0xff]  ;;  %v5419_v10 = vld [vmem:[%s6457_s12 + $0x99] sm:$0xff] }
  0x63   : >> { %989 = vrot.lane.b32.xlu1 %v6515_v54, %s6095_s18  ;;  %973 = vrot.lane.b32.xlu0 %v940_v55, %s6095_s18  ;;  %v5361_v3 = vld [vmem:[%s6457_s12 + $0x21] sm:$0xff]  ;;  %v5411_v11 = vld [vmem:[%s6457_s12 + $0x39] sm:$0xff] }
  0x64   : >> { %v5376_v5 = vld [vmem:[%s6457_s12 + $0x1a] sm:$0xff]  ;;  %v6592_v6 = vld [vmem:[%s6457_s12 + $0x82] sm:$0xff]  ;;  %v5413_v55 = vld [vmem:[%s6457_s12 + $0x51] sm:$0xff] }
  0x65   : >> { %v5377_v7 = vld [vmem:[%s6457_s12 + $0x22] sm:$0xff]  ;;  %v5435_v16 = vld [vmem:[%s6457_s12 + $0x9a] sm:$0xff] }
  0x66   : >> { %v5427_v17 = vld [vmem:[%s6457_s12 + $0x3a] sm:$0xff]  ;;  %v5420_v26 = vld [vmem:[%s6457_s12 + $0xa9] sm:$0xff] }
  0x67   : >> { %1087 = vrot.lane.b32.xlu1 %v6470_v30, %s6096_s19  ;;  %1071 = vrot.lane.b32.xlu0 %v5344_v31, %s6096_s19  ;;  %v5412_v27 = vld [vmem:[%s6457_s12 + $0x49] sm:$0xff] }
  0x6b   : >> { %1089 = vrot.lane.b32.xlu1 %v6474_v46, %s6096_s19  ;;  %1073 = vrot.lane.b32.xlu0 %v5345_v47, %s6096_s19 }
  0x6f   : >> { %1184 = vrot.lane.b32.xlu1 %v6562_v0, %s6097_s22  ;;  %1168 = vrot.lane.b32.xlu0 %v5360_v1, %s6097_s22 }
  0x73   : >> { %894 = vrot.lane.b32.xlu1 %v6562_v0, %s6094_s13  ;;  %878 = vrot.lane.b32.xlu0 %v5360_v1, %s6094_s13 }
  0x77   : >> { %1186 = vrot.lane.b32.xlu1 %v6572_v2, %s6097_s22  ;;  %1170 = vrot.lane.b32.xlu0 %v5361_v3, %s6097_s22 }
  0x7b   : >> { %1281 = vrot.lane.b32.xlu1 %v6579_v4, %s6098_s24  ;;  %1265 = vrot.lane.b32.xlu0 %v5376_v5, %s6098_s24 }
  0x7f   : >> { %896 = vrot.lane.b32.xlu1 %v6572_v2, %s6094_s13  ;;  %880 = vrot.lane.b32.xlu0 %v5361_v3, %s6094_s13 }
  0x83   : >> { %991 = vrot.lane.b32.xlu1 %v6579_v4, %s6095_s18  ;;  %975 = vrot.lane.b32.xlu0 %v5376_v5, %s6095_s18 }
  0x87   : >> { %1283 = vrot.lane.b32.xlu1 %v6592_v6, %s6098_s24  ;;  %1267 = vrot.lane.b32.xlu0 %v5377_v7, %s6098_s24 }
  0x8b   : >> { %1381 = vrot.lane.b32.xlu1 %v6492_v50, %s6099_s25  ;;  %1365 = vrot.lane.b32.xlu0 %v6495_v51, %s6099_s25 }
  0x8f   : >> { %993 = vrot.lane.b32.xlu1 %v6592_v6, %s6095_s18  ;;  %977 = vrot.lane.b32.xlu0 %v5377_v7, %s6095_s18 }
  0x93   : >> { %1091 = vrot.lane.b32.xlu1 %v6492_v50, %s6096_s19  ;;  %1075 = vrot.lane.b32.xlu0 %v6495_v51, %s6096_s19 }
  0x97   : >> { %1383 = vrot.lane.b32.xlu1 %v6498_v52, %s6099_s25  ;;  %1367 = vrot.lane.b32.xlu0 %v6501_v53, %s6099_s25 }
  0x9b   : >> { %1478 = vrot.lane.b32.xlu1 %v5418_v8, %s6100_s26  ;;  %1462 = vrot.lane.b32.xlu0 %v5410_v9, %s6100_s26 }
  0x9f   : >> { %1093 = vrot.lane.b32.xlu1 %v6498_v52, %s6096_s19  ;;  %1077 = vrot.lane.b32.xlu0 %v6501_v53, %s6096_s19  ;;  %v5421_v53 = vld [vmem:[%s6457_s12 + $0xb1] sm:$0xff] }
  0xa3   : >> { %1188 = vrot.lane.b32.xlu1 %v5418_v8, %s6097_s22  ;;  %1172 = vrot.lane.b32.xlu0 %v5410_v9, %s6097_s22 }
  0xa7   : >> { %1480 = vrot.lane.b32.xlu1 %v5419_v10, %s6100_s26  ;;  %1464 = vrot.lane.b32.xlu0 %v5411_v11, %s6100_s26 }
  0xab   : >> { %1575 = vrot.lane.b32.xlu1 %v5434_v12, %s6101_s28  ;;  %1559 = vrot.lane.b32.xlu0 %v5426_v13, %s6101_s28 }
  0xaf   : >> { %898 = vrot.lane.b32.xlu1 %v5418_v8, %s6094_s13  ;;  %882 = vrot.lane.b32.xlu0 %v5410_v9, %s6094_s13 }
  0xb3   : >> { %1190 = vrot.lane.b32.xlu1 %v5419_v10, %s6097_s22  ;;  %1174 = vrot.lane.b32.xlu0 %v5411_v11, %s6097_s22 }
  0xb7   : >> { %1285 = vrot.lane.b32.xlu1 %v5434_v12, %s6098_s24  ;;  %1269 = vrot.lane.b32.xlu0 %v5426_v13, %s6098_s24 }
  0xbb   : >> { %1577 = vrot.lane.b32.xlu1 %v5435_v16, %s6101_s28  ;;  %1561 = vrot.lane.b32.xlu0 %v5427_v17, %s6101_s28 }
  0xbf   : >> { %900 = vrot.lane.b32.xlu1 %v5419_v10, %s6094_s13  ;;  %884 = vrot.lane.b32.xlu0 %v5411_v11, %s6094_s13  ;;  %v5437_v10 = vld [vmem:[%s6457_s12 + $0xb2] sm:$0xff] }
  0xc0   : >> { %v5429_v11 = vld [vmem:[%s6457_s12 + $0x52] sm:$0xff] }
  0xc3   : >> { %995 = vrot.lane.b32.xlu1 %v5434_v12, %s6095_s18  ;;  %979 = vrot.lane.b32.xlu0 %v5426_v13, %s6095_s18 }
  0xc7   : >> { %1287 = vrot.lane.b32.xlu1 %v5435_v16, %s6098_s24  ;;  %1271 = vrot.lane.b32.xlu0 %v5427_v17, %s6098_s24 }
  0xc9   : >> { %v877_v18 = vpop.permute.xlu1 %876  ;;  %v875_v19 = vpop.permute.xlu0 %874 }
  0xca   : >> { %924 = vst.msk [vmem:[#allocation5 + $0x8] sm:$0xff] %vm922_vm5, %v877_v18  ;;  %923 = vst.msk [vmem:[#allocation5] sm:$0xff] %vm922_vm5, %v875_v19 }
  0xcb   : >> { %1385 = vrot.lane.b32.xlu1 %v6522_v58, %s6099_s25  ;;  %1369 = vrot.lane.b32.xlu0 %v6525_v59, %s6099_s25 }
  0xcd   : >> { %v893_v20 = vpop.permute.xlu1 %892  ;;  %v891_v21 = vpop.permute.xlu0 %890 }
  0xce   : >> { %932 = vst.msk [vmem:[#allocation5 + $0x48] sm:$0xff] %vm922_vm5, %v893_v20  ;;  %931 = vst.msk [vmem:[#allocation5 + $0x40] sm:$0xff] %vm922_vm5, %v891_v21  ;;  %v5406_v20 = vld [vmem:[%s6457_s12 + $0xc0] sm:$0xff] }
  0xcf   : >> { %997 = vrot.lane.b32.xlu1 %v5435_v16, %s6095_s18  ;;  %981 = vrot.lane.b32.xlu0 %v5427_v17, %s6095_s18 }
  0xd1   : >> { %v988_v22 = vpop.permute.xlu1 %987  ;;  %v972_v23 = vpop.permute.xlu0 %971 }
  0xd2   : >> { %1028 = vst.msk [vmem:[#allocation5 + $0x40] sm:$0xff] %vm1019_vm6, %v988_v22  ;;  %1020 = vst.msk [vmem:[#allocation5] sm:$0xff] %vm1019_vm6, %v972_v23 }
  0xd3   : >> { %1095 = vrot.lane.b32.xlu1 %v6522_v58, %s6096_s19  ;;  %1079 = vrot.lane.b32.xlu0 %v6525_v59, %s6096_s19  ;;  %v5436_v58 = vld [vmem:[%s6457_s12 + $0xaa] sm:$0xff] }
  0xd4   : >> { %v5428_v59 = vld [vmem:[%s6457_s12 + $0x4a] sm:$0xff] }
  0xd5   : >> { %v990_v24 = vpop.permute.xlu1 %989  ;;  %v974_v25 = vpop.permute.xlu0 %973 }
  0xd6   : >> { %1029 = vst.msk [vmem:[#allocation5 + $0x48] sm:$0xff] %vm1019_vm6, %v990_v24  ;;  %1021 = vst.msk [vmem:[#allocation5 + $0x8] sm:$0xff] %vm1019_vm6, %v974_v25 }
  0xd7   : >> { %1387 = vrot.lane.b32.xlu1 %v6546_v62, %s6099_s25  ;;  %1371 = vrot.lane.b32.xlu0 %v6549_v63, %s6099_s25 }
  0xd9   : >> { %v1088_v31 = vpop.permute.xlu1 %1087  ;;  %v1072_v47 = vpop.permute.xlu0 %1071 }
  0xda   : >> { %1128 = vst.msk [vmem:[#allocation5 + $0x40] sm:$0xff] %vm1119_vm7, %v1088_v31  ;;  %1120 = vst.msk [vmem:[#allocation5] sm:$0xff] %vm1119_vm7, %v1072_v47 }
  0xdb   : >> { %1482 = vrot.lane.b32.xlu1 %v5420_v26, %s6100_s26  ;;  %1466 = vrot.lane.b32.xlu0 %v5412_v27, %s6100_s26 }
  0xdd   : >> { %v1090_v49 = vpop.permute.xlu1 %1089  ;;  %v1074_v50 = vpop.permute.xlu0 %1073 }
  0xde   : >> { %1129 = vst.msk [vmem:[#allocation5 + $0x48] sm:$0xff] %vm1119_vm7, %v1090_v49  ;;  %1121 = vst.msk [vmem:[#allocation5 + $0x8] sm:$0xff] %vm1119_vm7, %v1074_v50  ;;  %v5422_v49 = vld [vmem:[%s6457_s12 + $0xc1] sm:$0xff] }
  0xdf   : >> { %1097 = vrot.lane.b32.xlu1 %v6546_v62, %s6096_s19  ;;  %1081 = vrot.lane.b32.xlu0 %v6549_v63, %s6096_s19 }
  0xe1   : >> { %v1185_v51 = vpop.permute.xlu1 %1184  ;;  %v1169_v52 = vpop.permute.xlu0 %1168 }
  0xe2   : >> { %1225 = vst.msk [vmem:[#allocation5 + $0x40] sm:$0xff] %vm1216_vm8, %v1185_v51  ;;  %1217 = vst.msk [vmem:[#allocation5] sm:$0xff] %vm1216_vm8, %v1169_v52 }
  0xe3   : >> { %1192 = vrot.lane.b32.xlu1 %v5420_v26, %s6097_s22  ;;  %1176 = vrot.lane.b32.xlu0 %v5412_v27, %s6097_s22 }
  0xe5   : >> { %v895_v56 = vpop.permute.xlu1 %894  ;;  %v879_v57 = vpop.permute.xlu0 %878 }
  0xe6   : >> { %933 = vst.msk [vmem:[#allocation5 + $0x50] sm:$0xff] %vm922_vm5, %v895_v56  ;;  %925 = vst.msk [vmem:[#allocation5 + $0x10] sm:$0xff] %vm922_vm5, %v879_v57  ;;  %v5423_v56 = vld [vmem:[%s6457_s12 + $0xc9] sm:$0xff] }
  0xe7   : >> { %1484 = vrot.lane.b32.xlu1 %v5421_v53, %s6100_s26  ;;  %1468 = vrot.lane.b32.xlu0 %v5413_v55, %s6100_s26 }
  0xe9   : >> { %v1187_v62 = vpop.permute.xlu1 %1186  ;;  %v1171_v63 = vpop.permute.xlu0 %1170 }
  0xea   : >> { %1226 = vst.msk [vmem:[#allocation5 + $0x48] sm:$0xff] %vm1216_vm8, %v1187_v62  ;;  %1218 = vst.msk [vmem:[#allocation5 + $0x8] sm:$0xff] %vm1216_vm8, %v1171_v63 }
  0xeb   : >> { %1579 = vrot.lane.b32.xlu1 %v5436_v58, %s6101_s28  ;;  %1563 = vrot.lane.b32.xlu0 %v5428_v59, %s6101_s28 }
  0xed   : >> { %v1282_v1 = vpop.permute.xlu1 %1281  ;;  %v1266_v3 = vpop.permute.xlu0 %1265 }
  0xee   : >> { %1322 = vst.msk [vmem:[#allocation5 + $0x40] sm:$0xff] %vm1313_vm9, %v1282_v1  ;;  %1314 = vst.msk [vmem:[#allocation5] sm:$0xff] %vm1313_vm9, %v1266_v3 }
  0xef   : >> { %902 = vrot.lane.b32.xlu1 %v5420_v26, %s6094_s13  ;;  %886 = vrot.lane.b32.xlu0 %v5412_v27, %s6094_s13  ;;  %v5407_v27 = vld [vmem:[%s6457_s12 + $0xc8] sm:$0xff] }
  0xf1   : >> { %v897_v5 = vpop.permute.xlu1 %896  ;;  %v881_v7 = vpop.permute.xlu0 %880 }
  0xf2   : >> { %934 = vst.msk [vmem:[#allocation5 + $0x58] sm:$0xff] %vm922_vm5, %v897_v5  ;;  %926 = vst.msk [vmem:[#allocation5 + $0x18] sm:$0xff] %vm922_vm5, %v881_v7 }
  0xf3   : >> { %1194 = vrot.lane.b32.xlu1 %v5421_v53, %s6097_s22  ;;  %1178 = vrot.lane.b32.xlu0 %v5413_v55, %s6097_s22 }
  0xf5   : >> { %v992_v8 = vpop.permute.xlu1 %991  ;;  %v976_v9 = vpop.permute.xlu0 %975 }
  0xf6   : >> { %1030 = vst.msk [vmem:[#allocation5 + $0x50] sm:$0xff] %vm1019_vm6, %v992_v8  ;;  %1022 = vst.msk [vmem:[#allocation5 + $0x10] sm:$0xff] %vm1019_vm6, %v976_v9  ;;  %v5439_v8 = vld [vmem:[%s6457_s12 + $0xca] sm:$0xff] }
  0xf7   : >> { %1289 = vrot.lane.b32.xlu1 %v5436_v58, %s6098_s24  ;;  %1273 = vrot.lane.b32.xlu0 %v5428_v59, %s6098_s24 }
  0xf9   : >> { %v1284_v12 = vpop.permute.xlu1 %1283  ;;  %v1268_v13 = vpop.permute.xlu0 %1267 }
  0xfa   : >> { %1323 = vst.msk [vmem:[#allocation5 + $0x48] sm:$0xff] %vm1313_vm9, %v1284_v12  ;;  %1315 = vst.msk [vmem:[#allocation5 + $0x8] sm:$0xff] %vm1313_vm9, %v1268_v13  ;;  %v5408_v13 = vld [vmem:[%s6457_s12 + $0xd8] sm:$0xff] }
  0xfb   : >> { %1581 = vrot.lane.b32.xlu1 %v5437_v10, %s6101_s28  ;;  %1565 = vrot.lane.b32.xlu0 %v5429_v11, %s6101_s28 }
  0xfd   : >> { %v1382_v14 = vpop.permute.xlu1 %1381  ;;  %v1366_v15 = vpop.permute.xlu0 %1365 }
  0xfe   : >> { %1422 = vst.msk [vmem:[#allocation5 + $0x40] sm:$0xff] %vm1413_vm10, %v1382_v14  ;;  %1414 = vst.msk [vmem:[#allocation5] sm:$0xff] %vm1413_vm10, %v1366_v15 }
  0xff   : >> { %904 = vrot.lane.b32.xlu1 %v5421_v53, %s6094_s13  ;;  %888 = vrot.lane.b32.xlu0 %v5413_v55, %s6094_s13 }
 0x101   : >> { %v994_v16 = vpop.permute.xlu1 %993  ;;  %v978_v17 = vpop.permute.xlu0 %977 }
 0x102   : >> { %1031 = vst.msk [vmem:[#allocation5 + $0x58] sm:$0xff] %vm1019_vm6, %v994_v16  ;;  %1023 = vst.msk [vmem:[#allocation5 + $0x18] sm:$0xff] %vm1019_vm6, %v978_v17  ;;  %v5409_v16 = vld [vmem:[%s6457_s12 + $0xe0] sm:$0xff] }
 0x103   : >> { %999 = vrot.lane.b32.xlu1 %v5436_v58, %s6095_s18  ;;  %983 = vrot.lane.b32.xlu0 %v5428_v59, %s6095_s18 }
 0x105   : >> { %v1092_v18 = vpop.permute.xlu1 %1091  ;;  %v1076_v19 = vpop.permute.xlu0 %1075 }
 0x106   : >> { %1130 = vst.msk [vmem:[#allocation5 + $0x50] sm:$0xff] %vm1119_vm7, %v1092_v18  ;;  %1122 = vst.msk [vmem:[#allocation5 + $0x10] sm:$0xff] %vm1119_vm7, %v1076_v19 }
 0x107   : >> { %1291 = vrot.lane.b32.xlu1 %v5437_v10, %s6098_s24  ;;  %1275 = vrot.lane.b32.xlu0 %v5429_v11, %s6098_s24 }
 0x109   : >> { %v1384_v21 = vpop.permute.xlu1 %1383  ;;  %v1368_v22 = vpop.permute.xlu0 %1367 }
 0x10a   : >> { %1423 = vst.msk [vmem:[#allocation5 + $0x48] sm:$0xff] %vm1413_vm10, %v1384_v21  ;;  %1415 = vst.msk [vmem:[#allocation5 + $0x8] sm:$0xff] %vm1413_vm10, %v1368_v22 }
 0x10b   : >> { %1389 = vrot.lane.b32.xlu1 %v5406_v20, %s6099_s25  ;;  %1373 = vrot.lane.b32.xlu0 %v6535_v61, %s6099_s25 }
 0x10d   : >> { %v1479_v23 = vpop.permute.xlu1 %1478  ;;  %v1463_v24 = vpop.permute.xlu0 %1462 }
 0x10e   : >> { %1519 = vst.msk [vmem:[#allocation5 + $0x40] sm:$0xff] %vm1510_vm11, %v1479_v23  ;;  %1511 = vst.msk [vmem:[#allocation5] sm:$0xff] %vm1510_vm11, %v1463_v24 }
 0x10f   : >> { %1001 = vrot.lane.b32.xlu1 %v5437_v10, %s6095_s18  ;;  %985 = vrot.lane.b32.xlu0 %v5429_v11, %s6095_s18 }
 0x111   : >> { %v1094_v25 = vpop.permute.xlu1 %1093  ;;  %v1078_v26 = vpop.permute.xlu0 %1077 }
 0x112   : >> { %1131 = vst.msk [vmem:[#allocation5 + $0x58] sm:$0xff] %vm1119_vm7, %v1094_v25  ;;  %1123 = vst.msk [vmem:[#allocation5 + $0x18] sm:$0xff] %vm1119_vm7, %v1078_v26 }
 0x113   : >> { %1099 = vrot.lane.b32.xlu1 %v5406_v20, %s6096_s19  ;;  %1083 = vrot.lane.b32.xlu0 %v6535_v61, %s6096_s19 }
 0x115   : >> { %v1189_v31 = vpop.permute.xlu1 %1188  ;;  %v1173_v47 = vpop.permute.xlu0 %1172 }
 0x116   : >> { %1227 = vst.msk [vmem:[#allocation5 + $0x50] sm:$0xff] %vm1216_vm8, %v1189_v31  ;;  %1219 = vst.msk [vmem:[#allocation5 + $0x10] sm:$0xff] %vm1216_vm8, %v1173_v47 }
 0x117   : >> { %1391 = vrot.lane.b32.xlu1 %v5407_v27, %s6099_s25  ;;  %1375 = vrot.lane.b32.xlu0 %v6532_v60, %s6099_s25 }
 0x119   : >> { %v1481_v50 = vpop.permute.xlu1 %1480  ;;  %v1465_v51 = vpop.permute.xlu0 %1464 }
 0x11a   : >> { %1520 = vst.msk [vmem:[#allocation5 + $0x48] sm:$0xff] %vm1510_vm11, %v1481_v50  ;;  %1512 = vst.msk [vmem:[#allocation5 + $0x8] sm:$0xff] %vm1510_vm11, %v1465_v51 }
 0x11b   : >> { %1486 = vrot.lane.b32.xlu1 %v5422_v49, %s6100_s26  ;;  %1470 = vrot.lane.b32.xlu0 %v6467_v29, %s6100_s26 }
 0x11d   : >> { %v1576_v61 = vpop.permute.xlu1 %1575  ;;  %v1560_v52 = vpop.permute.xlu0 %1559 }
 0x11e   : >> { %1616 = vst.msk [vmem:[#allocation5 + $0x40] sm:$0xff] %vm1607_vm12, %v1576_v61  ;;  %1608 = vst.msk [vmem:[#allocation5] sm:$0xff] %vm1607_vm12, %v1560_v52 }
 0x11f   : >> { %1101 = vrot.lane.b32.xlu1 %v5407_v27, %s6096_s19  ;;  %1085 = vrot.lane.b32.xlu0 %v6532_v60, %s6096_s19 }
 0x121   : >> { %v899_v53 = vpop.permute.xlu1 %898  ;;  %v883_v55 = vpop.permute.xlu0 %882 }
 0x122   : >> { %935 = vst.msk [vmem:[#allocation5 + $0x60] sm:$0xff] %vm922_vm5, %v899_v53  ;;  %927 = vst.msk [vmem:[#allocation5 + $0x20] sm:$0xff] %vm922_vm5, %v883_v55 }
 0x123   : >> { %1196 = vrot.lane.b32.xlu1 %v5422_v49, %s6097_s22  ;;  %1180 = vrot.lane.b32.xlu0 %v6467_v29, %s6097_s22  ;;  %v5438_v29 = vld [vmem:[%s6457_s12 + $0xc2] sm:$0xff] }
 0x125   : >> { %v1191_v57 = vpop.permute.xlu1 %1190  ;;  %v1175_v58 = vpop.permute.xlu0 %1174  ;;  %v1624_v59 = vld [vmem:[#allocation5] sm:$0xff] }
 0x126   : >> { %v1632_v62 = vld [vmem:[#allocation5 + $0x40] sm:$0xff]  ;;  %1228 = vst.msk [vmem:[#allocation5 + $0x58] sm:$0xff] %vm1216_vm8, %v1191_v57  ;;  %1220 = vst.msk [vmem:[#allocation5 + $0x18] sm:$0xff] %vm1216_vm8, %v1175_v58  ;;  %5791 = vmatprep.mubr.msk.f32.mxu0 %vm1644_vm13, %v1624_v59 }
 0x127   : >> { %5803 = vmatprep.mubr.msk.f32.mxu1 %vm1644_vm13, %v1632_v62  ;;  %1488 = vrot.lane.b32.xlu1 %v5423_v56, %s6100_s26 }
 0x128   : >> { %1472 = vrot.lane.b32.xlu0 %v6464_v28, %s6100_s26 }
 0x129   : >> { %v1286_v60 = vpop.permute.xlu1 %1285  ;;  %v1270_v63 = vpop.permute.xlu0 %1269 }
 0x12a   : >> { %1324 = vst.msk [vmem:[#allocation5 + $0x50] sm:$0xff] %vm1313_vm9, %v1286_v60  ;;  %1316 = vst.msk [vmem:[#allocation5 + $0x10] sm:$0xff] %vm1313_vm9, %v1270_v63 }
 0x12b   : >> { %1583 = vrot.lane.b32.xlu1 %v5438_v29, %s6101_s28 }
 0x12c   : >> { %1567 = vrot.lane.b32.xlu0 %v6488_v48, %s6101_s28 }
 0x12d   : >> { %v1578_v1 = vpop.permute.xlu1 %1577  ;;  %v1562_v3 = vpop.permute.xlu0 %1561 }
 0x12e   : >> { %1617 = vst.msk [vmem:[#allocation5 + $0x48] sm:$0xff] %vm1607_vm12, %v1578_v1  ;;  %1609 = vst.msk [vmem:[#allocation5 + $0x8] sm:$0xff] %vm1607_vm12, %v1562_v3 }
 0x12f   : >> { %1198 = vrot.lane.b32.xlu1 %v5423_v56, %s6097_s22 }
 0x130   : >> { %1182 = vrot.lane.b32.xlu0 %v6464_v28, %s6097_s22 }
 0x131   : >> { %v901_v5 = vpop.permute.xlu1 %900  ;;  %v885_v7 = vpop.permute.xlu0 %884 }
 0x132   : >> { %936 = vst.msk [vmem:[#allocation5 + $0x68] sm:$0xff] %vm922_vm5, %v901_v5  ;;  %928 = vst.msk [vmem:[#allocation5 + $0x28] sm:$0xff] %vm922_vm5, %v885_v7 }
 0x133   : >> { %1293 = vrot.lane.b32.xlu1 %v5438_v29, %s6098_s24 }
 0x134   : >> { %1277 = vrot.lane.b32.xlu0 %v6488_v48, %s6098_s24 }
 0x135   : >> { %v996_v9 = vpop.permute.xlu1 %995  ;;  %v980_v10 = vpop.permute.xlu0 %979  ;;  %v1625_v11 = vld [vmem:[#allocation5 + $0x8] sm:$0xff] }
 0x136   : >> { %v1633_v12 = vld [vmem:[#allocation5 + $0x48] sm:$0xff]  ;;  %1032 = vst.msk [vmem:[#allocation5 + $0x60] sm:$0xff] %vm1019_vm6, %v996_v9  ;;  %1024 = vst.msk [vmem:[#allocation5 + $0x20] sm:$0xff] %vm1019_vm6, %v980_v10  ;;  %5792 = vmatmul.mubr.msk.f32.vlgmr.msra.gmra.mrb[0].mxu0 %vm1644_vm13, %v1625_v11 }
 0x137   : >> { %5804 = vmatmul.mubr.msk.f32.vlgmr.msra.gmra.mrb[0].mxu1 %vm1644_vm13, %v1633_v12  ;;  %1585 = vrot.lane.b32.xlu1 %v5439_v8, %s6101_s28 }
 0x138   : >> { %1569 = vrot.lane.b32.xlu0 %v6515_v54, %s6101_s28 }
 0x139   : >> { %v1288_v28 = vpop.permute.xlu1 %1287  ;;  %v1272_v48 = vpop.permute.xlu0 %1271 }
 0x13a   : >> { %1325 = vst.msk [vmem:[#allocation5 + $0x58] sm:$0xff] %vm1313_vm9, %v1288_v28  ;;  %1317 = vst.msk [vmem:[#allocation5 + $0x18] sm:$0xff] %vm1313_vm9, %v1272_v48 }
 0x13b   : >> { %1295 = vrot.lane.b32.xlu1 %v5439_v8, %s6098_s24 }
 0x13c   : >> { %1279 = vrot.lane.b32.xlu0 %v6515_v54, %s6098_s24  ;;  %v5424_v54 = vld [vmem:[%s6457_s12 + $0xd9] sm:$0xff] }
 0x13d   : >> { %v1386_v14 = vpop.permute.xlu1 %1385  ;;  %v1370_v15 = vpop.permute.xlu0 %1369 }
 0x13e   : >> { %1424 = vst.msk [vmem:[#allocation5 + $0x50] sm:$0xff] %vm1413_vm10, %v1386_v14  ;;  %1416 = vst.msk [vmem:[#allocation5 + $0x10] sm:$0xff] %vm1413_vm10, %v1370_v15 }
 0x13f   : >> { %1393 = vrot.lane.b32.xlu1 %v5408_v13, %s6099_s25 }
 0x140   : >> { %1377 = vrot.lane.b32.xlu0 %v6470_v30, %s6099_s25  ;;  %v5425_v30 = vld [vmem:[%s6457_s12 + $0xe1] sm:$0xff] }
 0x141   : >> { %v998_v17 = vpop.permute.xlu1 %997  ;;  %v982_v18 = vpop.permute.xlu0 %981 }
 0x142   : >> { %1033 = vst.msk [vmem:[#allocation5 + $0x68] sm:$0xff] %vm1019_vm6, %v998_v17  ;;  %1025 = vst.msk [vmem:[#allocation5 + $0x28] sm:$0xff] %vm1019_vm6, %v982_v18 }
 0x143   : >> { %1395 = vrot.lane.b32.xlu1 %v5409_v16, %s6099_s25 }
 0x144   : >> { %1379 = vrot.lane.b32.xlu0 %v6474_v46, %s6099_s25  ;;  %v5440_v46 = vld [vmem:[%s6457_s12 + $0xda] sm:$0xff] }
 0x145   : >> { %v1096_v19 = vpop.permute.xlu1 %1095  ;;  %v1080_v20 = vpop.permute.xlu0 %1079 }
 0x146   : >> { %1132 = vst.msk [vmem:[#allocation5 + $0x60] sm:$0xff] %vm1119_vm7, %v1096_v19  ;;  %1124 = vst.msk [vmem:[#allocation5 + $0x20] sm:$0xff] %vm1119_vm7, %v1080_v20 }
 0x147   : >> { %1490 = vrot.lane.b32.xlu1 %v5424_v54, %s6100_s26 }
 0x148   : >> { %1474 = vrot.lane.b32.xlu0 %v6562_v0, %s6100_s26  ;;  %v5441_v0 = vld [vmem:[%s6457_s12 + $0xe2] sm:$0xff] }
 0x149   : >> { %v1388_v21 = vpop.permute.xlu1 %1387  ;;  %v1372_v22 = vpop.permute.xlu0 %1371 }
 0x14a   : >> { %1425 = vst.msk [vmem:[#allocation5 + $0x58] sm:$0xff] %vm1413_vm10, %v1388_v21  ;;  %1417 = vst.msk [vmem:[#allocation5 + $0x18] sm:$0xff] %vm1413_vm10, %v1372_v22 }
 0x14b   : >> { %1492 = vrot.lane.b32.xlu1 %v5425_v30, %s6100_s26 }
 0x14c   : >> { %1476 = vrot.lane.b32.xlu0 %v6572_v2, %s6100_s26 }
 0x14d   : >> { %v1483_v23 = vpop.permute.xlu1 %1482  ;;  %v1467_v24 = vpop.permute.xlu0 %1466 }
 0x14e   : >> { %1521 = vst.msk [vmem:[#allocation5 + $0x50] sm:$0xff] %vm1510_vm11, %v1483_v23  ;;  %1513 = vst.msk [vmem:[#allocation5 + $0x10] sm:$0xff] %vm1510_vm11, %v1467_v24 }
 0x14f   : >> { %1587 = vrot.lane.b32.xlu1 %v5440_v46, %s6101_s28 }
 0x150   : >> { %1571 = vrot.lane.b32.xlu0 %v6579_v4, %s6101_s28 }
 0x151   : >> { %v1098_v25 = vpop.permute.xlu1 %1097  ;;  %v1082_v26 = vpop.permute.xlu0 %1081 }
 0x152   : >> { %1133 = vst.msk [vmem:[#allocation5 + $0x68] sm:$0xff] %vm1119_vm7, %v1098_v25  ;;  %1125 = vst.msk [vmem:[#allocation5 + $0x28] sm:$0xff] %vm1119_vm7, %v1082_v26 }
 0x153   : >> { %1589 = vrot.lane.b32.xlu1 %v5441_v0, %s6101_s28 }
 0x154   : >> { %1573 = vrot.lane.b32.xlu0 %v6592_v6, %s6101_s28 }
 0x155   : >> { %v1193_v2 = vpop.permute.xlu1 %1192  ;;  %v1177_v27 = vpop.permute.xlu0 %1176 }
 0x156   : >> { %1229 = vst.msk [vmem:[#allocation5 + $0x60] sm:$0xff] %vm1216_vm8, %v1193_v2  ;;  %1221 = vst.msk [vmem:[#allocation5 + $0x20] sm:$0xff] %vm1216_vm8, %v1177_v27 }
 0x159   : >> { %v1485_v31 = vpop.permute.xlu1 %1484  ;;  %v1469_v4 = vpop.permute.xlu0 %1468 }
 0x15a   : >> { %1522 = vst.msk [vmem:[#allocation5 + $0x58] sm:$0xff] %vm1510_vm11, %v1485_v31  ;;  %1514 = vst.msk [vmem:[#allocation5 + $0x18] sm:$0xff] %vm1510_vm11, %v1469_v4 }
 0x15d   : >> { %v1580_v47 = vpop.permute.xlu1 %1579  ;;  %v1564_v49 = vpop.permute.xlu0 %1563 }
 0x15e   : >> { %1618 = vst.msk [vmem:[#allocation5 + $0x50] sm:$0xff] %vm1607_vm12, %v1580_v47  ;;  %1610 = vst.msk [vmem:[#allocation5 + $0x10] sm:$0xff] %vm1607_vm12, %v1564_v49 }
 0x161   : >> { %v903_v50 = vpop.permute.xlu1 %902  ;;  %v887_v6 = vpop.permute.xlu0 %886 }
 0x162   : >> { %937 = vst.msk [vmem:[#allocation5 + $0x70] sm:$0xff] %vm922_vm5, %v903_v50  ;;  %929 = vst.msk [vmem:[#allocation5 + $0x30] sm:$0xff] %vm922_vm5, %v887_v6 }
 0x165   : >> { %v1195_v51 = vpop.permute.xlu1 %1194  ;;  %v1179_v61 = vpop.permute.xlu0 %1178  ;;  %v1626_v52 = vld [vmem:[#allocation5 + $0x10] sm:$0xff] }
 0x166   : >> { %v1634_v53 = vld [vmem:[#allocation5 + $0x50] sm:$0xff]  ;;  %1230 = vst.msk [vmem:[#allocation5 + $0x68] sm:$0xff] %vm1216_vm8, %v1195_v51  ;;  %1222 = vst.msk [vmem:[#allocation5 + $0x28] sm:$0xff] %vm1216_vm8, %v1179_v61  ;;  %5794 = vmatprep.mubr.msk.f32.mxu0 %vm1644_vm13, %v1626_v52 }
 0x167   : >> { %5806 = vmatprep.mubr.msk.f32.mxu1 %vm1644_vm13, %v1634_v53 }
 0x169   : >> { %v1290_v55 = vpop.permute.xlu1 %1289  ;;  %v1274_v56 = vpop.permute.xlu0 %1273 }
 0x16a   : >> { %1326 = vst.msk [vmem:[#allocation5 + $0x60] sm:$0xff] %vm1313_vm9, %v1290_v55  ;;  %1318 = vst.msk [vmem:[#allocation5 + $0x20] sm:$0xff] %vm1313_vm9, %v1274_v56 }
 0x16d   : >> { %v1582_v57 = vpop.permute.xlu1 %1581  ;;  %v1566_v58 = vpop.permute.xlu0 %1565 }
 0x16e   : >> { %1619 = vst.msk [vmem:[#allocation5 + $0x58] sm:$0xff] %vm1607_vm12, %v1582_v57  ;;  %1611 = vst.msk [vmem:[#allocation5 + $0x18] sm:$0xff] %vm1607_vm12, %v1566_v58 }
 0x171   : >> { %v905_v59 = vpop.permute.xlu1 %904  ;;  %v889_v62 = vpop.permute.xlu0 %888 }
 0x172   : >> { %938 = vst.msk [vmem:[#allocation5 + $0x78] sm:$0xff] %vm922_vm5, %v905_v59  ;;  %930 = vst.msk [vmem:[#allocation5 + $0x38] sm:$0xff] %vm922_vm5, %v889_v62 }
 0x175   : >> { %v1000_v29 = vpop.permute.xlu1 %999  ;;  %v984_v60 = vpop.permute.xlu0 %983  ;;  %v1627_v63 = vld [vmem:[#allocation5 + $0x18] sm:$0xff] }
 0x176   : >> { %v1635_v1 = vld [vmem:[#allocation5 + $0x58] sm:$0xff]  ;;  %1034 = vst.msk [vmem:[#allocation5 + $0x70] sm:$0xff] %vm1019_vm6, %v1000_v29  ;;  %1026 = vst.msk [vmem:[#allocation5 + $0x30] sm:$0xff] %vm1019_vm6, %v984_v60  ;;  %5795 = vmatmul.mubr.msk.f32.gmra.mrb[2].mxu0 %vm1644_vm13, %v1627_v63  ;;  %v1640_v63 = vlaneseq }
 0x177   : >> { %5807 = vmatmul.mubr.msk.f32.gmra.mrb[2].mxu1 %vm1644_vm13, %v1635_v1 }
 0x178   : >> { %v6919_v1 = vshrl.u32 %v1640_v63, 7 }
 0x179   : >> { %v1292_v3 = vpop.permute.xlu1 %1291  ;;  %v1276_v5 = vpop.permute.xlu0 %1275 }
 0x17a   : >> { %1327 = vst.msk [vmem:[#allocation5 + $0x68] sm:$0xff] %vm1313_vm9, %v1292_v3  ;;  %1319 = vst.msk [vmem:[#allocation5 + $0x28] sm:$0xff] %vm1313_vm9, %v1276_v5  ;;  %v1642_v3 = vsub.s32 0, %v6919_v1 }
 0x17c   : >> { %v1643_v5 = vrot.slane %v6334_v42, %v1642_v3 }
 0x17d   : >> { %v1390_v7 = vpop.permute.xlu1 %1389  ;;  %v1374_v8 = vpop.permute.xlu0 %1373 }
 0x17e   : >> { %1426 = vst.msk [vmem:[#allocation5 + $0x60] sm:$0xff] %vm1413_vm10, %v1390_v7  ;;  %1418 = vst.msk [vmem:[#allocation5 + $0x20] sm:$0xff] %vm1413_vm10, %v1374_v8 }
 0x181   : >> { %v1002_v9 = vpop.permute.xlu1 %1001  ;;  %v986_v10 = vpop.permute.xlu0 %985 }
 0x182   : >> { %1035 = vst.msk [vmem:[#allocation5 + $0x78] sm:$0xff] %vm1019_vm6, %v1002_v9  ;;  %1027 = vst.msk [vmem:[#allocation5 + $0x38] sm:$0xff] %vm1019_vm6, %v986_v10 }
 0x185   : >> { %v1100_v11 = vpop.permute.xlu1 %1099  ;;  %v1084_v12 = vpop.permute.xlu0 %1083 }
 0x186   : >> { %1134 = vst.msk [vmem:[#allocation5 + $0x70] sm:$0xff] %vm1119_vm7, %v1100_v11  ;;  %1126 = vst.msk [vmem:[#allocation5 + $0x30] sm:$0xff] %vm1119_vm7, %v1084_v12 }
 0x189   : >> { %v1392_v28 = vpop.permute.xlu1 %1391  ;;  %v1376_v48 = vpop.permute.xlu0 %1375 }
 0x18a   : >> { %1427 = vst.msk [vmem:[#allocation5 + $0x68] sm:$0xff] %vm1413_vm10, %v1392_v28  ;;  %1419 = vst.msk [vmem:[#allocation5 + $0x28] sm:$0xff] %vm1413_vm10, %v1376_v48 }
 0x18d   : >> { %v1487_v13 = vpop.permute.xlu1 %1486  ;;  %v1471_v14 = vpop.permute.xlu0 %1470 }
 0x18e   : >> { %1523 = vst.msk [vmem:[#allocation5 + $0x60] sm:$0xff] %vm1510_vm11, %v1487_v13  ;;  %1515 = vst.msk [vmem:[#allocation5 + $0x20] sm:$0xff] %vm1510_vm11, %v1471_v14 }
 0x191   : >> { %v1102_v15 = vpop.permute.xlu1 %1101  ;;  %v1086_v16 = vpop.permute.xlu0 %1085 }
 0x192   : >> { %1135 = vst.msk [vmem:[#allocation5 + $0x78] sm:$0xff] %vm1119_vm7, %v1102_v15  ;;  %1127 = vst.msk [vmem:[#allocation5 + $0x38] sm:$0xff] %vm1119_vm7, %v1086_v16 }
 0x195   : >> { %v1197_v17 = vpop.permute.xlu1 %1196  ;;  %v1181_v18 = vpop.permute.xlu0 %1180 }
 0x196   : >> { %1231 = vst.msk [vmem:[#allocation5 + $0x70] sm:$0xff] %vm1216_vm8, %v1197_v17  ;;  %1223 = vst.msk [vmem:[#allocation5 + $0x30] sm:$0xff] %vm1216_vm8, %v1181_v18 }
 0x199   : >> { %v1489_v54 = vpop.permute.xlu1 %1488 }
 0x19a   : >> { %v1473_v19 = vpop.permute.xlu0 %1472  ;;  %1524 = vst.msk [vmem:[#allocation5 + $0x68] sm:$0xff] %vm1510_vm11, %v1489_v54 }
 0x19b   : >> { %1516 = vst.msk [vmem:[#allocation5 + $0x28] sm:$0xff] %vm1510_vm11, %v1473_v19 }
 0x19d   : >> { %v1584_v20 = vpop.permute.xlu1 %1583 }
 0x19e   : >> { %v1568_v30 = vpop.permute.xlu0 %1567  ;;  %1620 = vst.msk [vmem:[#allocation5 + $0x60] sm:$0xff] %vm1607_vm12, %v1584_v20 }
 0x19f   : >> { %1612 = vst.msk [vmem:[#allocation5 + $0x20] sm:$0xff] %vm1607_vm12, %v1568_v30 }
 0x1a1   : >> { %v1199_v21 = vpop.permute.xlu1 %1198 }
 0x1a2   : >> { %v1183_v22 = vpop.permute.xlu0 %1182  ;;  %1232 = vst.msk [vmem:[#allocation5 + $0x78] sm:$0xff] %vm1216_vm8, %v1199_v21 }
 0x1a3   : >> { %1224 = vst.msk [vmem:[#allocation5 + $0x38] sm:$0xff] %vm1216_vm8, %v1183_v22 }
 0x1a5   : >> { %v1294_v46 = vpop.permute.xlu1 %1293  ;;  %v1636_v0 = vld [vmem:[#allocation5 + $0x60] sm:$0xff] }
 0x1a6   : >> { %v1278_v23 = vpop.permute.xlu0 %1277  ;;  %v1628_v24 = vld [vmem:[#allocation5 + $0x20] sm:$0xff]  ;;  %1328 = vst.msk [vmem:[#allocation5 + $0x70] sm:$0xff] %vm1313_vm9, %v1294_v46  ;;  %5809 = vmatprep.mubr.msk.f32.mxu1 %vm1644_vm13, %v1636_v0 }
 0x1a7   : >> { %1320 = vst.msk [vmem:[#allocation5 + $0x30] sm:$0xff] %vm1313_vm9, %v1278_v23  ;;  %5797 = vmatprep.mubr.msk.f32.mxu0 %vm1644_vm13, %v1628_v24 }
 0x1a9   : >> { %v1586_v25 = vpop.permute.xlu1 %1585 }
 0x1aa   : >> { %v1570_v26 = vpop.permute.xlu0 %1569  ;;  %1621 = vst.msk [vmem:[#allocation5 + $0x68] sm:$0xff] %vm1607_vm12, %v1586_v25 }
 0x1ab   : >> { %1613 = vst.msk [vmem:[#allocation5 + $0x28] sm:$0xff] %vm1607_vm12, %v1570_v26 }
 0x1ad   : >> { %v1296_v2 = vpop.permute.xlu1 %1295 }
 0x1ae   : >> { %v1280_v27 = vpop.permute.xlu0 %1279  ;;  %1329 = vst.msk [vmem:[#allocation5 + $0x78] sm:$0xff] %vm1313_vm9, %v1296_v2 }
 0x1af   : >> { %1321 = vst.msk [vmem:[#allocation5 + $0x38] sm:$0xff] %vm1313_vm9, %v1280_v27 }
 0x1b1   : >> { %v1394_v31 = vpop.permute.xlu1 %1393  ;;  %v1637_v49 = vld [vmem:[#allocation5 + $0x68] sm:$0xff] }
 0x1b2   : >> { %v1378_v4 = vpop.permute.xlu0 %1377  ;;  %v1629_v47 = vld [vmem:[#allocation5 + $0x28] sm:$0xff]  ;;  %1428 = vst.msk [vmem:[#allocation5 + $0x70] sm:$0xff] %vm1413_vm10, %v1394_v31  ;;  %5810 = vmatmul.mubr.msk.f32.gmra.mrb[4].mxu1 %vm1644_vm13, %v1637_v49 }
 0x1b3   : >> { %1420 = vst.msk [vmem:[#allocation5 + $0x30] sm:$0xff] %vm1413_vm10, %v1378_v4  ;;  %5798 = vmatmul.mubr.msk.f32.gmra.mrb[4].mxu0 %vm1644_vm13, %v1629_v47 }
 0x1b5   : >> { %v1396_v50 = vpop.permute.xlu1 %1395 }
 0x1b6   : >> { %v1380_v6 = vpop.permute.xlu0 %1379  ;;  %1429 = vst.msk [vmem:[#allocation5 + $0x78] sm:$0xff] %vm1413_vm10, %v1396_v50 }
 0x1b7   : >> { %1421 = vst.msk [vmem:[#allocation5 + $0x38] sm:$0xff] %vm1413_vm10, %v1380_v6 }
 0x1b9   : >> { %v1491_v51 = vpop.permute.xlu1 %1490 }
 0x1ba   : >> { %v1475_v61 = vpop.permute.xlu0 %1474  ;;  %1525 = vst.msk [vmem:[#allocation5 + $0x70] sm:$0xff] %vm1510_vm11, %v1491_v51 }
 0x1bb   : >> { %1517 = vst.msk [vmem:[#allocation5 + $0x30] sm:$0xff] %vm1510_vm11, %v1475_v61 }
 0x1bd   : >> { %v1493_v52 = vpop.permute.xlu1 %1492 }
 0x1be   : >> { %v1477_v53 = vpop.permute.xlu0 %1476  ;;  %1526 = vst.msk [vmem:[#allocation5 + $0x78] sm:$0xff] %vm1510_vm11, %v1493_v52 }
 0x1bf   : >> { %1518 = vst.msk [vmem:[#allocation5 + $0x38] sm:$0xff] %vm1510_vm11, %v1477_v53 }
 0x1c1   : >> { %v1588_v55 = vpop.permute.xlu1 %1587 }
 0x1c2   : >> { %v1572_v56 = vpop.permute.xlu0 %1571  ;;  %1622 = vst.msk [vmem:[#allocation5 + $0x70] sm:$0xff] %vm1607_vm12, %v1588_v55 }
 0x1c3   : >> { %1614 = vst.msk [vmem:[#allocation5 + $0x30] sm:$0xff] %vm1607_vm12, %v1572_v56 }
 0x1c5   : >> { %v1590_v57 = vpop.permute.xlu1 %1589 }
 0x1c6   : >> { %v1574_v58 = vpop.permute.xlu0 %1573  ;;  %1623 = vst.msk [vmem:[#allocation5 + $0x78] sm:$0xff] %vm1607_vm12, %v1590_v57 }
 0x1c7   : >> { %1615 = vst.msk [vmem:[#allocation5 + $0x38] sm:$0xff] %vm1607_vm12, %v1574_v58 }
 0x1c9   : >> { %v1638_v62 = vld [vmem:[#allocation5 + $0x70] sm:$0xff] }
 0x1ca   : >> { %v1630_v59 = vld [vmem:[#allocation5 + $0x30] sm:$0xff]  ;;  %5812 = vmatprep.mubr.msk.f32.mxu1 %vm1644_vm13, %v1638_v62 }
 0x1cb   : >> { %5800 = vmatprep.mubr.msk.f32.mxu0 %vm1644_vm13, %v1630_v59 }
 0x1cd   : >> { %v1639_v60 = vld [vmem:[#allocation5 + $0x78] sm:$0xff] }
 0x1ce   : >> { %v1631_v29 = vld [vmem:[#allocation5 + $0x38] sm:$0xff]  ;;  %5813 = vmatmul.mubr.msk.f32.gmra.mrb[6].mxu1 %vm1644_vm13, %v1639_v60 }
 0x1cf   : >> { %5801 = vmatmul.mubr.msk.f32.gmra.mrb[6].mxu0 %vm1644_vm13, %v1631_v29 }
 0x209   : >> { %v5793_v7 = vpop.f32.mrb[0].mxu0 }
 0x20a   : >> { %v5805_v8 = vpop.f32.mrb[0].mxu1  ;;  %v1769_v9 = vadd.f32 %v5793_v7, %v1643_v5  ;;  %v1763_v11 = vpop.f32.mrb[1].mxu0 }
 0x20b   : >> { %v1809_v10 = vadd.f32 %v5805_v8, %v1643_v5  ;;  %v1803_v12 = vpop.f32.mrb[1].mxu1  ;;  %v1764_v28 = vadd.f32 %v1763_v11, %v1643_v5 }
 0x20c   : >> { %v1804_v48 = vadd.f32 %v1803_v12, %v1643_v5  ;;  %v1843_v13 = vmax.f32 %v1769_v9, 0.0 }
 0x20d   : >> { %v1851_v14 = vmax.f32 %v1809_v10, 0.0  ;;  %v1842_v15 = vmax.f32 %v1764_v28, 0.0 }
 0x20e   : >> { %v1850_v16 = vmax.f32 %v1804_v48, 0.0  ;;  %1861 = vst.msk [vmem:[%s6926_s15 + $0x8] sm:$0xff] %vm744_vm2, %v1843_v13 }
 0x20f   : >> { %1869 = vst.msk [vmem:[%s6926_s15 + $0x48] sm:$0xff] %vm744_vm2, %v1851_v14  ;;  %1860 = vst.msk [vmem:[%s6926_s15] sm:$0xff] %vm744_vm2, %v1842_v15 }
 0x210   : >> { %1868 = vst.msk [vmem:[%s6926_s15 + $0x40] sm:$0xff] %vm744_vm2, %v1850_v16 }
 0x249   : >> { %v5796_v17 = vpop.f32.mrb[2].mxu0 }
 0x24a   : >> { %v5808_v18 = vpop.f32.mrb[2].mxu1  ;;  %v1779_v54 = vadd.f32 %v5796_v17, %v1643_v5  ;;  %v1773_v20 = vpop.f32.mrb[3].mxu0 }
 0x24b   : >> { %v1819_v19 = vadd.f32 %v5808_v18, %v1643_v5  ;;  %v1813_v30 = vpop.f32.mrb[3].mxu1  ;;  %v1774_v21 = vadd.f32 %v1773_v20, %v1643_v5 }
 0x24c   : >> { %v1814_v22 = vadd.f32 %v1813_v30, %v1643_v5  ;;  %v1845_v46 = vmax.f32 %v1779_v54, 0.0 }
 0x24d   : >> { %v1853_v23 = vmax.f32 %v1819_v19, 0.0  ;;  %v1844_v24 = vmax.f32 %v1774_v21, 0.0 }
 0x24e   : >> { %v1852_v0 = vmax.f32 %v1814_v22, 0.0  ;;  %1863 = vst.msk [vmem:[%s6926_s15 + $0x18] sm:$0xff] %vm744_vm2, %v1845_v46 }
 0x24f   : >> { %1871 = vst.msk [vmem:[%s6926_s15 + $0x58] sm:$0xff] %vm744_vm2, %v1853_v23  ;;  %1862 = vst.msk [vmem:[%s6926_s15 + $0x10] sm:$0xff] %vm744_vm2, %v1844_v24 }
 0x250   : >> { %1870 = vst.msk [vmem:[%s6926_s15 + $0x50] sm:$0xff] %vm744_vm2, %v1852_v0 }
 0x285   : >> { %v5811_v26 = vpop.f32.mrb[4].mxu1 }
 0x286   : >> { %v5799_v25 = vpop.f32.mrb[4].mxu0  ;;  %v1829_v27 = vadd.f32 %v5811_v26, %v1643_v5  ;;  %v1823_v4 = vpop.f32.mrb[5].mxu1 }
 0x287   : >> { %v1789_v2 = vadd.f32 %v5799_v25, %v1643_v5  ;;  %v1783_v31 = vpop.f32.mrb[5].mxu0  ;;  %v1824_v49 = vadd.f32 %v1823_v4, %v1643_v5 }
 0x288   : >> { %v1784_v47 = vadd.f32 %v1783_v31, %v1643_v5  ;;  %v1855_v6 = vmax.f32 %v1829_v27, 0.0 }
 0x289   : >> { %v1847_v50 = vmax.f32 %v1789_v2, 0.0  ;;  %v1854_v61 = vmax.f32 %v1824_v49, 0.0 }
 0x28a   : >> { %v1846_v51 = vmax.f32 %v1784_v47, 0.0  ;;  %1873 = vst.msk [vmem:[%s6926_s15 + $0x68] sm:$0xff] %vm744_vm2, %v1855_v6 }
 0x28b   : >> { %1865 = vst.msk [vmem:[%s6926_s15 + $0x28] sm:$0xff] %vm744_vm2, %v1847_v50  ;;  %1872 = vst.msk [vmem:[%s6926_s15 + $0x60] sm:$0xff] %vm744_vm2, %v1854_v61 }
 0x28c   : >> { %1864 = vst.msk [vmem:[%s6926_s15 + $0x20] sm:$0xff] %vm744_vm2, %v1846_v51 }
 0x2a1   : >> { %v5814_v53 = vpop.f32.mrb[6].mxu1 }
 0x2a2   : >> { %v5802_v52 = vpop.f32.mrb[6].mxu0  ;;  %v1839_v56 = vadd.f32 %v5814_v53, %v1643_v5  ;;  %v1833_v58 = vpop.f32.mrb[7].mxu1  ;;  %805 = sbr.rel (!%p803_p8) target bundleno = 80 (0x50), region = 140 }
 0x2a3   : >> { %v1799_v55 = vadd.f32 %v5802_v52, %v1643_v5  ;;  %v1793_v57 = vpop.f32.mrb[7].mxu0  ;;  %v1834_v62 = vadd.f32 %v1833_v58, %v1643_v5 }
 0x2a4   : >> { %v1794_v59 = vadd.f32 %v1793_v57, %v1643_v5  ;;  %v1857_v60 = vmax.f32 %v1839_v56, 0.0 }
 0x2a5   : >> { %v1849_v29 = vmax.f32 %v1799_v55, 0.0  ;;  %v1856_v7 = vmax.f32 %v1834_v62, 0.0 }
 0x2a6   : >> { %v1848_v63 = vmax.f32 %v1794_v59, 0.0  ;;  %1875 = vst.msk [vmem:[%s6926_s15 + $0x78] sm:$0xff] %vm744_vm2, %v1857_v60 }
 0x2a7   : >> { %1867 = vst.msk [vmem:[%s6926_s15 + $0x38] sm:$0xff] %vm744_vm2, %v1849_v29  ;;  %1874 = vst.msk [vmem:[%s6926_s15 + $0x70] sm:$0xff] %vm744_vm2, %v1856_v7 }
 0x2a8   : >> { %1866 = vst.msk [vmem:[%s6926_s15 + $0x30] sm:$0xff] %vm744_vm2, %v1848_v63 }
 0x2af   : > { %v1876_v8 = vld [vmem:[#allocation3] sm:$0xff]  ;;  %v1877_v5 = vld [vmem:[#allocation3 + $0x8] sm:$0xff]  ;;  %v1878_v9 = vld [vmem:[#allocation3 + $0x10] sm:$0xff] }
 0x2b0   : > { %v1924_v10 = vrot.slane %v1876_v8, 1  ;;  %v1972_v11 = vrot.slane %v1876_v8, 7  ;;  %v1973_v12 = vrot.slane %v1877_v5, 7  ;;  %v2068_v28 = vrot.slane %v1877_v5, 5  ;;  %v1879_v48 = vld [vmem:[#allocation3 + $0x18] sm:$0xff]  ;;  %v1880_v13 = vld [vmem:[#allocation3 + $0x20] sm:$0xff] }
 0x2b1   : > { %v1925_v14 = vrot.slane %v1878_v9, 1  ;;  %v1975_v15 = vrot.slane %v1878_v9, 7  ;;  %v1976_v16 = vrot.slane %v1879_v48, 7  ;;  %v2069_v17 = vrot.slane %v1879_v48, 5  ;;  %v1881_v18 = vld [vmem:[#allocation3 + $0x28] sm:$0xff]  ;;  %v1882_v54 = vld [vmem:[#allocation3 + $0x30] sm:$0xff] }
 0x2b2   : > { %v2100_v19 = vsel %vm582_vm1, %v1924_v10, %v1972_v11  ;;  %v1974_v20 = vsel %vm582_vm1, %v1972_v11, %v1973_v12  ;;  %v2116_v32 = vsel %vm582_vm1, %v1973_v12, %v2068_v28  ;;  %v1926_v33 = vrot.slane %v1880_v13, 1  ;;  %v1883_v34 = vld [vmem:[#allocation3 + $0x38] sm:$0xff]  ;;  %v1884_v35 = vld [vmem:[#allocation3 + $0x40] sm:$0xff]  ;;  %v1885_v25 = vld [vmem:[#allocation3 + $0x48] sm:$0xff] }
 0x2b3   : > { %2132 = vst.msk [vmem:[#allocation4 + $0x18] sm:$0xff] %vm744_vm2, %v2100_v19  ;;  %2133 = vst.msk [vmem:[#allocation4 + $0x20] sm:$0xff] %vm744_vm2, %v1974_v20  ;;  %v2101_v36 = vsel %vm582_vm1, %v1925_v14, %v1975_v15  ;;  %v1977_v30 = vsel %vm582_vm1, %v1975_v15, %v1976_v16  ;;  %v2117_v21 = vsel %vm582_vm1, %v1976_v16, %v2069_v17  ;;  %v1978_v22 = vrot.slane %v1880_v13, 7  ;;  %v1886_v4 = vld [vmem:[#allocation3 + $0x50] sm:$0xff]  ;;  %v1887_v47 = vld [vmem:[#allocation3 + $0x58] sm:$0xff] }
 0x2b4   : > { %2134 = vst.msk [vmem:[#allocation4 + $0x28] sm:$0x3] %vm747_vm3, %v2116_v32  ;;  %2137 = vst.msk [vmem:[#allocation4 + $0x40] sm:$0x3] %vm747_vm3, %v2117_v21  ;;  %v1979_v46 = vrot.slane %v1881_v18, 7  ;;  %v2070_v23 = vrot.slane %v1881_v18, 5 }
 0x2b5   : > { %2135 = vst.msk [vmem:[#allocation4 + $0x30] sm:$0xff] %vm744_vm2, %v2101_v36  ;;  %2180 = vst.msk [vmem:[#allocation4] sm:$0xff] %vm744_vm2, %v2101_v36  ;;  %v1927_v24 = vrot.slane %v1882_v54, 1  ;;  %v1981_v0 = vrot.slane %v1882_v54, 7  ;;  %v2102_v26 = vsel %vm582_vm1, %v1926_v33, %v1978_v22  ;;  %v1982_v2 = vrot.slane %v1883_v34, 7  ;;  %v1888_v61 = vld [vmem:[#allocation3 + $0x60] sm:$0xff] }
 0x2b6   : > { %2136 = vst.msk [vmem:[#allocation4 + $0x38] sm:$0xff] %vm744_vm2, %v1977_v30  ;;  %2181 = vst.msk [vmem:[#allocation4 + $0x8] sm:$0xff] %vm744_vm2, %v1977_v30  ;;  %v2071_v27 = vrot.slane %v1883_v34, 5  ;;  %v1928_v31 = vrot.slane %v1884_v35, 1  ;;  %v1980_v49 = vsel %vm582_vm1, %v1978_v22, %v1979_v46  ;;  %v2118_v50 = vsel %vm582_vm1, %v1979_v46, %v2070_v23  ;;  %v1889_v57 = vld [vmem:[#allocation3 + $0x68] sm:$0xff]  ;;  %v1890_v60 = vld [vmem:[#allocation3 + $0x70] sm:$0xff] }
 0x2b7   : > { %2182 = vst.msk [vmem:[#allocation4 + $0x10] sm:$0x3] %vm747_vm3, %v2117_v21  ;;  %v2103_v6 = vsel %vm582_vm1, %v1927_v24, %v1981_v0  ;;  %v1984_v51 = vrot.slane %v1884_v35, 7  ;;  %2140 = vst.msk [vmem:[#allocation4 + $0x58] sm:$0x3] %vm747_vm3, %v2118_v50  ;;  %v1983_v52 = vsel %vm582_vm1, %v1981_v0, %v1982_v2  ;;  %v1985_v55 = vrot.slane %v1885_v25, 7 }
 0x2b8   : > { %2138 = vst.msk [vmem:[#allocation4 + $0x48] sm:$0xff] %vm744_vm2, %v2102_v26  ;;  %2139 = vst.msk [vmem:[#allocation4 + $0x50] sm:$0xff] %vm744_vm2, %v1980_v49  ;;  %v2119_v53 = vsel %vm582_vm1, %v1982_v2, %v2071_v27  ;;  %v2072_v56 = vrot.slane %v1885_v25, 5  ;;  %v1929_v59 = vrot.slane %v1886_v4, 1  ;;  %v1987_v62 = vrot.slane %v1886_v4, 7  ;;  %v1891_v9 = vld [vmem:[#allocation3 + $0x78] sm:$0xff] }
 0x2b9   : > { %2141 = vst.msk [vmem:[#allocation4 + $0x60] sm:$0xff] %vm744_vm2, %v2103_v6  ;;  %2142 = vst.msk [vmem:[#allocation4 + $0x68] sm:$0xff] %vm744_vm2, %v1983_v52  ;;  %v2104_v58 = vsel %vm582_vm1, %v1928_v31, %v1984_v51  ;;  %v1988_v29 = vrot.slane %v1887_v47, 7  ;;  %v1986_v63 = vsel %vm582_vm1, %v1984_v51, %v1985_v55  ;;  %v2073_v8 = vrot.slane %v1887_v47, 5  ;;  %v1892_v48 = vld [vmem:[#allocation3 + $0x80] sm:$0xff]  ;;  %v1893_v17 = vld [vmem:[#allocation3 + $0x88] sm:$0xff] }
 0x2ba   : > { %2143 = vst.msk [vmem:[#allocation4 + $0x70] sm:$0x3] %vm747_vm3, %v2119_v53  ;;  %v2120_v7 = vsel %vm582_vm1, %v1985_v55, %v2072_v56  ;;  %v1930_v5 = vrot.slane %v1888_v61, 1  ;;  %v2105_v10 = vsel %vm582_vm1, %v1929_v59, %v1987_v62  ;;  %v1990_v12 = vrot.slane %v1888_v61, 7  ;;  %v1894_v32 = vld [vmem:[#allocation3 + $0x90] sm:$0xff]  ;;  %v1895_v33 = vld [vmem:[#allocation3 + $0x98] sm:$0xff] }
 0x2bb   : > { %2144 = vst.msk [vmem:[#allocation4 + $0x78] sm:$0xff] %vm744_vm2, %v2104_v58  ;;  %2145 = vst.msk [vmem:[#allocation4 + $0x80] sm:$0xff] %vm744_vm2, %v1986_v63  ;;  %v1989_v11 = vsel %vm582_vm1, %v1987_v62, %v1988_v29  ;;  %v1991_v28 = vrot.slane %v1889_v57, 7  ;;  %v2121_v13 = vsel %vm582_vm1, %v1988_v29, %v2073_v8  ;;  %v2074_v14 = vrot.slane %v1889_v57, 5  ;;  %v1896_v21 = vld [vmem:[#allocation3 + $0xa0] sm:$0xff]  ;;  %v1897_v0 = vld [vmem:[#allocation3 + $0xa8] sm:$0xff] }
 0x2bc   : > { %2146 = vst.msk [vmem:[#allocation4 + $0x88] sm:$0x3] %vm747_vm3, %v2120_v7  ;;  %v1931_v15 = vrot.slane %v1890_v60, 1  ;;  %v1993_v16 = vrot.slane %v1890_v60, 7  ;;  %2149 = vst.msk [vmem:[#allocation4 + $0xa0] sm:$0x3] %vm747_vm3, %v2121_v13  ;;  %v2106_v18 = vsel %vm582_vm1, %v1930_v5, %v1990_v12 }
 0x2bd   : > { %2147 = vst.msk [vmem:[#allocation4 + $0x90] sm:$0xff] %vm744_vm2, %v2105_v10  ;;  %2148 = vst.msk [vmem:[#allocation4 + $0x98] sm:$0xff] %vm744_vm2, %v1989_v11  ;;  %v1992_v54 = vsel %vm582_vm1, %v1990_v12, %v1991_v28  ;;  %v1994_v19 = vrot.slane %v1891_v9, 7  ;;  %v2075_v20 = vrot.slane %v1891_v9, 5  ;;  %v2122_v34 = vsel %vm582_vm1, %v1991_v28, %v2074_v14  ;;  %v1898_v31 = vld [vmem:[#allocation3 + $0xb0] sm:$0xff]  ;;  %v1899_v6 = vld [vmem:[#allocation3 + $0xb8] sm:$0xff] }
 0x2be   : > { %2150 = vst.msk [vmem:[#allocation4 + $0xa8] sm:$0xff] %vm744_vm2, %v2106_v18  ;;  %2151 = vst.msk [vmem:[#allocation4 + $0xb0] sm:$0xff] %vm744_vm2, %v1992_v54  ;;  %v2107_v35 = vsel %vm582_vm1, %v1931_v15, %v1993_v16  ;;  %v1932_v36 = vrot.slane %v1892_v48, 1  ;;  %v1996_v30 = vrot.slane %v1892_v48, 7  ;;  %v1997_v23 = vrot.slane %v1893_v17, 7  ;;  %v1900_v55 = vld [vmem:[#allocation3 + $0xc0] sm:$0xff] }
 0x2bf   : > { %2152 = vst.msk [vmem:[#allocation4 + $0xb8] sm:$0x3] %vm747_vm3, %v2122_v34  ;;  %v1995_v22 = vsel %vm582_vm1, %v1993_v16, %v1994_v19  ;;  %v2123_v46 = vsel %vm582_vm1, %v1994_v19, %v2075_v20  ;;  %v2076_v24 = vrot.slane %v1893_v17, 5  ;;  %v1933_v26 = vrot.slane %v1894_v32, 1  ;;  %v1901_v62 = vld [vmem:[#allocation3 + $0xc8] sm:$0xff]  ;;  %v1902_v8 = vld [vmem:[#allocation3 + $0xd0] sm:$0xff] }
 0x2c0   : > { %2153 = vst.msk [vmem:[#allocation4 + $0xc0] sm:$0xff] %vm744_vm2, %v2107_v35  ;;  %2154 = vst.msk [vmem:[#allocation4 + $0xc8] sm:$0xff] %vm744_vm2, %v1995_v22  ;;  %v2108_v25 = vsel %vm582_vm1, %v1932_v36, %v1996_v30  ;;  %v1999_v2 = vrot.slane %v1894_v32, 7  ;;  %v2000_v27 = vrot.slane %v1895_v33, 7  ;;  %v1998_v4 = vsel %vm582_vm1, %v1996_v30, %v1997_v23  ;;  %v1903_v5 = vld [vmem:[#allocation3 + $0xd8] sm:$0xff]  ;;  %v1904_v28 = vld [vmem:[#allocation3 + $0xe0] sm:$0xff] }
 0x2c1   : > { %2155 = vst.msk [vmem:[#allocation4 + $0xd0] sm:$0x3] %vm747_vm3, %v2123_v46  ;;  %v2124_v47 = vsel %vm582_vm1, %v1997_v23, %v2076_v24  ;;  %v2077_v49 = vrot.slane %v1895_v33, 5  ;;  %v1934_v50 = vrot.slane %v1896_v21, 1  ;;  %v2002_v52 = vrot.slane %v1896_v21, 7  ;;  %v1905_v16 = vld [vmem:[#allocation3 + $0xe8] sm:$0xff] }
 0x2c2   : > { %2156 = vst.msk [vmem:[#allocation4 + $0xd8] sm:$0xff] %vm744_vm2, %v2108_v25  ;;  %2157 = vst.msk [vmem:[#allocation4 + $0xe0] sm:$0xff] %vm744_vm2, %v1998_v4  ;;  %v2109_v51 = vsel %vm582_vm1, %v1933_v26, %v1999_v2  ;;  %v2001_v61 = vsel %vm582_vm1, %v1999_v2, %v2000_v27  ;;  %v2003_v53 = vrot.slane %v1897_v0, 7  ;;  %v2078_v57 = vrot.slane %v1897_v0, 5  ;;  %v1906_v20 = vld [vmem:[#allocation3 + $0xf0] sm:$0xff]  ;;  %v1907_v36 = vld [vmem:[#allocation3 + $0xf8] sm:$0xff] }
 0x2c3   : > { %2158 = vst.msk [vmem:[#allocation4 + $0xe8] sm:$0x3] %vm747_vm3, %v2124_v47  ;;  %v2125_v56 = vsel %vm582_vm1, %v2000_v27, %v2077_v49  ;;  %v1935_v58 = vrot.slane %v1898_v31, 1  ;;  %v2005_v59 = vrot.slane %v1898_v31, 7  ;;  %v2110_v29 = vsel %vm582_vm1, %v1934_v50, %v2002_v52 }
 0x2c4   : > { %2159 = vst.msk [vmem:[#allocation4 + $0xf0] sm:$0xff] %vm744_vm2, %v2109_v51  ;;  %2160 = vst.msk [vmem:[#allocation4 + $0xf8] sm:$0xff] %vm744_vm2, %v2001_v61  ;;  %v2004_v60 = vsel %vm582_vm1, %v2002_v52, %v2003_v53  ;;  %v2006_v63 = vrot.slane %v1899_v6, 7  ;;  %v2079_v7 = vrot.slane %v1899_v6, 5  ;;  %v2126_v9 = vsel %vm582_vm1, %v2003_v53, %v2078_v57 }
 0x2c5   : > { %2161 = vst.msk [vmem:[#allocation4 + $0x100] sm:$0x3] %vm747_vm3, %v2125_v56  ;;  %v2111_v10 = vsel %vm582_vm1, %v1935_v58, %v2005_v59  ;;  %v1936_v11 = vrot.slane %v1900_v55, 1  ;;  %v2008_v12 = vrot.slane %v1900_v55, 7  ;;  %2164 = vst.msk [vmem:[#allocation4 + $0x118] sm:$0x3] %vm747_vm3, %v2126_v9 }
 0x2c6   : > { %2162 = vst.msk [vmem:[#allocation4 + $0x108] sm:$0xff] %vm744_vm2, %v2110_v29  ;;  %2163 = vst.msk [vmem:[#allocation4 + $0x110] sm:$0xff] %vm744_vm2, %v2004_v60  ;;  %v2007_v48 = vsel %vm582_vm1, %v2005_v59, %v2006_v63  ;;  %v2127_v13 = vsel %vm582_vm1, %v2006_v63, %v2079_v7  ;;  %v2009_v14 = vrot.slane %v1901_v62, 7  ;;  %v2080_v15 = vrot.slane %v1901_v62, 5 }
 0x2c7   : > { %2165 = vst.msk [vmem:[#allocation4 + $0x120] sm:$0xff] %vm744_vm2, %v2111_v10  ;;  %2166 = vst.msk [vmem:[#allocation4 + $0x128] sm:$0xff] %vm744_vm2, %v2007_v48  ;;  %v2112_v17 = vsel %vm582_vm1, %v1936_v11, %v2008_v12  ;;  %v1937_v18 = vrot.slane %v1902_v8, 1  ;;  %v2011_v54 = vrot.slane %v1902_v8, 7  ;;  %v2012_v19 = vrot.slane %v1903_v5, 7 }
 0x2c8   : > { %2167 = vst.msk [vmem:[#allocation4 + $0x130] sm:$0x3] %vm747_vm3, %v2127_v13  ;;  %v2010_v32 = vsel %vm582_vm1, %v2008_v12, %v2009_v14  ;;  %v2128_v33 = vsel %vm582_vm1, %v2009_v14, %v2080_v15  ;;  %v2081_v34 = vrot.slane %v1903_v5, 5  ;;  %v1938_v35 = vrot.slane %v1904_v28, 1 }
 0x2c9   : > { %2168 = vst.msk [vmem:[#allocation4 + $0x138] sm:$0xff] %vm744_vm2, %v2112_v17  ;;  %2169 = vst.msk [vmem:[#allocation4 + $0x140] sm:$0xff] %vm744_vm2, %v2010_v32  ;;  %v2113_v30 = vsel %vm582_vm1, %v1937_v18, %v2011_v54  ;;  %v2013_v21 = vsel %vm582_vm1, %v2011_v54, %v2012_v19  ;;  %v2014_v22 = vrot.slane %v1904_v28, 7  ;;  %v2015_v46 = vrot.slane %v1905_v16, 7 }
 0x2ca   : > { %2170 = vst.msk [vmem:[#allocation4 + $0x148] sm:$0x3] %vm747_vm3, %v2128_v33  ;;  %v2129_v23 = vsel %vm582_vm1, %v2012_v19, %v2081_v34  ;;  %v2082_v24 = vrot.slane %v1905_v16, 5  ;;  %v1939_v0 = vrot.slane %v1906_v20, 1  ;;  %v2017_v25 = vrot.slane %v1906_v20, 7 }
 0x2cb   : > { %2171 = vst.msk [vmem:[#allocation4 + $0x150] sm:$0xff] %vm744_vm2, %v2113_v30  ;;  %2172 = vst.msk [vmem:[#allocation4 + $0x158] sm:$0xff] %vm744_vm2, %v2013_v21  ;;  %v2114_v26 = vsel %vm582_vm1, %v1938_v35, %v2014_v22  ;;  %v2016_v2 = vsel %vm582_vm1, %v2014_v22, %v2015_v46  ;;  %v2018_v27 = vrot.slane %v1907_v36, 7  ;;  %v2083_v31 = vrot.slane %v1907_v36, 5 }
 0x2cc   : > { %2173 = vst.msk [vmem:[#allocation4 + $0x160] sm:$0x3] %vm747_vm3, %v2129_v23  ;;  %v2130_v4 = vsel %vm582_vm1, %v2015_v46, %v2082_v24  ;;  %v2115_v47 = vsel %vm582_vm1, %v1939_v0, %v2017_v25 }
 0x2cd   : > { %2174 = vst.msk [vmem:[#allocation4 + $0x168] sm:$0xff] %vm744_vm2, %v2114_v26  ;;  %2183 = vst.msk [vmem:[#allocation4 + $0x198] sm:$0xff] %vm744_vm2, %v2114_v26  ;;  %v2019_v49 = vsel %vm582_vm1, %v2017_v25, %v2018_v27  ;;  %v2131_v50 = vsel %vm582_vm1, %v2018_v27, %v2083_v31 }
 0x2ce   : > { %2175 = vst.msk [vmem:[#allocation4 + $0x170] sm:$0xff] %vm744_vm2, %v2016_v2  ;;  %2184 = vst.msk [vmem:[#allocation4 + $0x1a0] sm:$0xff] %vm744_vm2, %v2016_v2 }
 0x2cf   : > { %2176 = vst.msk [vmem:[#allocation4 + $0x178] sm:$0x3] %vm747_vm3, %v2130_v4  ;;  %2185 = vst.msk [vmem:[#allocation4 + $0x1a8] sm:$0x3] %vm747_vm3, %v2130_v4 }
 0x2d0   : > { %2177 = vst.msk [vmem:[#allocation4 + $0x180] sm:$0xff] %vm744_vm2, %v2115_v47  ;;  %2178 = vst.msk [vmem:[#allocation4 + $0x188] sm:$0xff] %vm744_vm2, %v2019_v49 }
 0x2d1   : > { %2179 = vst.msk [vmem:[#allocation4 + $0x190] sm:$0x3] %vm747_vm3, %v2131_v50 }
 0x2d2 LB: >> { %s5461_s20 = smul.u32 192, %s6088_s17  ;;  %s6102_s30 = smov 4   ;;  %v5901_v21 = vpack.c.bf16 %v6322_v38, %v6319_v37  ;;  %v5905_v22 = vpack.c.bf16 %v6328_v40, %v6325_v39  ;;  %s6088_s17 = sphi %s7065_s17, %s2191_s17  }
 0x2d3   : >> { %s6103_s10 = smov 8   ;;  %s6104_s0 = smov 12  }
 0x2d4   : >> { %s7071_s21 = scalar_lea.vmem [#allocation4], %s5461_s20  ;;  %s6105_s11 = smov 16   ;;  %5902 = vmatprep.subr.bf16.mxu0 %v5901_v21  ;;  %5923 = vmatprep.subr.bf16.mxu1 %v5901_v21 }
 0x2d5   : >> { %s6106_s12 = smov 20   ;;  %s6107_s13 = smov 24   ;;  %5904 = vmatpush3.bf16.msra.mxu0 %v5901_v21  ;;  %5926 = vmatpush3.bf16.msra.mxu1 %v5901_v21 }
 0x2d6   : >> { %s6108_s18 = smov 28   ;;  %s6109_s19 = smov 32   ;;  %5906 = vmatprep.subr.bf16.mxu0 %v5905_v22  ;;  %5924 = vmatprep.subr.bf16.mxu1 %v5905_v22 }
 0x2d7   : >> { %s5712_s22 = sshll.u32 %s6088_s17, 7  ;;  %s2191_s17 = sadd.s32 1, %s6088_s17  }
 0x2d8   : >> { %v2228_v6 = vld [vmem:[%s7071_s21 + $0x9] sm:$0xff]  ;;  %v2227_v51 = vld [vmem:[%s7071_s21 + $0x1] sm:$0xff]  ;;  %v7084_v53 = vld [vmem:[%s7071_s21 + $0x78] sm:$0xff]  ;;  %s7536_s24 = scalar_lea.vmem [#allocation3], %s5712_s22  ;;  %p2188_p9 = scmp.ge.s32.totalorder %s2191_s17, 2  }
 0x2d9   : >> { %2261 = vrot.lane.b32.xlu1 %v2228_v6, %s6102_s30  ;;  %2259 = vrot.lane.b32.xlu0 %v2227_v51, %s6102_s30  ;;  %v7078_v61 = vld [vmem:[%s7071_s21 + $0x69] sm:$0xff]  ;;  %v7081_v52 = vld [vmem:[%s7071_s21 + $0x61] sm:$0xff]  ;;  %2221 = vst.msk [vmem:[#allocation5 + $0x50] sm:$0xff] %vm744_vm2, %v7084_v53  ;;  %vm6111_vm14 = vmmov (%p2188_p9), 0   ;;  %vm3432_vm15 = vcmask (%p2188_p9), 1041408   ;;  %vm3428_vm0 = vcmask (%p2188_p9), 15360  }
 0x2da   : >> { %v5464_v55 = vld [vmem:[%s7071_s21 + $0x18] sm:$0xff]  ;;  %v7088_v56 = vld [vmem:[%s7071_s21 + $0x80] sm:$0xff]  ;;  %v7106_v62 = vld [vmem:[%s7071_s21 + $0x90] sm:$0xff]  ;;  %5908 = vmatpush3.bf16.msra.mxu0 %v5905_v22  ;;  %5927 = vmatpush3.bf16.msra.mxu1 %v5905_v22  ;;  %p5585_p10 = scmp.ne.s32.totalorder (%p2188_p9), %s6064_s27, 1 }
 0x2db   : >> { %v5465_v57 = vld [vmem:[%s7071_s21 + $0x20] sm:$0xff]  ;;  %2213 = vst.msk [vmem:[#allocation5 + $0x10] sm:$0xff] %vm744_vm2, %v5464_v55  ;;  %2222 = vst.msk [vmem:[#allocation5 + $0x58] sm:$0xff] %vm744_vm2, %v7088_v56  ;;  %v7109_v29 = vld [vmem:[%s7071_s21 + $0x30] sm:$0xff]  ;;  %5823 = vmatprep.subr.msk.mxu0 %vm1693_vm4, %v6331_v41  ;;  %5925 = vmatprep.subr.msk.mxu1 %vm1693_vm4, %v6331_v41 }
 0x2dc   : >> { %2214 = vst.msk [vmem:[#allocation5 + $0x18] sm:$0xff] %vm744_vm2, %v5465_v57  ;;  %v7102_v58 = vld [vmem:[%s7071_s21 + $0x62] sm:$0xff]  ;;  %v7112_v60 = vld [vmem:[%s7071_s21 + $0x98] sm:$0xff]  ;;  %2223 = vst.msk [vmem:[#allocation5 + $0x60] sm:$0xff] %vm744_vm2, %v7106_v62 }
 0x2dd   : >> { %2277 = vrot.lane.b32.xlu1 %v7078_v61, %s6102_s30  ;;  %2275 = vrot.lane.b32.xlu0 %v7081_v52, %s6102_s30  ;;  %v2324_v59 = vld [vmem:[%s7071_s21 + $0x2] sm:$0xff]  ;;  %v7115_v63 = vld [vmem:[%s7071_s21 + $0x38] sm:$0xff]  ;;  %2215 = vst.msk [vmem:[#allocation5 + $0x20] sm:$0xff] %vm744_vm2, %v7109_v29  ;;  %2224 = vst.msk [vmem:[#allocation5 + $0x68] sm:$0xff] %vm744_vm2, %v7112_v60 }
 0x2de   : >> { %2216 = vst.msk [vmem:[#allocation5 + $0x28] sm:$0xff] %vm744_vm2, %v7115_v63  ;;  %v7129_v7 = vld [vmem:[%s7071_s21 + $0x6a] sm:$0xff]  ;;  %v2195_v9 = vld [vmem:[%s7071_s21] sm:$0xff]  ;;  %v5554_v36 = vld [vmem:[%s7071_s21 + $0x92] sm:$0xff]  ;;  %5824 = vmatpush3.msk.msra.mxu0 %vm1693_vm4, %v6331_v41  ;;  %5928 = vmatpush3.msk.msra.mxu1 %vm1693_vm4, %v6331_v41 }
 0x2df   : >> { %v2325_v8 = vld [vmem:[%s7071_s21 + $0xa] sm:$0xff]  ;;  %2211 = vst.msk [vmem:[#allocation5] sm:$0xff] %vm744_vm2, %v2195_v9  ;;  %v7149_v28 = vld [vmem:[%s7071_s21 + $0x60] sm:$0xff]  ;;  %v5546_v30 = vld [vmem:[%s7071_s21 + $0x32] sm:$0xff] }
 0x2e0   : >> { %v2196_v5 = vld [vmem:[%s7071_s21 + $0x8] sm:$0xff]  ;;  %2219 = vst.msk [vmem:[#allocation5 + $0x40] sm:$0xff] %vm744_vm2, %v7149_v28  ;;  %v7160_v48 = vld [vmem:[%s7071_s21 + $0xb0] sm:$0xff]  ;;  %v7176_v14 = vld [vmem:[%s7071_s21 + $0x79] sm:$0xff] }
 0x2e1   : >> { %2372 = vrot.lane.b32.xlu1 %v7102_v58, %s6103_s10  ;;  %2356 = vrot.lane.b32.xlu0 %v2324_v59, %s6103_s10  ;;  %2212 = vst.msk [vmem:[#allocation5 + $0x8] sm:$0xff] %vm744_vm2, %v2196_v5  ;;  %v7136_v10 = vld [vmem:[%s7071_s21 + $0xa8] sm:$0xff]  ;;  %v7163_v13 = vld [vmem:[%s7071_s21 + $0x50] sm:$0xff]  ;;  %2226 = vst.msk [vmem:[#allocation5 + $0x78] sm:$0xff] %vm744_vm2, %v7160_v48 }
 0x2e2   : >> { %v7139_v11 = vld [vmem:[%s7071_s21 + $0x48] sm:$0xff]  ;;  %2225 = vst.msk [vmem:[#allocation5 + $0x70] sm:$0xff] %vm744_vm2, %v7136_v10  ;;  %2218 = vst.msk [vmem:[#allocation5 + $0x38] sm:$0xff] %vm744_vm2, %v7163_v13  ;;  %v5480_v15 = vld [vmem:[%s7071_s21 + $0x19] sm:$0xff] }
 0x2e3   : >> { %v7146_v12 = vld [vmem:[%s7071_s21 + $0x68] sm:$0xff]  ;;  %2217 = vst.msk [vmem:[#allocation5 + $0x30] sm:$0xff] %vm744_vm2, %v7139_v11  ;;  %v7193_v18 = vld [vmem:[%s7071_s21 + $0x7a] sm:$0xff]  ;;  %v5538_v32 = vld [vmem:[%s7071_s21 + $0x91] sm:$0xff] }
 0x2e4   : >> { %2220 = vst.msk [vmem:[#allocation5 + $0x48] sm:$0xff] %vm744_vm2, %v7146_v12  ;;  %v7186_v16 = vld [vmem:[%s7071_s21 + $0x81] sm:$0xff]  ;;  %v5530_v33 = vld [vmem:[%s7071_s21 + $0x31] sm:$0xff]  ;;  %v5539_v34 = vld [vmem:[%s7071_s21 + $0x99] sm:$0xff] }
 0x2e5   : >> { %2374 = vrot.lane.b32.xlu1 %v7129_v7, %s6103_s10  ;;  %2358 = vrot.lane.b32.xlu0 %v2325_v8, %s6103_s10  ;;  %v5481_v17 = vld [vmem:[%s7071_s21 + $0x21] sm:$0xff]  ;;  %v5531_v35 = vld [vmem:[%s7071_s21 + $0x39] sm:$0xff] }
 0x2e6   : >> { %v5496_v54 = vld [vmem:[%s7071_s21 + $0x1a] sm:$0xff]  ;;  %v7206_v19 = vld [vmem:[%s7071_s21 + $0x82] sm:$0xff]  ;;  %v5556_v8 = vld [vmem:[%s7071_s21 + $0xaa] sm:$0xff] }
 0x2e7   : >> { %v5497_v20 = vld [vmem:[%s7071_s21 + $0x22] sm:$0xff]  ;;  %v5555_v46 = vld [vmem:[%s7071_s21 + $0x9a] sm:$0xff]  ;;  %v5548_v5 = vld [vmem:[%s7071_s21 + $0x4a] sm:$0xff] }
 0x2e8   : >> { %v5547_v23 = vld [vmem:[%s7071_s21 + $0x3a] sm:$0xff]  ;;  %v5540_v47 = vld [vmem:[%s7071_s21 + $0xa9] sm:$0xff] }
 0x2e9   : >> { %2472 = vrot.lane.b32.xlu1 %v7084_v53, %s6104_s0  ;;  %2456 = vrot.lane.b32.xlu0 %v5464_v55, %s6104_s0  ;;  %v5532_v49 = vld [vmem:[%s7071_s21 + $0x49] sm:$0xff] }
 0x2ed   : >> { %2474 = vrot.lane.b32.xlu1 %v7088_v56, %s6104_s0  ;;  %2458 = vrot.lane.b32.xlu0 %v5465_v57, %s6104_s0 }
 0x2f1   : >> { %2569 = vrot.lane.b32.xlu1 %v7176_v14, %s6105_s11  ;;  %2553 = vrot.lane.b32.xlu0 %v5480_v15, %s6105_s11 }
 0x2f5   : >> { %2279 = vrot.lane.b32.xlu1 %v7176_v14, %s6102_s30  ;;  %2263 = vrot.lane.b32.xlu0 %v5480_v15, %s6102_s30 }
 0x2f9   : >> { %2571 = vrot.lane.b32.xlu1 %v7186_v16, %s6105_s11  ;;  %2555 = vrot.lane.b32.xlu0 %v5481_v17, %s6105_s11 }
 0x2fd   : >> { %2666 = vrot.lane.b32.xlu1 %v7193_v18, %s6106_s12  ;;  %2650 = vrot.lane.b32.xlu0 %v5496_v54, %s6106_s12 }
 0x301   : >> { %2281 = vrot.lane.b32.xlu1 %v7186_v16, %s6102_s30  ;;  %2265 = vrot.lane.b32.xlu0 %v5481_v17, %s6102_s30 }
 0x305   : >> { %2376 = vrot.lane.b32.xlu1 %v7193_v18, %s6103_s10  ;;  %2360 = vrot.lane.b32.xlu0 %v5496_v54, %s6103_s10 }
 0x309   : >> { %2668 = vrot.lane.b32.xlu1 %v7206_v19, %s6106_s12  ;;  %2652 = vrot.lane.b32.xlu0 %v5497_v20, %s6106_s12 }
 0x30d   : >> { %2766 = vrot.lane.b32.xlu1 %v7106_v62, %s6107_s13  ;;  %2750 = vrot.lane.b32.xlu0 %v7109_v29, %s6107_s13 }
 0x311   : >> { %2378 = vrot.lane.b32.xlu1 %v7206_v19, %s6103_s10  ;;  %2362 = vrot.lane.b32.xlu0 %v5497_v20, %s6103_s10  ;;  %v5557_v20 = vld [vmem:[%s7071_s21 + $0xb2] sm:$0xff] }
 0x315   : >> { %2476 = vrot.lane.b32.xlu1 %v7106_v62, %s6104_s0  ;;  %2460 = vrot.lane.b32.xlu0 %v7109_v29, %s6104_s0  ;;  %v5541_v62 = vld [vmem:[%s7071_s21 + $0xb1] sm:$0xff] }
 0x316   : >> { %v5533_v29 = vld [vmem:[%s7071_s21 + $0x51] sm:$0xff] }
 0x319   : >> { %2768 = vrot.lane.b32.xlu1 %v7112_v60, %s6107_s13  ;;  %2752 = vrot.lane.b32.xlu0 %v7115_v63, %s6107_s13 }
 0x31d   : >> { %2863 = vrot.lane.b32.xlu1 %v5538_v32, %s6108_s18  ;;  %2847 = vrot.lane.b32.xlu0 %v5530_v33, %s6108_s18 }
 0x321   : >> { %2478 = vrot.lane.b32.xlu1 %v7112_v60, %s6104_s0  ;;  %2462 = vrot.lane.b32.xlu0 %v7115_v63, %s6104_s0 }
 0x325   : >> { %2573 = vrot.lane.b32.xlu1 %v5538_v32, %s6105_s11  ;;  %2557 = vrot.lane.b32.xlu0 %v5530_v33, %s6105_s11 }
 0x329   : >> { %2865 = vrot.lane.b32.xlu1 %v5539_v34, %s6108_s18  ;;  %2849 = vrot.lane.b32.xlu0 %v5531_v35, %s6108_s18 }
 0x32d   : >> { %2960 = vrot.lane.b32.xlu1 %v5554_v36, %s6109_s19  ;;  %2944 = vrot.lane.b32.xlu0 %v5546_v30, %s6109_s19 }
 0x331   : >> { %2283 = vrot.lane.b32.xlu1 %v5538_v32, %s6102_s30  ;;  %2267 = vrot.lane.b32.xlu0 %v5530_v33, %s6102_s30  ;;  %v5549_v32 = vld [vmem:[%s7071_s21 + $0x52] sm:$0xff] }
 0x335   : >> { %2575 = vrot.lane.b32.xlu1 %v5539_v34, %s6105_s11  ;;  %2559 = vrot.lane.b32.xlu0 %v5531_v35, %s6105_s11 }
 0x339   : >> { %2670 = vrot.lane.b32.xlu1 %v5554_v36, %s6106_s12  ;;  %2654 = vrot.lane.b32.xlu0 %v5546_v30, %s6106_s12 }
 0x33d   : >> { %2962 = vrot.lane.b32.xlu1 %v5555_v46, %s6109_s19  ;;  %2946 = vrot.lane.b32.xlu0 %v5547_v23, %s6109_s19 }
 0x341   : >> { %2285 = vrot.lane.b32.xlu1 %v5539_v34, %s6102_s30  ;;  %2269 = vrot.lane.b32.xlu0 %v5531_v35, %s6102_s30 }
 0x345   : >> { %2380 = vrot.lane.b32.xlu1 %v5554_v36, %s6103_s10  ;;  %2364 = vrot.lane.b32.xlu0 %v5546_v30, %s6103_s10 }
 0x349   : >> { %2672 = vrot.lane.b32.xlu1 %v5555_v46, %s6106_s12  ;;  %2656 = vrot.lane.b32.xlu0 %v5547_v23, %s6106_s12 }
 0x34b   : >> { %v2262_v24 = vpop.permute.xlu1 %2261  ;;  %v2260_v0 = vpop.permute.xlu0 %2259 }
 0x34c   : >> { %2309 = vst.msk [vmem:[#allocation5 + $0x8] sm:$0xff] %vm922_vm5, %v2262_v24  ;;  %2308 = vst.msk [vmem:[#allocation5] sm:$0xff] %vm922_vm5, %v2260_v0 }
 0x34d   : >> { %2770 = vrot.lane.b32.xlu1 %v7136_v10, %s6107_s13  ;;  %2754 = vrot.lane.b32.xlu0 %v7139_v11, %s6107_s13 }
 0x34f   : >> { %v2278_v25 = vpop.permute.xlu1 %2277  ;;  %v2276_v26 = vpop.permute.xlu0 %2275 }
 0x350   : >> { %2317 = vst.msk [vmem:[#allocation5 + $0x48] sm:$0xff] %vm922_vm5, %v2278_v25  ;;  %2316 = vst.msk [vmem:[#allocation5 + $0x40] sm:$0xff] %vm922_vm5, %v2276_v26 }
 0x351   : >> { %2382 = vrot.lane.b32.xlu1 %v5555_v46, %s6103_s10  ;;  %2366 = vrot.lane.b32.xlu0 %v5547_v23, %s6103_s10  ;;  %v5526_v23 = vld [vmem:[%s7071_s21 + $0xc0] sm:$0xff] }
 0x353   : >> { %v2373_v2 = vpop.permute.xlu1 %2372  ;;  %v2357_v27 = vpop.permute.xlu0 %2356 }
 0x354   : >> { %2413 = vst.msk [vmem:[#allocation5 + $0x40] sm:$0xff] %vm1019_vm6, %v2373_v2  ;;  %2405 = vst.msk [vmem:[#allocation5] sm:$0xff] %vm1019_vm6, %v2357_v27 }
 0x355   : >> { %2480 = vrot.lane.b32.xlu1 %v7136_v10, %s6104_s0  ;;  %2464 = vrot.lane.b32.xlu0 %v7139_v11, %s6104_s0 }
 0x357   : >> { %v2375_v31 = vpop.permute.xlu1 %2374  ;;  %v2359_v4 = vpop.permute.xlu0 %2358 }
 0x358   : >> { %2414 = vst.msk [vmem:[#allocation5 + $0x48] sm:$0xff] %vm1019_vm6, %v2375_v31  ;;  %2406 = vst.msk [vmem:[#allocation5 + $0x8] sm:$0xff] %vm1019_vm6, %v2359_v4  ;;  %v5527_v31 = vld [vmem:[%s7071_s21 + $0xc8] sm:$0xff] }
 0x359   : >> { %2772 = vrot.lane.b32.xlu1 %v7160_v48, %s6107_s13  ;;  %2756 = vrot.lane.b32.xlu0 %v7163_v13, %s6107_s13 }
 0x35b   : >> { %v2473_v50 = vpop.permute.xlu1 %2472  ;;  %v2457_v6 = vpop.permute.xlu0 %2456 }
 0x35c   : >> { %2513 = vst.msk [vmem:[#allocation5 + $0x40] sm:$0xff] %vm1119_vm7, %v2473_v50  ;;  %2505 = vst.msk [vmem:[#allocation5] sm:$0xff] %vm1119_vm7, %v2457_v6 }
 0x35d   : >> { %2867 = vrot.lane.b32.xlu1 %v5540_v47, %s6108_s18  ;;  %2851 = vrot.lane.b32.xlu0 %v5532_v49, %s6108_s18 }
 0x35f   : >> { %v2475_v51 = vpop.permute.xlu1 %2474  ;;  %v2459_v55 = vpop.permute.xlu0 %2458 }
 0x360   : >> { %2514 = vst.msk [vmem:[#allocation5 + $0x48] sm:$0xff] %vm1119_vm7, %v2475_v51  ;;  %2506 = vst.msk [vmem:[#allocation5 + $0x8] sm:$0xff] %vm1119_vm7, %v2459_v55 }
 0x361   : >> { %2482 = vrot.lane.b32.xlu1 %v7160_v48, %s6104_s0  ;;  %2466 = vrot.lane.b32.xlu0 %v7163_v13, %s6104_s0 }
 0x363   : >> { %v2570_v57 = vpop.permute.xlu1 %2569  ;;  %v2554_v59 = vpop.permute.xlu0 %2553 }
 0x364   : >> { %2610 = vst.msk [vmem:[#allocation5 + $0x40] sm:$0xff] %vm1216_vm8, %v2570_v57  ;;  %2602 = vst.msk [vmem:[#allocation5] sm:$0xff] %vm1216_vm8, %v2554_v59  ;;  %v5543_v59 = vld [vmem:[%s7071_s21 + $0xc9] sm:$0xff] }
 0x365   : >> { %2577 = vrot.lane.b32.xlu1 %v5540_v47, %s6105_s11  ;;  %2561 = vrot.lane.b32.xlu0 %v5532_v49, %s6105_s11 }
 0x367   : >> { %v2280_v60 = vpop.permute.xlu1 %2279  ;;  %v2264_v63 = vpop.permute.xlu0 %2263 }
 0x368   : >> { %2318 = vst.msk [vmem:[#allocation5 + $0x50] sm:$0xff] %vm922_vm5, %v2280_v60  ;;  %2310 = vst.msk [vmem:[#allocation5 + $0x10] sm:$0xff] %vm922_vm5, %v2264_v63 }
 0x369   : >> { %2869 = vrot.lane.b32.xlu1 %v5541_v62, %s6108_s18  ;;  %2853 = vrot.lane.b32.xlu0 %v5533_v29, %s6108_s18 }
 0x36b   : >> { %v2572_v9 = vpop.permute.xlu1 %2571  ;;  %v2556_v10 = vpop.permute.xlu0 %2555 }
 0x36c   : >> { %2611 = vst.msk [vmem:[#allocation5 + $0x48] sm:$0xff] %vm1216_vm8, %v2572_v9  ;;  %2603 = vst.msk [vmem:[#allocation5 + $0x8] sm:$0xff] %vm1216_vm8, %v2556_v10 }
 0x36d   : >> { %2964 = vrot.lane.b32.xlu1 %v5556_v8, %s6109_s19  ;;  %2948 = vrot.lane.b32.xlu0 %v5548_v5, %s6109_s19 }
 0x36f   : >> { %v2667_v11 = vpop.permute.xlu1 %2666  ;;  %v2651_v48 = vpop.permute.xlu0 %2650 }
 0x370   : >> { %2707 = vst.msk [vmem:[#allocation5 + $0x40] sm:$0xff] %vm1313_vm9, %v2667_v11  ;;  %2699 = vst.msk [vmem:[#allocation5] sm:$0xff] %vm1313_vm9, %v2651_v48  ;;  %v5559_v48 = vld [vmem:[%s7071_s21 + $0xca] sm:$0xff] }
 0x371   : >> { %2287 = vrot.lane.b32.xlu1 %v5540_v47, %s6102_s30  ;;  %2271 = vrot.lane.b32.xlu0 %v5532_v49, %s6102_s30  ;;  %v5542_v49 = vld [vmem:[%s7071_s21 + $0xc1] sm:$0xff] }
 0x373   : >> { %v2282_v13 = vpop.permute.xlu1 %2281  ;;  %v2266_v15 = vpop.permute.xlu0 %2265 }
 0x374   : >> { %2319 = vst.msk [vmem:[#allocation5 + $0x58] sm:$0xff] %vm922_vm5, %v2282_v13  ;;  %2311 = vst.msk [vmem:[#allocation5 + $0x18] sm:$0xff] %vm922_vm5, %v2266_v15 }
 0x375   : >> { %2579 = vrot.lane.b32.xlu1 %v5541_v62, %s6105_s11  ;;  %2563 = vrot.lane.b32.xlu0 %v5533_v29, %s6105_s11 }
 0x377   : >> { %v2377_v17 = vpop.permute.xlu1 %2376  ;;  %v2361_v54 = vpop.permute.xlu0 %2360 }
 0x378   : >> { %2415 = vst.msk [vmem:[#allocation5 + $0x50] sm:$0xff] %vm1019_vm6, %v2377_v17  ;;  %2407 = vst.msk [vmem:[#allocation5 + $0x10] sm:$0xff] %vm1019_vm6, %v2361_v54 }
 0x379   : >> { %2674 = vrot.lane.b32.xlu1 %v5556_v8, %s6106_s12  ;;  %2658 = vrot.lane.b32.xlu0 %v5548_v5, %s6106_s12 }
 0x37b   : >> { %v2669_v33 = vpop.permute.xlu1 %2668  ;;  %v2653_v34 = vpop.permute.xlu0 %2652 }
 0x37c   : >> { %2708 = vst.msk [vmem:[#allocation5 + $0x48] sm:$0xff] %vm1313_vm9, %v2669_v33  ;;  %2700 = vst.msk [vmem:[#allocation5 + $0x8] sm:$0xff] %vm1313_vm9, %v2653_v34  ;;  %v5529_v34 = vld [vmem:[%s7071_s21 + $0xe0] sm:$0xff] }
 0x37d   : >> { %2966 = vrot.lane.b32.xlu1 %v5557_v20, %s6109_s19  ;;  %2950 = vrot.lane.b32.xlu0 %v5549_v32, %s6109_s19 }
 0x37f   : >> { %v2767_v35 = vpop.permute.xlu1 %2766  ;;  %v2751_v36 = vpop.permute.xlu0 %2750 }
 0x380   : >> { %2807 = vst.msk [vmem:[#allocation5 + $0x40] sm:$0xff] %vm1413_vm10, %v2767_v35  ;;  %2799 = vst.msk [vmem:[#allocation5] sm:$0xff] %vm1413_vm10, %v2751_v36 }
 0x381   : >> { %2289 = vrot.lane.b32.xlu1 %v5541_v62, %s6102_s30  ;;  %2273 = vrot.lane.b32.xlu0 %v5533_v29, %s6102_s30 }
 0x383   : >> { %v2379_v30 = vpop.permute.xlu1 %2378  ;;  %v2363_v21 = vpop.permute.xlu0 %2362 }
 0x384   : >> { %2416 = vst.msk [vmem:[#allocation5 + $0x58] sm:$0xff] %vm1019_vm6, %v2379_v30  ;;  %2408 = vst.msk [vmem:[#allocation5 + $0x18] sm:$0xff] %vm1019_vm6, %v2363_v21 }
 0x385   : >> { %2384 = vrot.lane.b32.xlu1 %v5556_v8, %s6103_s10  ;;  %2368 = vrot.lane.b32.xlu0 %v5548_v5, %s6103_s10 }
 0x387   : >> { %v2477_v22 = vpop.permute.xlu1 %2476  ;;  %v2461_v46 = vpop.permute.xlu0 %2460 }
 0x388   : >> { %2515 = vst.msk [vmem:[#allocation5 + $0x50] sm:$0xff] %vm1119_vm7, %v2477_v22  ;;  %2507 = vst.msk [vmem:[#allocation5 + $0x10] sm:$0xff] %vm1119_vm7, %v2461_v46 }
 0x389   : >> { %2676 = vrot.lane.b32.xlu1 %v5557_v20, %s6106_s12  ;;  %2660 = vrot.lane.b32.xlu0 %v5549_v32, %s6106_s12 }
 0x38b   : >> { %v2769_v24 = vpop.permute.xlu1 %2768  ;;  %v2753_v0 = vpop.permute.xlu0 %2752 }
 0x38c   : >> { %2808 = vst.msk [vmem:[#allocation5 + $0x48] sm:$0xff] %vm1413_vm10, %v2769_v24  ;;  %2800 = vst.msk [vmem:[#allocation5 + $0x8] sm:$0xff] %vm1413_vm10, %v2753_v0 }
 0x38d   : >> { %2774 = vrot.lane.b32.xlu1 %v5526_v23, %s6107_s13  ;;  %2758 = vrot.lane.b32.xlu0 %v7149_v28, %s6107_s13 }
 0x38f   : >> { %v2864_v25 = vpop.permute.xlu1 %2863  ;;  %v2848_v26 = vpop.permute.xlu0 %2847 }
 0x390   : >> { %2904 = vst.msk [vmem:[#allocation5 + $0x40] sm:$0xff] %vm1510_vm11, %v2864_v25  ;;  %2896 = vst.msk [vmem:[#allocation5] sm:$0xff] %vm1510_vm11, %v2848_v26 }
 0x391   : >> { %2386 = vrot.lane.b32.xlu1 %v5557_v20, %s6103_s10  ;;  %2370 = vrot.lane.b32.xlu0 %v5549_v32, %s6103_s10  ;;  %v5528_v20 = vld [vmem:[%s7071_s21 + $0xd8] sm:$0xff] }
 0x393   : >> { %v2479_v2 = vpop.permute.xlu1 %2478  ;;  %v2463_v27 = vpop.permute.xlu0 %2462 }
 0x394   : >> { %2516 = vst.msk [vmem:[#allocation5 + $0x58] sm:$0xff] %vm1119_vm7, %v2479_v2  ;;  %2508 = vst.msk [vmem:[#allocation5 + $0x18] sm:$0xff] %vm1119_vm7, %v2463_v27 }
 0x395   : >> { %2484 = vrot.lane.b32.xlu1 %v5526_v23, %s6104_s0  ;;  %2468 = vrot.lane.b32.xlu0 %v7149_v28, %s6104_s0 }
 0x397   : >> { %v2574_v4 = vpop.permute.xlu1 %2573  ;;  %v2558_v47 = vpop.permute.xlu0 %2557 }
 0x398   : >> { %2612 = vst.msk [vmem:[#allocation5 + $0x50] sm:$0xff] %vm1216_vm8, %v2574_v4  ;;  %2604 = vst.msk [vmem:[#allocation5 + $0x10] sm:$0xff] %vm1216_vm8, %v2558_v47 }
 0x399   : >> { %2776 = vrot.lane.b32.xlu1 %v5527_v31, %s6107_s13  ;;  %2760 = vrot.lane.b32.xlu0 %v7146_v12, %s6107_s13 }
 0x39b   : >> { %v2866_v50 = vpop.permute.xlu1 %2865  ;;  %v2850_v6 = vpop.permute.xlu0 %2849 }
 0x39c   : >> { %2905 = vst.msk [vmem:[#allocation5 + $0x48] sm:$0xff] %vm1510_vm11, %v2866_v50  ;;  %2897 = vst.msk [vmem:[#allocation5 + $0x8] sm:$0xff] %vm1510_vm11, %v2850_v6 }
 0x39d   : >> { %2871 = vrot.lane.b32.xlu1 %v5542_v49, %s6108_s18  ;;  %2855 = vrot.lane.b32.xlu0 %v7081_v52, %s6108_s18 }
 0x39f   : >> { %v2961_v28 = vpop.permute.xlu1 %2960  ;;  %v2945_v51 = vpop.permute.xlu0 %2944 }
 0x3a0   : >> { %3001 = vst.msk [vmem:[#allocation5 + $0x40] sm:$0xff] %vm1607_vm12, %v2961_v28  ;;  %2993 = vst.msk [vmem:[#allocation5] sm:$0xff] %vm1607_vm12, %v2945_v51 }
 0x3a1   : >> { %2486 = vrot.lane.b32.xlu1 %v5527_v31, %s6104_s0  ;;  %2470 = vrot.lane.b32.xlu0 %v7146_v12, %s6104_s0  ;;  %v5558_v12 = vld [vmem:[%s7071_s21 + $0xc2] sm:$0xff] }
 0x3a3   : >> { %v2284_v55 = vpop.permute.xlu1 %2283  ;;  %v2268_v57 = vpop.permute.xlu0 %2267 }
 0x3a4   : >> { %2320 = vst.msk [vmem:[#allocation5 + $0x60] sm:$0xff] %vm922_vm5, %v2284_v55  ;;  %2312 = vst.msk [vmem:[#allocation5 + $0x20] sm:$0xff] %vm922_vm5, %v2268_v57 }
 0x3a5   : >> { %2581 = vrot.lane.b32.xlu1 %v5542_v49, %s6105_s11  ;;  %2565 = vrot.lane.b32.xlu0 %v7081_v52, %s6105_s11 }
 0x3a7   : >> { %v2576_v62 = vpop.permute.xlu1 %2575  ;;  %v2560_v29 = vpop.permute.xlu0 %2559  ;;  %v3009_v60 = vld [vmem:[#allocation5] sm:$0xff] }
 0x3a8   : >> { %v3017_v63 = vld [vmem:[#allocation5 + $0x40] sm:$0xff]  ;;  %2613 = vst.msk [vmem:[#allocation5 + $0x58] sm:$0xff] %vm1216_vm8, %v2576_v62  ;;  %2605 = vst.msk [vmem:[#allocation5 + $0x18] sm:$0xff] %vm1216_vm8, %v2560_v29  ;;  %5825 = vmatprep.mubr.msk.f32.mxu0 %vm1644_vm13, %v3009_v60 }
 0x3a9   : >> { %5837 = vmatprep.mubr.msk.f32.mxu1 %vm1644_vm13, %v3017_v63  ;;  %2873 = vrot.lane.b32.xlu1 %v5543_v59, %s6108_s18 }
 0x3aa   : >> { %2857 = vrot.lane.b32.xlu0 %v7078_v61, %s6108_s18 }
 0x3ab   : >> { %v2671_v52 = vpop.permute.xlu1 %2670  ;;  %v2655_v8 = vpop.permute.xlu0 %2654 }
 0x3ac   : >> { %2709 = vst.msk [vmem:[#allocation5 + $0x50] sm:$0xff] %vm1313_vm9, %v2671_v52  ;;  %2701 = vst.msk [vmem:[#allocation5 + $0x10] sm:$0xff] %vm1313_vm9, %v2655_v8 }
 0x3ad   : >> { %2968 = vrot.lane.b32.xlu1 %v5558_v12, %s6109_s19 }
 0x3ae   : >> { %2952 = vrot.lane.b32.xlu0 %v7102_v58, %s6109_s19 }
 0x3af   : >> { %v2963_v5 = vpop.permute.xlu1 %2962  ;;  %v2947_v9 = vpop.permute.xlu0 %2946 }
 0x3b0   : >> { %3002 = vst.msk [vmem:[#allocation5 + $0x48] sm:$0xff] %vm1607_vm12, %v2963_v5  ;;  %2994 = vst.msk [vmem:[#allocation5 + $0x8] sm:$0xff] %vm1607_vm12, %v2947_v9 }
 0x3b1   : >> { %2583 = vrot.lane.b32.xlu1 %v5543_v59, %s6105_s11 }
 0x3b2   : >> { %2567 = vrot.lane.b32.xlu0 %v7078_v61, %s6105_s11 }
 0x3b3   : >> { %v2286_v10 = vpop.permute.xlu1 %2285  ;;  %v2270_v11 = vpop.permute.xlu0 %2269 }
 0x3b4   : >> { %2321 = vst.msk [vmem:[#allocation5 + $0x68] sm:$0xff] %vm922_vm5, %v2286_v10  ;;  %2313 = vst.msk [vmem:[#allocation5 + $0x28] sm:$0xff] %vm922_vm5, %v2270_v11 }
 0x3b5   : >> { %2678 = vrot.lane.b32.xlu1 %v5558_v12, %s6106_s12 }
 0x3b6   : >> { %2662 = vrot.lane.b32.xlu0 %v7102_v58, %s6106_s12 }
 0x3b7   : >> { %v2381_v13 = vpop.permute.xlu1 %2380  ;;  %v2365_v15 = vpop.permute.xlu0 %2364  ;;  %v3010_v17 = vld [vmem:[#allocation5 + $0x8] sm:$0xff] }
 0x3b8   : >> { %v3018_v54 = vld [vmem:[#allocation5 + $0x48] sm:$0xff]  ;;  %2417 = vst.msk [vmem:[#allocation5 + $0x60] sm:$0xff] %vm1019_vm6, %v2381_v13  ;;  %2409 = vst.msk [vmem:[#allocation5 + $0x20] sm:$0xff] %vm1019_vm6, %v2365_v15  ;;  %5826 = vmatmul.mubr.msk.f32.vlgmr.msra.gmra.mrb[0].mxu0 %vm1644_vm13, %v3010_v17 }
 0x3b9   : >> { %5838 = vmatmul.mubr.msk.f32.vlgmr.msra.gmra.mrb[0].mxu1 %vm1644_vm13, %v3018_v54  ;;  %2970 = vrot.lane.b32.xlu1 %v5559_v48, %s6109_s19 }
 0x3ba   : >> { %2954 = vrot.lane.b32.xlu0 %v7129_v7, %s6109_s19 }
 0x3bb   : >> { %v2673_v61 = vpop.permute.xlu1 %2672  ;;  %v2657_v58 = vpop.permute.xlu0 %2656 }
 0x3bc   : >> { %2710 = vst.msk [vmem:[#allocation5 + $0x58] sm:$0xff] %vm1313_vm9, %v2673_v61  ;;  %2702 = vst.msk [vmem:[#allocation5 + $0x18] sm:$0xff] %vm1313_vm9, %v2657_v58 }
 0x3bd   : >> { %2680 = vrot.lane.b32.xlu1 %v5559_v48, %s6106_s12 }
 0x3be   : >> { %2664 = vrot.lane.b32.xlu0 %v7129_v7, %s6106_s12  ;;  %v5544_v7 = vld [vmem:[%s7071_s21 + $0xd9] sm:$0xff] }
 0x3bf   : >> { %v2771_v32 = vpop.permute.xlu1 %2770  ;;  %v2755_v33 = vpop.permute.xlu0 %2754 }
 0x3c0   : >> { %2809 = vst.msk [vmem:[#allocation5 + $0x50] sm:$0xff] %vm1413_vm10, %v2771_v32  ;;  %2801 = vst.msk [vmem:[#allocation5 + $0x10] sm:$0xff] %vm1413_vm10, %v2755_v33 }
 0x3c1   : >> { %2778 = vrot.lane.b32.xlu1 %v5528_v20, %s6107_s13 }
 0x3c2   : >> { %2762 = vrot.lane.b32.xlu0 %v7084_v53, %s6107_s13  ;;  %v5545_v53 = vld [vmem:[%s7071_s21 + $0xe1] sm:$0xff] }
 0x3c3   : >> { %v2383_v35 = vpop.permute.xlu1 %2382  ;;  %v2367_v36 = vpop.permute.xlu0 %2366 }
 0x3c4   : >> { %2418 = vst.msk [vmem:[#allocation5 + $0x68] sm:$0xff] %vm1019_vm6, %v2383_v35  ;;  %2410 = vst.msk [vmem:[#allocation5 + $0x28] sm:$0xff] %vm1019_vm6, %v2367_v36 }
 0x3c5   : >> { %2780 = vrot.lane.b32.xlu1 %v5529_v34, %s6107_s13 }
 0x3c6   : >> { %2764 = vrot.lane.b32.xlu0 %v7088_v56, %s6107_s13  ;;  %v5560_v56 = vld [vmem:[%s7071_s21 + $0xda] sm:$0xff] }
 0x3c7   : >> { %v2481_v30 = vpop.permute.xlu1 %2480  ;;  %v2465_v21 = vpop.permute.xlu0 %2464 }
 0x3c8   : >> { %2517 = vst.msk [vmem:[#allocation5 + $0x60] sm:$0xff] %vm1119_vm7, %v2481_v30  ;;  %2509 = vst.msk [vmem:[#allocation5 + $0x20] sm:$0xff] %vm1119_vm7, %v2465_v21 }
 0x3c9   : >> { %2875 = vrot.lane.b32.xlu1 %v5544_v7, %s6108_s18 }
 0x3ca   : >> { %2859 = vrot.lane.b32.xlu0 %v7176_v14, %s6108_s18  ;;  %v5561_v14 = vld [vmem:[%s7071_s21 + $0xe2] sm:$0xff] }
 0x3cb   : >> { %v2773_v22 = vpop.permute.xlu1 %2772  ;;  %v2757_v46 = vpop.permute.xlu0 %2756 }
 0x3cc   : >> { %2810 = vst.msk [vmem:[#allocation5 + $0x58] sm:$0xff] %vm1413_vm10, %v2773_v22  ;;  %2802 = vst.msk [vmem:[#allocation5 + $0x18] sm:$0xff] %vm1413_vm10, %v2757_v46 }
 0x3cd   : >> { %2877 = vrot.lane.b32.xlu1 %v5545_v53, %s6108_s18 }
 0x3ce   : >> { %2861 = vrot.lane.b32.xlu0 %v7186_v16, %s6108_s18 }
 0x3cf   : >> { %v2868_v23 = vpop.permute.xlu1 %2867  ;;  %v2852_v24 = vpop.permute.xlu0 %2851 }
 0x3d0   : >> { %2906 = vst.msk [vmem:[#allocation5 + $0x50] sm:$0xff] %vm1510_vm11, %v2868_v23  ;;  %2898 = vst.msk [vmem:[#allocation5 + $0x10] sm:$0xff] %vm1510_vm11, %v2852_v24 }
 0x3d1   : >> { %2972 = vrot.lane.b32.xlu1 %v5560_v56, %s6109_s19 }
 0x3d2   : >> { %2956 = vrot.lane.b32.xlu0 %v7193_v18, %s6109_s19 }
 0x3d3   : >> { %v2483_v0 = vpop.permute.xlu1 %2482  ;;  %v2467_v25 = vpop.permute.xlu0 %2466 }
 0x3d4   : >> { %2518 = vst.msk [vmem:[#allocation5 + $0x68] sm:$0xff] %vm1119_vm7, %v2483_v0  ;;  %2510 = vst.msk [vmem:[#allocation5 + $0x28] sm:$0xff] %vm1119_vm7, %v2467_v25 }
 0x3d5   : >> { %2974 = vrot.lane.b32.xlu1 %v5561_v14, %s6109_s19 }
 0x3d6   : >> { %2958 = vrot.lane.b32.xlu0 %v7206_v19, %s6109_s19 }
 0x3d7   : >> { %v2578_v16 = vpop.permute.xlu1 %2577  ;;  %v2562_v26 = vpop.permute.xlu0 %2561 }
 0x3d8   : >> { %2614 = vst.msk [vmem:[#allocation5 + $0x60] sm:$0xff] %vm1216_vm8, %v2578_v16  ;;  %2606 = vst.msk [vmem:[#allocation5 + $0x20] sm:$0xff] %vm1216_vm8, %v2562_v26 }
 0x3db   : >> { %v2870_v2 = vpop.permute.xlu1 %2869  ;;  %v2854_v18 = vpop.permute.xlu0 %2853 }
 0x3dc   : >> { %2907 = vst.msk [vmem:[#allocation5 + $0x58] sm:$0xff] %vm1510_vm11, %v2870_v2  ;;  %2899 = vst.msk [vmem:[#allocation5 + $0x18] sm:$0xff] %vm1510_vm11, %v2854_v18 }
 0x3df   : >> { %v2965_v27 = vpop.permute.xlu1 %2964  ;;  %v2949_v31 = vpop.permute.xlu0 %2948 }
 0x3e0   : >> { %3003 = vst.msk [vmem:[#allocation5 + $0x50] sm:$0xff] %vm1607_vm12, %v2965_v27  ;;  %2995 = vst.msk [vmem:[#allocation5 + $0x10] sm:$0xff] %vm1607_vm12, %v2949_v31 }
 0x3e3   : >> { %v2288_v4 = vpop.permute.xlu1 %2287  ;;  %v2272_v19 = vpop.permute.xlu0 %2271 }
 0x3e4   : >> { %2322 = vst.msk [vmem:[#allocation5 + $0x70] sm:$0xff] %vm922_vm5, %v2288_v4  ;;  %2314 = vst.msk [vmem:[#allocation5 + $0x30] sm:$0xff] %vm922_vm5, %v2272_v19 }
 0x3e7   : >> { %v2580_v47 = vpop.permute.xlu1 %2579  ;;  %v2564_v49 = vpop.permute.xlu0 %2563  ;;  %v3011_v50 = vld [vmem:[#allocation5 + $0x10] sm:$0xff] }
 0x3e8   : >> { %v3019_v6 = vld [vmem:[#allocation5 + $0x50] sm:$0xff]  ;;  %2615 = vst.msk [vmem:[#allocation5 + $0x68] sm:$0xff] %vm1216_vm8, %v2580_v47  ;;  %2607 = vst.msk [vmem:[#allocation5 + $0x28] sm:$0xff] %vm1216_vm8, %v2564_v49  ;;  %5828 = vmatprep.mubr.msk.f32.mxu0 %vm1644_vm13, %v3011_v50 }
 0x3e9   : >> { %5840 = vmatprep.mubr.msk.f32.mxu1 %vm1644_vm13, %v3019_v6 }
 0x3eb   : >> { %v2675_v28 = vpop.permute.xlu1 %2674  ;;  %v2659_v51 = vpop.permute.xlu0 %2658 }
 0x3ec   : >> { %2711 = vst.msk [vmem:[#allocation5 + $0x60] sm:$0xff] %vm1313_vm9, %v2675_v28  ;;  %2703 = vst.msk [vmem:[#allocation5 + $0x20] sm:$0xff] %vm1313_vm9, %v2659_v51 }
 0x3ef   : >> { %v2967_v55 = vpop.permute.xlu1 %2966  ;;  %v2951_v57 = vpop.permute.xlu0 %2950 }
 0x3f0   : >> { %3004 = vst.msk [vmem:[#allocation5 + $0x58] sm:$0xff] %vm1607_vm12, %v2967_v55  ;;  %2996 = vst.msk [vmem:[#allocation5 + $0x18] sm:$0xff] %vm1607_vm12, %v2951_v57 }
 0x3f3   : >> { %v2290_v59 = vpop.permute.xlu1 %2289  ;;  %v2274_v62 = vpop.permute.xlu0 %2273 }
 0x3f4   : >> { %2323 = vst.msk [vmem:[#allocation5 + $0x78] sm:$0xff] %vm922_vm5, %v2290_v59  ;;  %2315 = vst.msk [vmem:[#allocation5 + $0x38] sm:$0xff] %vm922_vm5, %v2274_v62  ;;  %v3027_v62 = vsub.s32 1, %v6919_v1 }
 0x3f7   : >> { %v2385_v29 = vpop.permute.xlu1 %2384  ;;  %v2369_v60 = vpop.permute.xlu0 %2368  ;;  %v3012_v63 = vld [vmem:[#allocation5 + $0x18] sm:$0xff] }
 0x3f8   : >> { %v3020_v12 = vld [vmem:[#allocation5 + $0x58] sm:$0xff]  ;;  %2419 = vst.msk [vmem:[#allocation5 + $0x70] sm:$0xff] %vm1019_vm6, %v2385_v29  ;;  %2411 = vst.msk [vmem:[#allocation5 + $0x30] sm:$0xff] %vm1019_vm6, %v2369_v60  ;;  %5829 = vmatmul.mubr.msk.f32.gmra.mrb[2].mxu0 %vm1644_vm13, %v3012_v63  ;;  %v3028_v29 = vrot.slane %v6334_v42, %v3027_v62 }
 0x3f9   : >> { %5841 = vmatmul.mubr.msk.f32.gmra.mrb[2].mxu1 %vm1644_vm13, %v3020_v12 }
 0x3fb   : >> { %v2677_v52 = vpop.permute.xlu1 %2676  ;;  %v2661_v8 = vpop.permute.xlu0 %2660 }
 0x3fc   : >> { %2712 = vst.msk [vmem:[#allocation5 + $0x68] sm:$0xff] %vm1313_vm9, %v2677_v52  ;;  %2704 = vst.msk [vmem:[#allocation5 + $0x28] sm:$0xff] %vm1313_vm9, %v2661_v8 }
 0x3ff   : >> { %v2775_v5 = vpop.permute.xlu1 %2774  ;;  %v2759_v9 = vpop.permute.xlu0 %2758 }
 0x400   : >> { %2811 = vst.msk [vmem:[#allocation5 + $0x60] sm:$0xff] %vm1413_vm10, %v2775_v5  ;;  %2803 = vst.msk [vmem:[#allocation5 + $0x20] sm:$0xff] %vm1413_vm10, %v2759_v9 }
 0x403   : >> { %v2387_v10 = vpop.permute.xlu1 %2386  ;;  %v2371_v11 = vpop.permute.xlu0 %2370 }
 0x404   : >> { %2420 = vst.msk [vmem:[#allocation5 + $0x78] sm:$0xff] %vm1019_vm6, %v2387_v10  ;;  %2412 = vst.msk [vmem:[#allocation5 + $0x38] sm:$0xff] %vm1019_vm6, %v2371_v11 }
 0x407   : >> { %v2485_v48 = vpop.permute.xlu1 %2484  ;;  %v2469_v13 = vpop.permute.xlu0 %2468 }
 0x408   : >> { %2519 = vst.msk [vmem:[#allocation5 + $0x70] sm:$0xff] %vm1119_vm7, %v2485_v48  ;;  %2511 = vst.msk [vmem:[#allocation5 + $0x30] sm:$0xff] %vm1119_vm7, %v2469_v13 }
 0x40b   : >> { %v2777_v15 = vpop.permute.xlu1 %2776  ;;  %v2761_v17 = vpop.permute.xlu0 %2760 }
 0x40c   : >> { %2812 = vst.msk [vmem:[#allocation5 + $0x68] sm:$0xff] %vm1413_vm10, %v2777_v15  ;;  %2804 = vst.msk [vmem:[#allocation5 + $0x28] sm:$0xff] %vm1413_vm10, %v2761_v17 }
 0x40f   : >> { %v2872_v54 = vpop.permute.xlu1 %2871  ;;  %v2856_v61 = vpop.permute.xlu0 %2855 }
 0x410   : >> { %2908 = vst.msk [vmem:[#allocation5 + $0x60] sm:$0xff] %vm1510_vm11, %v2872_v54  ;;  %2900 = vst.msk [vmem:[#allocation5 + $0x20] sm:$0xff] %vm1510_vm11, %v2856_v61 }
 0x413   : >> { %v2487_v58 = vpop.permute.xlu1 %2486  ;;  %v2471_v20 = vpop.permute.xlu0 %2470 }
 0x414   : >> { %2520 = vst.msk [vmem:[#allocation5 + $0x78] sm:$0xff] %vm1119_vm7, %v2487_v58  ;;  %2512 = vst.msk [vmem:[#allocation5 + $0x38] sm:$0xff] %vm1119_vm7, %v2471_v20 }
 0x417   : >> { %v2582_v32 = vpop.permute.xlu1 %2581  ;;  %v2566_v33 = vpop.permute.xlu0 %2565 }
 0x418   : >> { %2616 = vst.msk [vmem:[#allocation5 + $0x70] sm:$0xff] %vm1216_vm8, %v2582_v32  ;;  %2608 = vst.msk [vmem:[#allocation5 + $0x30] sm:$0xff] %vm1216_vm8, %v2566_v33 }
 0x41b   : >> { %v2874_v34 = vpop.permute.xlu1 %2873 }
 0x41c   : >> { %v2858_v35 = vpop.permute.xlu0 %2857  ;;  %2909 = vst.msk [vmem:[#allocation5 + $0x68] sm:$0xff] %vm1510_vm11, %v2874_v34 }
 0x41d   : >> { %2901 = vst.msk [vmem:[#allocation5 + $0x28] sm:$0xff] %vm1510_vm11, %v2858_v35 }
 0x41f   : >> { %v2969_v36 = vpop.permute.xlu1 %2968 }
 0x420   : >> { %v2953_v7 = vpop.permute.xlu0 %2952  ;;  %3005 = vst.msk [vmem:[#allocation5 + $0x60] sm:$0xff] %vm1607_vm12, %v2969_v36 }
 0x421   : >> { %2997 = vst.msk [vmem:[#allocation5 + $0x20] sm:$0xff] %vm1607_vm12, %v2953_v7 }
 0x423   : >> { %v2584_v30 = vpop.permute.xlu1 %2583 }
 0x424   : >> { %v2568_v21 = vpop.permute.xlu0 %2567  ;;  %2617 = vst.msk [vmem:[#allocation5 + $0x78] sm:$0xff] %vm1216_vm8, %v2584_v30 }
 0x425   : >> { %2609 = vst.msk [vmem:[#allocation5 + $0x38] sm:$0xff] %vm1216_vm8, %v2568_v21 }
 0x427   : >> { %v2679_v53 = vpop.permute.xlu1 %2678  ;;  %v3021_v56 = vld [vmem:[#allocation5 + $0x60] sm:$0xff] }
 0x428   : >> { %v2663_v22 = vpop.permute.xlu0 %2662  ;;  %v3013_v46 = vld [vmem:[#allocation5 + $0x20] sm:$0xff]  ;;  %2713 = vst.msk [vmem:[#allocation5 + $0x70] sm:$0xff] %vm1313_vm9, %v2679_v53  ;;  %5843 = vmatprep.mubr.msk.f32.mxu1 %vm1644_vm13, %v3021_v56 }
 0x429   : >> { %2705 = vst.msk [vmem:[#allocation5 + $0x30] sm:$0xff] %vm1313_vm9, %v2663_v22  ;;  %5831 = vmatprep.mubr.msk.f32.mxu0 %vm1644_vm13, %v3013_v46 }
 0x42b   : >> { %v2971_v23 = vpop.permute.xlu1 %2970 }
 0x42c   : >> { %v2955_v24 = vpop.permute.xlu0 %2954  ;;  %3006 = vst.msk [vmem:[#allocation5 + $0x68] sm:$0xff] %vm1607_vm12, %v2971_v23 }
 0x42d   : >> { %2998 = vst.msk [vmem:[#allocation5 + $0x28] sm:$0xff] %vm1607_vm12, %v2955_v24 }
 0x42f   : >> { %v2681_v14 = vpop.permute.xlu1 %2680 }
 0x430   : >> { %v2665_v0 = vpop.permute.xlu0 %2664  ;;  %2714 = vst.msk [vmem:[#allocation5 + $0x78] sm:$0xff] %vm1313_vm9, %v2681_v14 }
 0x431   : >> { %2706 = vst.msk [vmem:[#allocation5 + $0x38] sm:$0xff] %vm1313_vm9, %v2665_v0 }
 0x433   : >> { %v2779_v25 = vpop.permute.xlu1 %2778  ;;  %v3022_v2 = vld [vmem:[#allocation5 + $0x68] sm:$0xff] }
 0x434   : >> { %v2763_v16 = vpop.permute.xlu0 %2762  ;;  %v3014_v26 = vld [vmem:[#allocation5 + $0x28] sm:$0xff]  ;;  %2813 = vst.msk [vmem:[#allocation5 + $0x70] sm:$0xff] %vm1413_vm10, %v2779_v25  ;;  %5844 = vmatmul.mubr.msk.f32.gmra.mrb[4].mxu1 %vm1644_vm13, %v3022_v2 }
 0x435   : >> { %2805 = vst.msk [vmem:[#allocation5 + $0x30] sm:$0xff] %vm1413_vm10, %v2763_v16  ;;  %5832 = vmatmul.mubr.msk.f32.gmra.mrb[4].mxu0 %vm1644_vm13, %v3014_v26  ;;  %v6110_v26 = vmov (%p2188_p9), 0.0  }
 0x436   : > { %5849 = vmatprep.subr.mxu0 (%p2188_p9), %v6110_v26  ;;  %5854 = vmatprep.subr.mxu1 (%p2188_p9), %v6110_v26 }
 0x437   : >> { %v2781_v18 = vpop.permute.xlu1 %2780  ;;  %5850 = vmatpush3.msk.msra.mxu0 (%p2188_p9), %vm1693_vm4, %v6337_v43  ;;  %5855 = vmatpush3.msk.msra.mxu1 (%p2188_p9), %vm3432_vm15, %v6340_v44 }
 0x438   : >> { %v2765_v27 = vpop.permute.xlu0 %2764  ;;  %2814 = vst.msk [vmem:[#allocation5 + $0x78] sm:$0xff] %vm1413_vm10, %v2781_v18 }
 0x439   : >> { %2806 = vst.msk [vmem:[#allocation5 + $0x38] sm:$0xff] %vm1413_vm10, %v2765_v27 }
 0x43b   : >> { %v2876_v31 = vpop.permute.xlu1 %2875 }
 0x43c   : >> { %v2860_v4 = vpop.permute.xlu0 %2859  ;;  %2910 = vst.msk [vmem:[#allocation5 + $0x70] sm:$0xff] %vm1510_vm11, %v2876_v31 }
 0x43d   : >> { %2902 = vst.msk [vmem:[#allocation5 + $0x30] sm:$0xff] %vm1510_vm11, %v2860_v4 }
 0x43f   : >> { %v2878_v19 = vpop.permute.xlu1 %2877 }
 0x440   : >> { %v2862_v47 = vpop.permute.xlu0 %2861  ;;  %2911 = vst.msk [vmem:[#allocation5 + $0x78] sm:$0xff] %vm1510_vm11, %v2878_v19 }
 0x441   : >> { %2903 = vst.msk [vmem:[#allocation5 + $0x38] sm:$0xff] %vm1510_vm11, %v2862_v47 }
 0x443   : >> { %v2973_v49 = vpop.permute.xlu1 %2972 }
 0x444   : >> { %v2957_v50 = vpop.permute.xlu0 %2956  ;;  %3007 = vst.msk [vmem:[#allocation5 + $0x70] sm:$0xff] %vm1607_vm12, %v2973_v49 }
 0x445   : >> { %2999 = vst.msk [vmem:[#allocation5 + $0x30] sm:$0xff] %vm1607_vm12, %v2957_v50 }
 0x447   : >> { %v2975_v6 = vpop.permute.xlu1 %2974 }
 0x448   : >> { %v2959_v28 = vpop.permute.xlu0 %2958  ;;  %3008 = vst.msk [vmem:[#allocation5 + $0x78] sm:$0xff] %vm1607_vm12, %v2975_v6 }
 0x449   : >> { %3000 = vst.msk [vmem:[#allocation5 + $0x38] sm:$0xff] %vm1607_vm12, %v2959_v28 }
 0x44b   : >> { %v3023_v55 = vld [vmem:[#allocation5 + $0x70] sm:$0xff] }
 0x44c   : >> { %v3015_v51 = vld [vmem:[#allocation5 + $0x30] sm:$0xff]  ;;  %5846 = vmatprep.mubr.msk.f32.mxu1 %vm1644_vm13, %v3023_v55 }
 0x44d   : >> { %5834 = vmatprep.mubr.msk.f32.mxu0 %vm1644_vm13, %v3015_v51 }
 0x44f   : >> { %v3024_v59 = vld [vmem:[#allocation5 + $0x78] sm:$0xff] }
 0x450   : >> { %v3016_v57 = vld [vmem:[#allocation5 + $0x38] sm:$0xff]  ;;  %5847 = vmatmul.mubr.msk.f32.gmra.mrb[6].mxu1 %vm1644_vm13, %v3024_v59 }
 0x451   : >> { %5835 = vmatmul.mubr.msk.f32.gmra.mrb[6].mxu0 %vm1644_vm13, %v3016_v57  ;;  %5856 = vmatprep.mubr.msk.f32.mxu1 (%p2188_p9), %vm6111_vm14, %v6110_v26 }
 0x452   : > { %5851 = vmatprep.mubr.msk.f32.mxu0 (%p2188_p9), %vm6111_vm14, %v6110_v26 }
 0x48b   : >> { %v5827_v60 = vpop.f32.mrb[0].mxu0 }
 0x48c   : >> { %v5839_v63 = vpop.f32.mrb[0].mxu1  ;;  %v3154_v12 = vadd.f32 %v5827_v60, %v3028_v29  ;;  %v3148_v8 = vpop.f32.mrb[1].mxu0 }
 0x48d   : >> { %v3194_v52 = vadd.f32 %v5839_v63, %v3028_v29  ;;  %v3188_v5 = vpop.f32.mrb[1].mxu1  ;;  %v3149_v9 = vadd.f32 %v3148_v8, %v3028_v29 }
 0x48e   : >> { %v3189_v10 = vadd.f32 %v3188_v5, %v3028_v29  ;;  %3230 = vst.msk [vmem:[%s7536_s24 + $0x8] sm:$0xff] %vm744_vm2, %v3154_v12 }
 0x48f   : >> { %3238 = vst.msk [vmem:[%s7536_s24 + $0x48] sm:$0xff] %vm744_vm2, %v3194_v52  ;;  %3229 = vst.msk [vmem:[%s7536_s24] sm:$0xff] %vm744_vm2, %v3149_v9 }
 0x490   : >> { %3237 = vst.msk [vmem:[%s7536_s24 + $0x40] sm:$0xff] %vm744_vm2, %v3189_v10 }
 0x4cb   : >> { %v5830_v11 = vpop.f32.mrb[2].mxu0 }
 0x4cc   : >> { %v5842_v48 = vpop.f32.mrb[2].mxu1  ;;  %v3164_v13 = vadd.f32 %v5830_v11, %v3028_v29  ;;  %v3158_v17 = vpop.f32.mrb[3].mxu0 }
 0x4cd   : >> { %v3204_v15 = vadd.f32 %v5842_v48, %v3028_v29  ;;  %v3198_v54 = vpop.f32.mrb[3].mxu1  ;;  %v3159_v61 = vadd.f32 %v3158_v17, %v3028_v29 }
 0x4ce   : >> { %v3199_v58 = vadd.f32 %v3198_v54, %v3028_v29  ;;  %3232 = vst.msk [vmem:[%s7536_s24 + $0x18] sm:$0xff] %vm744_vm2, %v3164_v13 }
 0x4cf   : >> { %3240 = vst.msk [vmem:[%s7536_s24 + $0x58] sm:$0xff] %vm744_vm2, %v3204_v15  ;;  %3231 = vst.msk [vmem:[%s7536_s24 + $0x10] sm:$0xff] %vm744_vm2, %v3159_v61 }
 0x4d0   : >> { %3239 = vst.msk [vmem:[%s7536_s24 + $0x50] sm:$0xff] %vm744_vm2, %v3199_v58 }
 0x507   : >> { %v5845_v32 = vpop.f32.mrb[4].mxu1 }
 0x508   : >> { %v5833_v20 = vpop.f32.mrb[4].mxu0  ;;  %v3214_v34 = vadd.f32 %v5845_v32, %v3028_v29  ;;  %v3208_v36 = vpop.f32.mrb[5].mxu1 }
 0x509   : >> { %v3174_v33 = vadd.f32 %v5833_v20, %v3028_v29  ;;  %v3168_v35 = vpop.f32.mrb[5].mxu0  ;;  %v3209_v30 = vadd.f32 %v3208_v36, %v3028_v29 }
 0x50a   : >> { %v3169_v7 = vadd.f32 %v3168_v35, %v3028_v29  ;;  %3242 = vst.msk [vmem:[%s7536_s24 + $0x68] sm:$0xff] %vm744_vm2, %v3214_v34 }
 0x50b   : >> { %3234 = vst.msk [vmem:[%s7536_s24 + $0x28] sm:$0xff] %vm744_vm2, %v3174_v33  ;;  %3241 = vst.msk [vmem:[%s7536_s24 + $0x60] sm:$0xff] %vm744_vm2, %v3209_v30 }
 0x50c   : >> { %3233 = vst.msk [vmem:[%s7536_s24 + $0x20] sm:$0xff] %vm744_vm2, %v3169_v7 }
 0x522   : > { %2190 = sbr.rel (!%p2188_p9) target bundleno = 722 (0x2d2), region = 151 }
 0x523   : >> { %v5848_v53 = vpop.f32.mrb[6].mxu1 }
 0x524   : >> { %v5836_v21 = vpop.f32.mrb[6].mxu0  ;;  %v3224_v46 = vadd.f32 %v5848_v53, %v3028_v29  ;;  %v3218_v23 = vpop.f32.mrb[7].mxu1 }
 0x525   : >> { %v3184_v22 = vadd.f32 %v5836_v21, %v3028_v29  ;;  %v3178_v56 = vpop.f32.mrb[7].mxu0  ;;  %v3219_v14 = vadd.f32 %v3218_v23, %v3028_v29 }
 0x526   : >> { %v3179_v24 = vadd.f32 %v3178_v56, %v3028_v29  ;;  %3244 = vst.msk [vmem:[%s7536_s24 + $0x78] sm:$0xff] %vm744_vm2, %v3224_v46 }
 0x527   : >> { %3236 = vst.msk [vmem:[%s7536_s24 + $0x38] sm:$0xff] %vm744_vm2, %v3184_v22  ;;  %3243 = vst.msk [vmem:[%s7536_s24 + $0x70] sm:$0xff] %vm744_vm2, %v3219_v14 }
 0x528   : >> { %3235 = vst.msk [vmem:[%s7536_s24 + $0x30] sm:$0xff] %vm744_vm2, %v3179_v24 }
 0x529   : > { %s7966_s11 = smov (!%p5585_p10), 0  }
 0x52f   : > { %v7573_v0 = vld [vmem:[#allocation3] sm:$0xff]  ;;  %v7575_v25 = vld [vmem:[#allocation3 + $0x8] sm:$0xff]  ;;  %v7577_v16 = vld [vmem:[#allocation3 + $0x10] sm:$0xff] }
 0x530   : > { %v7579_v2 = vld [vmem:[#allocation3 + $0x18] sm:$0xff]  ;;  %v3277_v18 = vsel %vm744_vm2, %v7573_v0, 0.0  ;;  %v3278_v27 = vsel %vm744_vm2, %v7575_v25, 0.0  ;;  %v3280_v37 = vsel %vm744_vm2, %v7577_v16, 0.0  ;;  %v7589_v38 = vld [vmem:[#allocation3 + $0x20] sm:$0xff]  ;;  %v7593_v41 = vld [vmem:[#allocation3 + $0x28] sm:$0xff] }
 0x531   : > { %v3279_v39 = vadd.f32 %v3278_v27, %v3277_v18  ;;  %v3282_v40 = vsel %vm744_vm2, %v7579_v2, 0.0  ;;  %v3284_v4 = vsel %vm744_vm2, %v7589_v38, 0.0  ;;  %v7597_v19 = vld [vmem:[#allocation3 + $0x30] sm:$0xff]  ;;  %v3286_v43 = vsel %vm744_vm2, %v7593_v41, 0.0  ;;  %v7601_v49 = vld [vmem:[#allocation3 + $0x38] sm:$0xff]  ;;  %v7605_v28 = vld [vmem:[#allocation3 + $0x40] sm:$0xff] }
 0x532   : > { %v3288_v6 = vsel %vm744_vm2, %v7597_v19, 0.0  ;;  %v3290_v55 = vsel %vm744_vm2, %v7601_v49, 0.0  ;;  %v7609_v57 = vld [vmem:[#allocation3 + $0x48] sm:$0xff]  ;;  %v3292_v62 = vsel %vm744_vm2, %v7605_v28, 0.0  ;;  %v7613_v29 = vld [vmem:[#allocation3 + $0x50] sm:$0xff]  ;;  %v7617_v12 = vld [vmem:[#allocation3 + $0x58] sm:$0xff] }
 0x533   : > { %v3281_v31 = vadd.f32 %v3280_v37, %v3279_v39  ;;  %v3294_v63 = vsel %vm744_vm2, %v7609_v57, 0.0  ;;  %v3296_v8 = vsel %vm744_vm2, %v7613_v29, 0.0  ;;  %v7621_v5 = vld [vmem:[#allocation3 + $0x60] sm:$0xff]  ;;  %v3298_v10 = vsel %vm744_vm2, %v7617_v12, 0.0  ;;  %v7625_v11 = vld [vmem:[#allocation3 + $0x68] sm:$0xff]  ;;  %v7629_v15 = vld [vmem:[#allocation3 + $0x70] sm:$0xff] }
 0x534   : > { %v3300_v13 = vsel %vm744_vm2, %v7621_v5, 0.0  ;;  %v3302_v54 = vsel %vm744_vm2, %v7625_v11, 0.0  ;;  %v7633_v61 = vld [vmem:[#allocation3 + $0x78] sm:$0xff]  ;;  %v3304_v20 = vsel %vm744_vm2, %v7629_v15, 0.0  ;;  %v7637_v32 = vld [vmem:[#allocation3 + $0x80] sm:$0xff]  ;;  %v7641_v35 = vld [vmem:[#allocation3 + $0x88] sm:$0xff] }
 0x535   : > { %v3283_v47 = vadd.f32 %v3282_v40, %v3281_v31  ;;  %v3306_v34 = vsel %vm744_vm2, %v7633_v61, 0.0  ;;  %v3308_v7 = vsel %vm744_vm2, %v7637_v32, 0.0  ;;  %v7645_v30 = vld [vmem:[#allocation3 + $0x90] sm:$0xff]  ;;  %v3310_v53 = vsel %vm744_vm2, %v7641_v35, 0.0  ;;  %v7649_v22 = vld [vmem:[#allocation3 + $0x98] sm:$0xff]  ;;  %v7653_v23 = vld [vmem:[#allocation3 + $0xa0] sm:$0xff] }
 0x536   : > { %v3312_v56 = vsel %vm744_vm2, %v7645_v30, 0.0  ;;  %v3314_v14 = vsel %vm744_vm2, %v7649_v22, 0.0  ;;  %v7657_v26 = vld [vmem:[#allocation3 + $0xa8] sm:$0xff]  ;;  %v3316_v27 = vsel %vm744_vm2, %v7653_v23, 0.0  ;;  %v7661_v37 = vld [vmem:[#allocation3 + $0xb0] sm:$0xff]  ;;  %v7665_v31 = vld [vmem:[#allocation3 + $0xb8] sm:$0xff] }
 0x537   : > { %v3285_v50 = vadd.f32 %v3284_v4, %v3283_v47  ;;  %v3318_v40 = vsel %vm744_vm2, %v7657_v26, 0.0  ;;  %v3320_v47 = vsel %vm744_vm2, %v7661_v37, 0.0 }
 0x539   : > { %v3287_v51 = vadd.f32 %v3286_v43, %v3285_v50  ;;  %v7669_v43 = vld [vmem:[#allocation3 + $0xc0] sm:$0xff] }
 0x53b   : > { %v3289_v59 = vadd.f32 %v3288_v6, %v3287_v51  ;;  %v3322_v6 = vsel %vm744_vm2, %v7665_v31, 0.0  ;;  %v7673_v51 = vld [vmem:[#allocation3 + $0xc8] sm:$0xff] }
 0x53d   : > { %v3291_v60 = vadd.f32 %v3290_v55, %v3289_v59  ;;  %v3324_v59 = vsel %vm744_vm2, %v7669_v43, 0.0 }
 0x53f   : > { %v3293_v52 = vadd.f32 %v3292_v62, %v3291_v60  ;;  %v7677_v62 = vld [vmem:[#allocation3 + $0xd0] sm:$0xff] }
 0x541   : > { %v3295_v9 = vadd.f32 %v3294_v63, %v3293_v52  ;;  %v3326_v63 = vsel %vm744_vm2, %v7673_v51, 0.0  ;;  %v7681_v52 = vld [vmem:[#allocation3 + $0xd8] sm:$0xff] }
 0x543   : > { %v3297_v48 = vadd.f32 %v3296_v8, %v3295_v9  ;;  %v3328_v9 = vsel %vm744_vm2, %v7677_v62, 0.0 }
 0x545   : > { %v3299_v17 = vadd.f32 %v3298_v10, %v3297_v48  ;;  %v7685_v10 = vld [vmem:[#allocation3 + $0xe0] sm:$0xff] }
 0x547   : > { %v3301_v58 = vadd.f32 %v3300_v13, %v3299_v17  ;;  %v3330_v13 = vsel %vm744_vm2, %v7681_v52, 0.0  ;;  %v7689_v17 = vld [vmem:[#allocation3 + $0xe8] sm:$0xff] }
 0x549   : > { %v3303_v33 = vadd.f32 %v3302_v54, %v3301_v58  ;;  %v3332_v58 = vsel %vm744_vm2, %v7685_v10, 0.0 }
 0x54b   : > { %v3305_v36 = vadd.f32 %v3304_v20, %v3303_v33  ;;  %v7693_v20 = vld [vmem:[#allocation3 + $0xf0] sm:$0xff] }
 0x54d   : > { %v3307_v21 = vadd.f32 %v3306_v34, %v3305_v36  ;;  %v3334_v34 = vsel %vm744_vm2, %v7689_v17, 0.0  ;;  %v7697_v36 = vld [vmem:[#allocation3 + $0xf8] sm:$0xff] }
 0x54f   : > { %v3309_v46 = vadd.f32 %v3308_v7, %v3307_v21  ;;  %v3336_v21 = vsel %vm744_vm2, %v7693_v20, 0.0 }
 0x551   : > { %v3311_v24 = vadd.f32 %v3310_v53, %v3309_v46  ;;  %v3338_v46 = vsel %vm744_vm2, %v7697_v36, 0.0 }
 0x553   : > { %v3313_v18 = vadd.f32 %v3312_v56, %v3311_v24 }
 0x555   : > { %v3315_v39 = vadd.f32 %v3314_v14, %v3313_v18 }
 0x557   : > { %v3317_v4 = vadd.f32 %v3316_v27, %v3315_v39 }
 0x559   : > { %v3319_v50 = vadd.f32 %v3318_v40, %v3317_v4 }
 0x55b   : > { %v3321_v55 = vadd.f32 %v3320_v47, %v3319_v50 }
 0x55d   : > { %v3323_v60 = vadd.f32 %v3322_v6, %v3321_v55 }
 0x55f   : > { %v3325_v8 = vadd.f32 %v3324_v59, %v3323_v60  ;;  %v3426_v60 = vrot.slane %v6334_v42, 2 }
 0x561   : > { %v3327_v48 = vadd.f32 %v3326_v63, %v3325_v8 }
 0x563   : > { %v3329_v54 = vadd.f32 %v3328_v9, %v3327_v48 }
 0x565   : > { %v3331_v33 = vadd.f32 %v3330_v13, %v3329_v54 }
 0x567   : > { %v3333_v7 = vadd.f32 %v3332_v58, %v3331_v33 }
 0x569   : > { %v3335_v53 = vadd.f32 %v3334_v34, %v3333_v7 }
 0x56b   : > { %v3337_v56 = vadd.f32 %v3336_v21, %v3335_v53 }
 0x56d   : > { %v3339_v24 = vadd.f32 %v3338_v46, %v3337_v56 }
 0x56f   : > { %v3340_v14 = vrot.slane %v3339_v24, 4 }
 0x571   : > { %v3341_v18 = vadd.f32 %v3340_v14, %v3339_v24  ;;  %v3555_v24 = vld [vmem:[#allocation2 + $0x38] sm:$0xff] }
 0x573   : > { %v3342_v27 = vrot.slane %v3341_v18, 2 }
 0x575   : > { %v3343_v39 = vadd.f32 %v3342_v27, %v3341_v18  ;;  %v3557_v27 = vld [vmem:[#allocation2 + $0x48] sm:$0xff] }
 0x577   : > { %v3344_v40 = vrot.slane %v3343_v39, 1 }
 0x579   : > { %v3345_v4 = vadd.f32 %v3344_v40, %v3343_v39 }
 0x57b   : > { %v3346_v47 = vmul.f32 0.00390625, %v3345_v4  ;;  %v3560_v4 = vld [vmem:[#allocation2 + $0x60] sm:$0xff] }
 0x57d   : > { %5852 = vmatmul.mubr.msk.f32.vlgmr.msra.gmra.mrb[0].mxu0 %vm744_vm2, %v3346_v47  ;;  %v3561_v47 = vld [vmem:[#allocation2 + $0x68] sm:$0xff] }
 0x650   : > { %v3420_v50 = vpop.f32.mrb[0].mxu0 }
 0x651   : > { %v3421_v6 = vadd.f32 %v3420_v50, %v6347_v45  ;;  %v5853_v55 = vpop.f32.mrb[1].mxu0 }
 0x652   : > { %v3564_v55 = vld [vmem:[#allocation2 + $0x80] sm:$0xff] }
 0x653   : > { %v3424_v59 = vmax.f32 %v3421_v6, 0.0  ;;  %v3563_v6 = vld [vmem:[#allocation2 + $0x78] sm:$0xff] }
 0x655   : > { %5857 = vmatmul.mubr.msk.f32.vlgmr.msra.gmra.mrb[0].mxu1 %vm3428_vm0, %v3424_v59  ;;  %v3566_v59 = vld [vmem:[#allocation2 + $0x90] sm:$0xff] }
 0x728   : > { %v3502_v63 = vpop.f32.mrb[0].mxu1 }
 0x729   : > { %v3503_v8 = vadd.f32 %v3502_v63, %v3426_v60  ;;  %v5858_v9 = vpop.f32.mrb[1].mxu1  ;;  %v3567_v60 = vld [vmem:[#allocation2 + $0x98] sm:$0xff] }
 0x72b   : > { %v5584_v48 = vmul.f32 -1.442695, %v3503_v8 }
 0x72d   : > { %6026 = vpow2.f32 %v5584_v48  ;;  %v3568_v48 = vld [vmem:[#allocation2 + $0xa0] sm:$0xff] }
 0x737   : > { %v6027_v13 = vpop.eup %6026 }
 0x738   : > { %v3509_v54 = vadd.f32 1.0, %v6027_v13  ;;  %v3569_v13 = vld [vmem:[#allocation2 + $0xa8] sm:$0xff] }
 0x73a   : > { %6028 = vrcp.f32 %v3509_v54 }
 0x744   : > { %v6029_v58 = vpop.eup %6028 }
 0x745   : > { %v3515_v44 = vrot.slane %v6029_v58, %v1642_v3 }
 0x747   : > { %v3516_v45 = vmul.f32 %v3515_v44, %v7573_v0  ;;  %v3517_v33 = vmul.f32 %v3515_v44, %v7575_v25  ;;  %v3518_v34 = vmul.f32 %v3515_v44, %v7577_v16  ;;  %v3519_v42 = vmul.f32 %v3515_v44, %v7579_v2 }
 0x748   : > { %v3520_v7 = vmul.f32 %v3515_v44, %v7589_v38  ;;  %v3521_v21 = vmul.f32 %v3515_v44, %v7593_v41  ;;  %v3522_v53 = vmul.f32 %v3515_v44, %v7597_v19  ;;  %v3523_v46 = vmul.f32 %v3515_v44, %v7601_v49  ;;  %v3548_v41 = vld [vmem:[#allocation2] sm:$0xff]  ;;  %v3549_v19 = vld [vmem:[#allocation2 + $0x8] sm:$0xff]  ;;  %v3550_v49 = vld [vmem:[#allocation2 + $0x10] sm:$0xff] }
 0x749   : > { %v3524_v56 = vmul.f32 %v3515_v44, %v7605_v28  ;;  %v3525_v1 = vmul.f32 %v3515_v44, %v7609_v57  ;;  %v3526_v3 = vmul.f32 %v3515_v44, %v7613_v29  ;;  %v3527_v0 = vmul.f32 %v3515_v44, %v7617_v12  ;;  %v3551_v28 = vld [vmem:[#allocation2 + $0x18] sm:$0xff] }
 0x74a   : > { %v7722_v25 = vmul.f32 %v3515_v44, %v7621_v5  ;;  %v7725_v16 = vmul.f32 %v3515_v44, %v7625_v11  ;;  %v7728_v2 = vmul.f32 %v3515_v44, %v7629_v15  ;;  %v7731_v38 = vmul.f32 %v3515_v44, %v7633_v61  ;;  %v3552_v11 = vld [vmem:[#allocation2 + $0x20] sm:$0xff]  ;;  %v3553_v15 = vld [vmem:[#allocation2 + $0x28] sm:$0xff]  ;;  %v3554_v61 = vld [vmem:[#allocation2 + $0x30] sm:$0xff] }
 0x74b   : > { %v7734_v57 = vmul.f32 %v3515_v44, %v7637_v32  ;;  %v7737_v29 = vmul.f32 %v3515_v44, %v7641_v35  ;;  %v7740_v12 = vmul.f32 %v3515_v44, %v7645_v30  ;;  %v7743_v5 = vmul.f32 %v3515_v44, %v7649_v22  ;;  %v3556_v30 = vld [vmem:[#allocation2 + $0x40] sm:$0xff]  ;;  %v3558_v22 = vld [vmem:[#allocation2 + $0x50] sm:$0xff] }
 0x74c   : > { %v7746_v14 = vmul.f32 %v3515_v44, %v7653_v23  ;;  %v7749_v18 = vmul.f32 %v3515_v44, %v7657_v26  ;;  %v7752_v32 = vmul.f32 %v3515_v44, %v7661_v37  ;;  %v7755_v35 = vmul.f32 %v3515_v44, %v7665_v31  ;;  %v3559_v37 = vld [vmem:[#allocation2 + $0x58] sm:$0xff] }
 0x74d   : > { %v7758_v39 = vmul.f32 %v3515_v44, %v7669_v43  ;;  %v7761_v40 = vmul.f32 %v3515_v44, %v7673_v51  ;;  %v7764_v23 = vmul.f32 %v3515_v44, %v7677_v62  ;;  %v7767_v26 = vmul.f32 %v3515_v44, %v7681_v52  ;;  %v3562_v62 = vld [vmem:[#allocation2 + $0x70] sm:$0xff]  ;;  %v3565_v52 = vld [vmem:[#allocation2 + $0x88] sm:$0xff] }
 0x74e   : > { %v7770_v31 = vmul.f32 %v3515_v44, %v7685_v10  ;;  %v7773_v50 = vmul.f32 %v3515_v44, %v7689_v17  ;;  %v7776_v43 = vmul.f32 %v3515_v44, %v7693_v20  ;;  %v7779_v51 = vmul.f32 %v3515_v44, %v7697_v36  ;;  %v3570_v17 = vld [vmem:[#allocation2 + $0xb0] sm:$0xff]  ;;  %v3572_v36 = vld [vmem:[#allocation2 + $0xc0] sm:$0xff]  ;;  %v3573_v44 = vld [vmem:[#allocation2 + $0xc8] sm:$0xff] }
 0x74f   : > { %8614 = vst [vmem:[#allocation9_spill] sm:$0xff] %v7764_v23  ;;  %8615 = vst [vmem:[#allocation10_spill] sm:$0xff] %v7767_v26  ;;  %v3580_v63 = vadd.f32 %v3548_v41, %v3516_v45  ;;  %v3581_v8 = vadd.f32 %v3549_v19, %v3517_v33  ;;  %v3582_v9 = vadd.f32 %v3550_v49, %v3518_v34  ;;  %v3574_v45 = vld [vmem:[#allocation2 + $0xd0] sm:$0xff]  ;;  %v3575_v33 = vld [vmem:[#allocation2 + $0xd8] sm:$0xff] }
 0x750   : > { %8616 = vst [vmem:[#allocation11_spill] sm:$0xff] %v7770_v31  ;;  %8617 = vst [vmem:[#allocation12_spill] sm:$0xff] %v7773_v50  ;;  %v3583_v10 = vadd.f32 %v3551_v28, %v3519_v42  ;;  %v3584_v54 = vadd.f32 %v3552_v11, %v3520_v7  ;;  %v3585_v58 = vadd.f32 %v3553_v15, %v3521_v21  ;;  %v3571_v50 = vld [vmem:[#allocation2 + $0xb8] sm:$0xff]  ;;  %v3576_v34 = vld [vmem:[#allocation2 + $0xe0] sm:$0xff] }
 0x751   : > { %8618 = vst [vmem:[#allocation13_spill] sm:$0xff] %v7776_v43  ;;  %8619 = vst [vmem:[#allocation14_spill] sm:$0xff] %v7779_v51  ;;  %v3586_v20 = vadd.f32 %v3554_v61, %v3522_v53  ;;  %v3587_v43 = vadd.f32 %v3555_v24, %v3523_v46  ;;  %v3588_v51 = vadd.f32 %v3556_v30, %v3524_v56  ;;  %v3577_v46 = vld [vmem:[#allocation2 + $0xe8] sm:$0xff]  ;;  %v3578_v56 = vld [vmem:[#allocation2 + $0xf0] sm:$0xff] }
 0x752   : > { %v3589_v31 = vadd.f32 %v3557_v27, %v3525_v1  ;;  %v3590_v26 = vadd.f32 %v3558_v22, %v3526_v3  ;;  %v3591_v23 = vadd.f32 %v3559_v37, %v3527_v0  ;;  %3612 = vst.msk [vmem:[#allocation2] sm:$0xff] %vm744_vm2, %v3580_v63  ;;  %3613 = vst.msk [vmem:[#allocation2 + $0x8] sm:$0xff] %vm744_vm2, %v3581_v8  ;;  %v3579_v1 = vld [vmem:[#allocation2 + $0xf8] sm:$0xff]  ;;  %v7837_v27 = vld [vmem:[%s8605_s6] sm:$0xff] (!%p5585_p10) }
 0x753   : > { %3614 = vst.msk [vmem:[#allocation2 + $0x10] sm:$0xff] %vm744_vm2, %v3582_v9  ;;  %3615 = vst.msk [vmem:[#allocation2 + $0x18] sm:$0xff] %vm744_vm2, %v3583_v10  ;;  %v3592_v42 = vadd.f32 %v3560_v4, %v7722_v25  ;;  %v3593_v7 = vadd.f32 %v3561_v47, %v7725_v16  ;;  %v3594_v21 = vadd.f32 %v3562_v62, %v7728_v2  ;;  %v7842_v22 = vld [vmem:[%s8605_s6 + $0x8] sm:$0xff] (!%p5585_p10)  ;;  %v7862_v4 = vld [vmem:[%s8606_s7] ss:$0 sm:$0xff] (!%p5585_p10) }
 0x754   : > { %v3595_v53 = vadd.f32 %v3563_v6, %v7731_v38  ;;  %3616 = vst.msk [vmem:[#allocation2 + $0x20] sm:$0xff] %vm744_vm2, %v3584_v54  ;;  %3617 = vst.msk [vmem:[#allocation2 + $0x28] sm:$0xff] %vm744_vm2, %v3585_v58  ;;  %v3596_v3 = vadd.f32 %v3564_v55, %v7734_v57  ;;  %v3597_v0 = vadd.f32 %v3565_v52, %v7737_v29 }
 0x755   : > { %3618 = vst.msk [vmem:[#allocation2 + $0x30] sm:$0xff] %vm744_vm2, %v3586_v20  ;;  %3619 = vst.msk [vmem:[#allocation2 + $0x38] sm:$0xff] %vm744_vm2, %v3587_v43  ;;  %v3598_v25 = vadd.f32 %v3566_v59, %v7740_v12  ;;  %v3599_v16 = vadd.f32 %v3567_v60, %v7743_v5  ;;  %v3600_v2 = vadd.f32 %v3568_v48, %v7746_v14 }
 0x756   : > { %3620 = vst.msk [vmem:[#allocation2 + $0x40] sm:$0xff] %vm744_vm2, %v3588_v51  ;;  %3621 = vst.msk [vmem:[#allocation2 + $0x48] sm:$0xff] %vm744_vm2, %v3589_v31  ;;  %v3601_v38 = vadd.f32 %v3569_v13, %v7749_v18  ;;  %v3602_v41 = vadd.f32 %v3570_v17, %v7752_v32  ;;  %v3603_v19 = vadd.f32 %v3571_v50, %v7755_v35  ;;  %v8620_v57 = vld [vmem:[#allocation9_spill] sm:$0xff]  ;;  %v8621_v12 = vld [vmem:[#allocation10_spill] sm:$0xff] }
 0x757   : > { %3622 = vst.msk [vmem:[#allocation2 + $0x50] sm:$0xff] %vm744_vm2, %v3590_v26  ;;  %3623 = vst.msk [vmem:[#allocation2 + $0x58] sm:$0xff] %vm744_vm2, %v3591_v23  ;;  %v3604_v49 = vadd.f32 %v3572_v36, %v7758_v39  ;;  %v3605_v28 = vadd.f32 %v3573_v44, %v7761_v40  ;;  %v3606_v29 = vadd.f32 %v3574_v45, %v8620_v57  ;;  %v8622_v11 = vld [vmem:[#allocation11_spill] sm:$0xff]  ;;  %v8623_v61 = vld [vmem:[#allocation12_spill] sm:$0xff] }
 0x758   : > { %3624 = vst.msk [vmem:[#allocation2 + $0x60] sm:$0xff] %vm744_vm2, %v3592_v42  ;;  %3625 = vst.msk [vmem:[#allocation2 + $0x68] sm:$0xff] %vm744_vm2, %v3593_v7  ;;  %v3607_v5 = vadd.f32 %v3575_v33, %v8621_v12  ;;  %v3608_v15 = vadd.f32 %v3576_v34, %v8622_v11  ;;  %v3609_v24 = vadd.f32 %v3577_v46, %v8623_v61  ;;  %v8624_v14 = vld [vmem:[#allocation13_spill] sm:$0xff]  ;;  %v8625_v32 = vld [vmem:[#allocation14_spill] sm:$0xff] }
 0x759   : > { %3626 = vst.msk [vmem:[#allocation2 + $0x70] sm:$0xff] %vm744_vm2, %v3594_v21  ;;  %3627 = vst.msk [vmem:[#allocation2 + $0x78] sm:$0xff] %vm744_vm2, %v3595_v53  ;;  %v3610_v18 = vadd.f32 %v3578_v56, %v8624_v14  ;;  %v3611_v35 = vadd.f32 %v3579_v1, %v8625_v32  ;;  %v3648_v30 = vld [vmem:[#allocation2] sm:$0xff] (!%p5585_p10)  ;;  %v7847_v39 = vld [vmem:[%s8605_s6 + $0x10] sm:$0xff] (!%p5585_p10) }
 0x75a   : > { %3628 = vst.msk [vmem:[#allocation2 + $0x80] sm:$0xff] %vm744_vm2, %v3596_v3  ;;  %3629 = vst.msk [vmem:[#allocation2 + $0x88] sm:$0xff] %vm744_vm2, %v3597_v0  ;;  %v7852_v40 = vld [vmem:[%s8605_s6 + $0x18] sm:$0xff] (!%p5585_p10)  ;;  %v7857_v23 = vld [vmem:[%s8605_s6 + $0x20] sm:$0xf] (!%p5585_p10)  ;;  %v3702_v26 = vrot.slane (!%p5585_p10), %v3648_v30, 1 }
 0x75b   : > { %3630 = vst.msk [vmem:[#allocation2 + $0x90] sm:$0xff] %vm744_vm2, %v3598_v25  ;;  %3631 = vst.msk [vmem:[#allocation2 + $0x98] sm:$0xff] %vm744_vm2, %v3599_v16  ;;  %3647 = sbr.rel (%p5585_p10) target bundleno = 2544 (0x9f0), region = 74  ;;  %v3750_v37 = vrot.slane (!%p5585_p10), %v3648_v30, 7  ;;  %v3649_v47 = vld [vmem:[#allocation2 + $0x8] sm:$0xff] (!%p5585_p10)  ;;  %v3650_v31 = vld [vmem:[#allocation2 + $0x10] sm:$0xff] (!%p5585_p10) }
 0x75c   : > { %3632 = vst.msk [vmem:[#allocation2 + $0xa0] sm:$0xff] %vm744_vm2, %v3600_v2  ;;  %3633 = vst.msk [vmem:[#allocation2 + $0xa8] sm:$0xff] %vm744_vm2, %v3601_v38  ;;  %v3751_v43 = vrot.slane (!%p5585_p10), %v3649_v47, 7  ;;  %v3846_v51 = vrot.slane (!%p5585_p10), %v3649_v47, 5  ;;  %v3703_v62 = vrot.slane (!%p5585_p10), %v3650_v31, 1  ;;  %v3651_v6 = vld [vmem:[#allocation2 + $0x18] sm:$0xff] (!%p5585_p10) }
 0x75d   : > { %3634 = vst.msk [vmem:[#allocation2 + $0xb0] sm:$0xff] %vm744_vm2, %v3602_v41  ;;  %3635 = vst.msk [vmem:[#allocation2 + $0xb8] sm:$0xff] %vm744_vm2, %v3603_v19  ;;  %v3878_v50 = vsel (!%p5585_p10), %vm582_vm1, %v3702_v26, %v3750_v37  ;;  %v3652_v55 = vld [vmem:[#allocation2 + $0x20] sm:$0xff] (!%p5585_p10)  ;;  %v3653_v52 = vld [vmem:[#allocation2 + $0x28] sm:$0xff] (!%p5585_p10)  ;;  %v3753_v59 = vrot.slane (!%p5585_p10), %v3650_v31, 7  ;;  %v3754_v60 = vrot.slane (!%p5585_p10), %v3651_v6, 7 }
 0x75e   : > { %3636 = vst.msk [vmem:[#allocation2 + $0xc0] sm:$0xff] %vm744_vm2, %v3604_v49  ;;  %3637 = vst.msk [vmem:[#allocation2 + $0xc8] sm:$0xff] %vm744_vm2, %v3605_v28  ;;  %v3847_v63 = vrot.slane (!%p5585_p10), %v3651_v6, 5  ;;  %v3704_v8 = vrot.slane (!%p5585_p10), %v3652_v55, 1  ;;  %v3654_v9 = vld [vmem:[#allocation2 + $0x30] sm:$0xff] (!%p5585_p10)  ;;  %v3752_v10 = vsel (!%p5585_p10), %vm582_vm1, %v3750_v37, %v3751_v43  ;;  %v3894_v48 = vsel (!%p5585_p10), %vm582_vm1, %v3751_v43, %v3846_v51  ;;  %v3655_v54 = vld [vmem:[#allocation2 + $0x38] sm:$0xff] (!%p5585_p10) }
 0x75f   : > { %3638 = vst.msk [vmem:[#allocation2 + $0xd0] sm:$0xff] %vm744_vm2, %v3606_v29  ;;  %3639 = vst.msk [vmem:[#allocation2 + $0xd8] sm:$0xff] %vm744_vm2, %v3607_v5  ;;  %v3756_v13 = vrot.slane (!%p5585_p10), %v3652_v55, 7  ;;  %v3757_v17 = vrot.slane (!%p5585_p10), %v3653_v52, 7  ;;  %v3656_v58 = vld [vmem:[#allocation2 + $0x40] sm:$0xff] (!%p5585_p10)  ;;  %v3879_v20 = vsel (!%p5585_p10), %vm582_vm1, %v3703_v62, %v3753_v59  ;;  %v3755_v36 = vsel (!%p5585_p10), %vm582_vm1, %v3753_v59, %v3754_v60  ;;  %v3657_v33 = vld [vmem:[#allocation2 + $0x48] sm:$0xff] (!%p5585_p10) }
 0x760   : > { %3640 = vst.msk [vmem:[#allocation2 + $0xe0] sm:$0xff] %vm744_vm2, %v3608_v15  ;;  %3641 = vst.msk [vmem:[#allocation2 + $0xe8] sm:$0xff] %vm744_vm2, %v3609_v24  ;;  %v3895_v44 = vsel (!%p5585_p10), %vm582_vm1, %v3754_v60, %v3847_v63  ;;  %v3848_v45 = vrot.slane (!%p5585_p10), %v3653_v52, 5  ;;  %v3705_v7 = vrot.slane (!%p5585_p10), %v3654_v9, 1  ;;  %v3759_v21 = vrot.slane (!%p5585_p10), %v3654_v9, 7  ;;  %v3658_v53 = vld [vmem:[#allocation2 + $0x50] sm:$0xff] (!%p5585_p10) }
 0x761   : > { %3642 = vst.msk [vmem:[#allocation2 + $0xf0] sm:$0xff] %vm744_vm2, %v3610_v18  ;;  %3643 = vst.msk [vmem:[#allocation2 + $0xf8] sm:$0xff] %vm744_vm2, %v3611_v35  ;;  %v3880_v34 = vsel (!%p5585_p10), %vm582_vm1, %v3704_v8, %v3756_v13  ;;  %v3758_v42 = vsel (!%p5585_p10), %vm582_vm1, %v3756_v13, %v3757_v17  ;;  %v3760_v56 = vrot.slane (!%p5585_p10), %v3655_v54, 7  ;;  %v3849_v1 = vrot.slane (!%p5585_p10), %v3655_v54, 5  ;;  %v3659_v0 = vld [vmem:[#allocation2 + $0x58] sm:$0xff] (!%p5585_p10)  ;;  %v3660_v41 = vld [vmem:[#allocation2 + $0x60] sm:$0xff] (!%p5585_p10) }
 0x762   : > { %3910 = vst.msk [vmem:[#allocation4 + $0x18] sm:$0xff] %vm744_vm2, %v3878_v50  ;;  %3911 = vst.msk [vmem:[#allocation4 + $0x20] sm:$0xff] %vm744_vm2, %v3752_v10  ;;  %v3896_v46 = vsel %vm582_vm1, %v3757_v17, %v3848_v45  ;;  %v3706_v3 = vrot.slane %v3656_v58, 1  ;;  %v3881_v25 = vsel %vm582_vm1, %v3705_v7, %v3759_v21  ;;  %v3762_v16 = vrot.slane %v3656_v58, 7  ;;  %v3661_v29 = vld [vmem:[#allocation2 + $0x68] sm:$0xff]  ;;  %v3662_v12 = vld [vmem:[#allocation2 + $0x70] sm:$0xff] }
 0x763   : > { %3912 = vst.msk [vmem:[#allocation4 + $0x28] sm:$0x3] %vm747_vm3, %v3894_v48  ;;  %3915 = vst.msk [vmem:[#allocation4 + $0x40] sm:$0x3] %vm747_vm3, %v3895_v44  ;;  %v3763_v2 = vrot.slane %v3657_v33, 7  ;;  %v3850_v38 = vrot.slane %v3657_v33, 5  ;;  %v3761_v19 = vsel %vm582_vm1, %v3759_v21, %v3760_v56  ;;  %v3897_v49 = vsel %vm582_vm1, %v3760_v56, %v3849_v1 }
 0x764   : > { %3913 = vst.msk [vmem:[#allocation4 + $0x30] sm:$0xff] %vm744_vm2, %v3879_v20  ;;  %3958 = vst.msk [vmem:[#allocation4] sm:$0xff] %vm744_vm2, %v3879_v20  ;;  %v3707_v28 = vrot.slane %v3658_v53, 1  ;;  %v3765_v57 = vrot.slane %v3658_v53, 7  ;;  %v3882_v5 = vsel %vm582_vm1, %v3706_v3, %v3762_v16  ;;  %v3766_v61 = vrot.slane %v3659_v0, 7  ;;  %v3663_v24 = vld [vmem:[#allocation2 + $0x78] sm:$0xff] }
 0x765   : > { %3914 = vst.msk [vmem:[#allocation4 + $0x38] sm:$0xff] %vm744_vm2, %v3755_v36  ;;  %3959 = vst.msk [vmem:[#allocation4 + $0x8] sm:$0xff] %vm744_vm2, %v3755_v36  ;;  %v3764_v11 = vsel %vm582_vm1, %v3762_v16, %v3763_v2  ;;  %v3898_v15 = vsel %vm582_vm1, %v3763_v2, %v3850_v38  ;;  %v3851_v18 = vrot.slane %v3659_v0, 5  ;;  %v3708_v32 = vrot.slane %v3660_v41, 1  ;;  %v3664_v30 = vld [vmem:[#allocation2 + $0x80] sm:$0xff]  ;;  %v3665_v50 = vld [vmem:[#allocation2 + $0x88] sm:$0xff] }
 0x766   : > { %3960 = vst.msk [vmem:[#allocation4 + $0x10] sm:$0x3] %vm747_vm3, %v3895_v44  ;;  %3918 = vst.msk [vmem:[#allocation4 + $0x58] sm:$0x3] %vm747_vm3, %v3896_v46  ;;  %v3883_v14 = vsel %vm582_vm1, %v3707_v28, %v3765_v57  ;;  %v3768_v35 = vrot.slane %v3660_v41, 7  ;;  %v3767_v26 = vsel %vm582_vm1, %v3765_v57, %v3766_v61  ;;  %v3769_v37 = vrot.slane %v3661_v29, 7 }
 0x767   : > { %3916 = vst.msk [vmem:[#allocation4 + $0x48] sm:$0xff] %vm744_vm2, %v3880_v34  ;;  %3917 = vst.msk [vmem:[#allocation4 + $0x50] sm:$0xff] %vm744_vm2, %v3758_v42  ;;  %v3852_v47 = vrot.slane %v3661_v29, 5  ;;  %v3709_v31 = vrot.slane %v3662_v12, 1  ;;  %v3899_v43 = vsel %vm582_vm1, %v3766_v61, %v3851_v18  ;;  %v3771_v62 = vrot.slane %v3662_v12, 7  ;;  %v3666_v55 = vld [vmem:[#allocation2 + $0x90] sm:$0xff] }
 0x768   : > { %3919 = vst.msk [vmem:[#allocation4 + $0x60] sm:$0xff] %vm744_vm2, %v3881_v25  ;;  %3920 = vst.msk [vmem:[#allocation4 + $0x68] sm:$0xff] %vm744_vm2, %v3761_v19  ;;  %v3884_v51 = vsel %vm582_vm1, %v3708_v32, %v3768_v35  ;;  %v3772_v6 = vrot.slane %v3663_v24, 7  ;;  %v3770_v52 = vsel %vm582_vm1, %v3768_v35, %v3769_v37  ;;  %v3853_v60 = vrot.slane %v3663_v24, 5  ;;  %v3667_v8 = vld [vmem:[#allocation2 + $0x98] sm:$0xff]  ;;  %v3668_v17 = vld [vmem:[#allocation2 + $0xa0] sm:$0xff] }
 0x769   : > { %3921 = vst.msk [vmem:[#allocation4 + $0x70] sm:$0x3] %vm747_vm3, %v3897_v49  ;;  %3924 = vst.msk [vmem:[#allocation4 + $0x88] sm:$0x3] %vm747_vm3, %v3898_v15  ;;  %v3900_v59 = vsel %vm582_vm1, %v3769_v37, %v3852_v47  ;;  %v3710_v63 = vrot.slane %v3664_v30, 1  ;;  %v3885_v9 = vsel %vm582_vm1, %v3709_v31, %v3771_v62  ;;  %v3774_v48 = vrot.slane %v3664_v30, 7 }
 0x76a   : > { %3922 = vst.msk [vmem:[#allocation4 + $0x78] sm:$0xff] %vm744_vm2, %v3882_v5  ;;  %3923 = vst.msk [vmem:[#allocation4 + $0x80] sm:$0xff] %vm744_vm2, %v3764_v11  ;;  %v3773_v10 = vsel %vm582_vm1, %v3771_v62, %v3772_v6  ;;  %v3775_v13 = vrot.slane %v3665_v50, 7  ;;  %v3901_v54 = vsel %vm582_vm1, %v3772_v6, %v3853_v60  ;;  %v3854_v58 = vrot.slane %v3665_v50, 5  ;;  %v3669_v44 = vld [vmem:[#allocation2 + $0xa8] sm:$0xff]  ;;  %v3670_v7 = vld [vmem:[#allocation2 + $0xb0] sm:$0xff] }
 0x76b   : > { %3925 = vst.msk [vmem:[#allocation4 + $0x90] sm:$0xff] %vm744_vm2, %v3883_v14  ;;  %3926 = vst.msk [vmem:[#allocation4 + $0x98] sm:$0xff] %vm744_vm2, %v3767_v26  ;;  %v3711_v20 = vrot.slane %v3666_v55, 1  ;;  %v3777_v36 = vrot.slane %v3666_v55, 7  ;;  %v3886_v45 = vsel %vm582_vm1, %v3710_v63, %v3774_v48  ;;  %v3778_v34 = vrot.slane %v3667_v8, 7  ;;  %v3671_v21 = vld [vmem:[#allocation2 + $0xb8] sm:$0xff] }
 0x76c   : > { %3927 = vst.msk [vmem:[#allocation4 + $0xa0] sm:$0x3] %vm747_vm3, %v3899_v43  ;;  %3930 = vst.msk [vmem:[#allocation4 + $0xb8] sm:$0x3] %vm747_vm3, %v3900_v59  ;;  %v3776_v33 = vsel %vm582_vm1, %v3774_v48, %v3775_v13  ;;  %v3855_v42 = vrot.slane %v3667_v8, 5  ;;  %v3902_v53 = vsel %vm582_vm1, %v3775_v13, %v3854_v58  ;;  %v3712_v56 = vrot.slane %v3668_v17, 1 }
 0x76d   : > { %3928 = vst.msk [vmem:[#allocation4 + $0xa8] sm:$0xff] %vm744_vm2, %v3884_v51  ;;  %3929 = vst.msk [vmem:[#allocation4 + $0xb0] sm:$0xff] %vm744_vm2, %v3770_v52  ;;  %v3887_v46 = vsel %vm582_vm1, %v3711_v20, %v3777_v36  ;;  %v3780_v1 = vrot.slane %v3668_v17, 7  ;;  %v3672_v3 = vld [vmem:[#allocation2 + $0xc0] sm:$0xff]  ;;  %v3779_v0 = vsel %vm582_vm1, %v3777_v36, %v3778_v34  ;;  %v3781_v16 = vrot.slane %v3669_v44, 7  ;;  %v3673_v38 = vld [vmem:[#allocation2 + $0xc8] sm:$0xff] }
 0x76e   : > { %3931 = vst.msk [vmem:[#allocation4 + $0xc0] sm:$0xff] %vm744_vm2, %v3885_v9  ;;  %3932 = vst.msk [vmem:[#allocation4 + $0xc8] sm:$0xff] %vm744_vm2, %v3773_v10  ;;  %v3903_v25 = vsel %vm582_vm1, %v3778_v34, %v3855_v42  ;;  %v3856_v2 = vrot.slane %v3669_v44, 5  ;;  %v3713_v19 = vrot.slane %v3670_v7, 1  ;;  %v3783_v49 = vrot.slane %v3670_v7, 7  ;;  %v3674_v57 = vld [vmem:[#allocation2 + $0xd0] sm:$0xff] }
 0x76f   : > { %3933 = vst.msk [vmem:[#allocation4 + $0xd0] sm:$0x3] %vm747_vm3, %v3901_v54  ;;  %3936 = vst.msk [vmem:[#allocation4 + $0xe8] sm:$0x3] %vm747_vm3, %v3902_v53  ;;  %v3888_v41 = vsel %vm582_vm1, %v3712_v56, %v3780_v1  ;;  %v3784_v28 = vrot.slane %v3671_v21, 7  ;;  %v3782_v29 = vsel %vm582_vm1, %v3780_v1, %v3781_v16  ;;  %v3857_v5 = vrot.slane %v3671_v21, 5 }
 0x770   : > { %3934 = vst.msk [vmem:[#allocation4 + $0xd8] sm:$0xff] %vm744_vm2, %v3886_v45  ;;  %3935 = vst.msk [vmem:[#allocation4 + $0xe0] sm:$0xff] %vm744_vm2, %v3776_v33  ;;  %v3904_v12 = vsel %vm582_vm1, %v3781_v16, %v3856_v2  ;;  %v3714_v11 = vrot.slane %v3672_v3, 1  ;;  %v3675_v15 = vld [vmem:[#allocation2 + $0xd8] sm:$0xff]  ;;  %v3889_v61 = vsel %vm582_vm1, %v3713_v19, %v3783_v49  ;;  %v3786_v14 = vrot.slane %v3672_v3, 7  ;;  %v3676_v32 = vld [vmem:[#allocation2 + $0xe0] sm:$0xff] }
 0x771   : > { %3937 = vst.msk [vmem:[#allocation4 + $0xf0] sm:$0xff] %vm744_vm2, %v3887_v46  ;;  %3938 = vst.msk [vmem:[#allocation4 + $0xf8] sm:$0xff] %vm744_vm2, %v3779_v0  ;;  %v3785_v24 = vsel %vm582_vm1, %v3783_v49, %v3784_v28  ;;  %v3787_v18 = vrot.slane %v3673_v38, 7  ;;  %v3905_v35 = vsel %vm582_vm1, %v3784_v28, %v3857_v5  ;;  %v3858_v30 = vrot.slane %v3673_v38, 5  ;;  %v3677_v47 = vld [vmem:[#allocation2 + $0xe8] sm:$0xff]  ;;  %v3678_v62 = vld [vmem:[#allocation2 + $0xf0] sm:$0xff] }
 0x772   : > { %3939 = vst.msk [vmem:[#allocation4 + $0x100] sm:$0x3] %vm747_vm3, %v3903_v25  ;;  %3942 = vst.msk [vmem:[#allocation4 + $0x118] sm:$0x3] %vm747_vm3, %v3904_v12  ;;  %v3715_v26 = vrot.slane %v3674_v57, 1  ;;  %v3789_v37 = vrot.slane %v3674_v57, 7  ;;  %v3890_v31 = vsel %vm582_vm1, %v3714_v11, %v3786_v14 }
 0x773   : > { %3940 = vst.msk [vmem:[#allocation4 + $0x108] sm:$0xff] %vm744_vm2, %v3888_v41  ;;  %3941 = vst.msk [vmem:[#allocation4 + $0x110] sm:$0xff] %vm744_vm2, %v3782_v29  ;;  %v3788_v50 = vsel %vm582_vm1, %v3786_v14, %v3787_v18  ;;  %v3790_v43 = vrot.slane %v3675_v15, 7  ;;  %v3859_v51 = vrot.slane %v3675_v15, 5  ;;  %v3679_v6 = vld [vmem:[#allocation2 + $0xf8] sm:$0xff]  ;;  %v3906_v55 = vsel %vm582_vm1, %v3787_v18, %v3858_v30 }
 0x774   : > { %3943 = vst.msk [vmem:[#allocation4 + $0x120] sm:$0xff] %vm744_vm2, %v3889_v61  ;;  %3944 = vst.msk [vmem:[#allocation4 + $0x128] sm:$0xff] %vm744_vm2, %v3785_v24  ;;  %v3891_v52 = vsel %vm582_vm1, %v3715_v26, %v3789_v37  ;;  %v3716_v59 = vrot.slane %v3676_v32, 1  ;;  %v3792_v60 = vrot.slane %v3676_v32, 7  ;;  %v3793_v9 = vrot.slane %v3677_v47, 7 }
 0x775   : > { %3945 = vst.msk [vmem:[#allocation4 + $0x130] sm:$0x3] %vm747_vm3, %v3905_v35  ;;  %3948 = vst.msk [vmem:[#allocation4 + $0x148] sm:$0x3] %vm747_vm3, %v3906_v55  ;;  %v3791_v63 = vsel %vm582_vm1, %v3789_v37, %v3790_v43  ;;  %v3907_v8 = vsel %vm582_vm1, %v3790_v43, %v3859_v51  ;;  %v3860_v10 = vrot.slane %v3677_v47, 5  ;;  %v3717_v13 = vrot.slane %v3678_v62, 1 }
 0x776   : > { %3946 = vst.msk [vmem:[#allocation4 + $0x138] sm:$0xff] %vm744_vm2, %v3890_v31  ;;  %3947 = vst.msk [vmem:[#allocation4 + $0x140] sm:$0xff] %vm744_vm2, %v3788_v50  ;;  %v3892_v48 = vsel %vm582_vm1, %v3716_v59, %v3792_v60  ;;  %v3795_v17 = vrot.slane %v3678_v62, 7  ;;  %v3796_v54 = vrot.slane %v3679_v6, 7  ;;  %v3794_v58 = vsel %vm582_vm1, %v3792_v60, %v3793_v9 }
 0x777   : > { %3949 = vst.msk [vmem:[#allocation4 + $0x150] sm:$0xff] %vm744_vm2, %v3891_v52  ;;  %3950 = vst.msk [vmem:[#allocation4 + $0x158] sm:$0xff] %vm744_vm2, %v3791_v63  ;;  %v3908_v20 = vsel %vm582_vm1, %v3793_v9, %v3860_v10  ;;  %v3861_v36 = vrot.slane %v3679_v6, 5 }
 0x778   : > { %3951 = vst.msk [vmem:[#allocation4 + $0x160] sm:$0x3] %vm747_vm3, %v3907_v8  ;;  %3954 = vst.msk [vmem:[#allocation4 + $0x178] sm:$0x3] %vm747_vm3, %v3908_v20  ;;  %v3893_v44 = vsel %vm582_vm1, %v3717_v13, %v3795_v17  ;;  %v3797_v45 = vsel %vm582_vm1, %v3795_v17, %v3796_v54 }
 0x779   : > { %3952 = vst.msk [vmem:[#allocation4 + $0x168] sm:$0xff] %vm744_vm2, %v3892_v48  ;;  %3961 = vst.msk [vmem:[#allocation4 + $0x198] sm:$0xff] %vm744_vm2, %v3892_v48  ;;  %v3909_v33 = vsel %vm582_vm1, %v3796_v54, %v3861_v36 }
 0x77a   : > { %3953 = vst.msk [vmem:[#allocation4 + $0x170] sm:$0xff] %vm744_vm2, %v3794_v58  ;;  %3962 = vst.msk [vmem:[#allocation4 + $0x1a0] sm:$0xff] %vm744_vm2, %v3794_v58 }
 0x77b   : > { %3963 = vst.msk [vmem:[#allocation4 + $0x1a8] sm:$0x3] %vm747_vm3, %v3908_v20  ;;  %3957 = vst.msk [vmem:[#allocation4 + $0x190] sm:$0x3] %vm747_vm3, %v3909_v33 }
 0x77c   : > { %3955 = vst.msk [vmem:[#allocation4 + $0x180] sm:$0xff] %vm744_vm2, %v3893_v44  ;;  %3956 = vst.msk [vmem:[#allocation4 + $0x188] sm:$0xff] %vm744_vm2, %v3797_v45 }
 0x77d LB: >> { %s5587_s12 = smul.u32 192, %s6092_s11  ;;  %s6112_s18 = smov 4   ;;  %v5909_v62 = vpack.c.bf16 %v7842_v22, %v7837_v27  ;;  %v5913_v6 = vpack.c.bf16 %v7852_v40, %v7847_v39  ;;  %s6092_s11 = sphi %s7966_s11, %s3969_s11  }
 0x77e   : >> { %s6113_s19 = smov 8   ;;  %s6114_s22 = smov 12  }
 0x77f   : >> { %s7972_s13 = scalar_lea.vmem [#allocation4], %s5587_s12  ;;  %s6115_s24 = smov 16   ;;  %5910 = vmatprep.subr.bf16.mxu0 %v5909_v62  ;;  %5929 = vmatprep.subr.bf16.mxu1 %v5909_v62 }
 0x780   : >> { %s6116_s25 = smov 20   ;;  %s6117_s26 = smov 24   ;;  %5912 = vmatpush3.bf16.msra.mxu0 %v5909_v62  ;;  %5932 = vmatpush3.bf16.msra.mxu1 %v5909_v62 }
 0x781   : >> { %s6118_s28 = smov 28   ;;  %s6119_s14 = smov 32   ;;  %5914 = vmatprep.subr.bf16.mxu0 %v5913_v6  ;;  %5930 = vmatprep.subr.bf16.mxu1 %v5913_v6 }
 0x782   : >> { %s5713_s15 = sshll.u32 %s6092_s11, 7  ;;  %s3969_s11 = sadd.s32 1, %s6092_s11  }
 0x783   : >> { %v4006_v34 = vld [vmem:[%s7972_s13 + $0x9] sm:$0xff]  ;;  %v4005_v42 = vld [vmem:[%s7972_s13 + $0x1] sm:$0xff]  ;;  %v7985_v53 = vld [vmem:[%s7972_s13 + $0x78] sm:$0xff]  ;;  %s8439_s17 = scalar_lea.vmem [#allocation3], %s5713_s15  ;;  %p3966_p11 = scmp.ge.s32.totalorder %s3969_s11, 2  }
 0x784   : >> { %4039 = vrot.lane.b32.xlu1 %v4006_v34, %s6112_s18  ;;  %4037 = vrot.lane.b32.xlu0 %v4005_v42, %s6112_s18  ;;  %v7979_v7 = vld [vmem:[%s7972_s13 + $0x69] sm:$0xff]  ;;  %v7982_v21 = vld [vmem:[%s7972_s13 + $0x61] sm:$0xff]  ;;  %3999 = vst.msk [vmem:[#allocation5 + $0x50] sm:$0xff] %vm744_vm2, %v7985_v53 }
 0x785   : >> { %v5590_v46 = vld [vmem:[%s7972_s13 + $0x18] sm:$0xff]  ;;  %v7989_v56 = vld [vmem:[%s7972_s13 + $0x80] sm:$0xff]  ;;  %v8007_v25 = vld [vmem:[%s7972_s13 + $0x90] sm:$0xff]  ;;  %5916 = vmatpush3.bf16.msra.mxu0 %v5913_v6  ;;  %5933 = vmatpush3.bf16.msra.mxu1 %v5913_v6 }
 0x786   : >> { %v5591_v1 = vld [vmem:[%s7972_s13 + $0x20] sm:$0xff]  ;;  %3991 = vst.msk [vmem:[#allocation5 + $0x10] sm:$0xff] %vm744_vm2, %v5590_v46  ;;  %4000 = vst.msk [vmem:[#allocation5 + $0x58] sm:$0xff] %vm744_vm2, %v7989_v56  ;;  %v8010_v16 = vld [vmem:[%s7972_s13 + $0x30] sm:$0xff]  ;;  %5867 = vmatprep.subr.msk.mxu0 %vm1693_vm4, %v7857_v23  ;;  %5931 = vmatprep.subr.msk.mxu1 %vm1693_vm4, %v7857_v23 }
 0x787   : >> { %3992 = vst.msk [vmem:[#allocation5 + $0x18] sm:$0xff] %vm744_vm2, %v5591_v1  ;;  %v8003_v3 = vld [vmem:[%s7972_s13 + $0x62] sm:$0xff]  ;;  %v8013_v2 = vld [vmem:[%s7972_s13 + $0x98] sm:$0xff]  ;;  %4001 = vst.msk [vmem:[#allocation5 + $0x60] sm:$0xff] %vm744_vm2, %v8007_v25 }
 0x788   : >> { %4055 = vrot.lane.b32.xlu1 %v7979_v7, %s6112_s18  ;;  %4053 = vrot.lane.b32.xlu0 %v7982_v21, %s6112_s18  ;;  %v4102_v0 = vld [vmem:[%s7972_s13 + $0x2] sm:$0xff]  ;;  %v8016_v38 = vld [vmem:[%s7972_s13 + $0x38] sm:$0xff]  ;;  %3993 = vst.msk [vmem:[#allocation5 + $0x20] sm:$0xff] %vm744_vm2, %v8010_v16  ;;  %4002 = vst.msk [vmem:[#allocation5 + $0x68] sm:$0xff] %vm744_vm2, %v8013_v2 }
 0x789   : >> { %3994 = vst.msk [vmem:[#allocation5 + $0x28] sm:$0xff] %vm744_vm2, %v8016_v38  ;;  %v8030_v41 = vld [vmem:[%s7972_s13 + $0x6a] sm:$0xff]  ;;  %v3973_v28 = vld [vmem:[%s7972_s13] sm:$0xff]  ;;  %v5680_v43 = vld [vmem:[%s7972_s13 + $0x92] sm:$0xff]  ;;  %5868 = vmatpush3.msk.msra.mxu0 %vm1693_vm4, %v7857_v23  ;;  %5934 = vmatpush3.msk.msra.mxu1 %vm1693_vm4, %v7857_v23 }
 0x78a   : >> { %v4103_v19 = vld [vmem:[%s7972_s13 + $0xa] sm:$0xff]  ;;  %3989 = vst.msk [vmem:[#allocation5] sm:$0xff] %vm744_vm2, %v3973_v28  ;;  %v8050_v5 = vld [vmem:[%s7972_s13 + $0x60] sm:$0xff]  ;;  %v5672_v51 = vld [vmem:[%s7972_s13 + $0x32] sm:$0xff] }
 0x78b   : >> { %v3974_v49 = vld [vmem:[%s7972_s13 + $0x8] sm:$0xff]  ;;  %3997 = vst.msk [vmem:[#allocation5 + $0x40] sm:$0xff] %vm744_vm2, %v8050_v5  ;;  %v8061_v11 = vld [vmem:[%s7972_s13 + $0xb0] sm:$0xff]  ;;  %v8077_v61 = vld [vmem:[%s7972_s13 + $0x79] sm:$0xff] }
 0x78c   : >> { %4150 = vrot.lane.b32.xlu1 %v8003_v3, %s6113_s19  ;;  %4134 = vrot.lane.b32.xlu0 %v4102_v0, %s6113_s19  ;;  %3990 = vst.msk [vmem:[#allocation5 + $0x8] sm:$0xff] %vm744_vm2, %v3974_v49  ;;  %v8037_v57 = vld [vmem:[%s7972_s13 + $0xa8] sm:$0xff]  ;;  %v8064_v15 = vld [vmem:[%s7972_s13 + $0x50] sm:$0xff]  ;;  %4004 = vst.msk [vmem:[#allocation5 + $0x78] sm:$0xff] %vm744_vm2, %v8061_v11 }
 0x78d   : >> { %v8040_v29 = vld [vmem:[%s7972_s13 + $0x48] sm:$0xff]  ;;  %4003 = vst.msk [vmem:[#allocation5 + $0x70] sm:$0xff] %vm744_vm2, %v8037_v57  ;;  %3996 = vst.msk [vmem:[#allocation5 + $0x38] sm:$0xff] %vm744_vm2, %v8064_v15  ;;  %v5606_v24 = vld [vmem:[%s7972_s13 + $0x19] sm:$0xff] }
 0x78e   : >> { %v8047_v12 = vld [vmem:[%s7972_s13 + $0x68] sm:$0xff]  ;;  %3995 = vst.msk [vmem:[#allocation5 + $0x30] sm:$0xff] %vm744_vm2, %v8040_v29  ;;  %v8094_v32 = vld [vmem:[%s7972_s13 + $0x7a] sm:$0xff]  ;;  %v5664_v37 = vld [vmem:[%s7972_s13 + $0x91] sm:$0xff] }
 0x78f   : >> { %3998 = vst.msk [vmem:[#allocation5 + $0x48] sm:$0xff] %vm744_vm2, %v8047_v12  ;;  %v8087_v14 = vld [vmem:[%s7972_s13 + $0x81] sm:$0xff]  ;;  %v5656_v47 = vld [vmem:[%s7972_s13 + $0x31] sm:$0xff]  ;;  %v5665_v31 = vld [vmem:[%s7972_s13 + $0x99] sm:$0xff] }
 0x790   : >> { %4152 = vrot.lane.b32.xlu1 %v8030_v41, %s6113_s19  ;;  %4136 = vrot.lane.b32.xlu0 %v4103_v19, %s6113_s19  ;;  %v5607_v18 = vld [vmem:[%s7972_s13 + $0x21] sm:$0xff]  ;;  %v5657_v50 = vld [vmem:[%s7972_s13 + $0x39] sm:$0xff] }
 0x791   : >> { %v5622_v35 = vld [vmem:[%s7972_s13 + $0x1a] sm:$0xff]  ;;  %v8107_v30 = vld [vmem:[%s7972_s13 + $0x82] sm:$0xff]  ;;  %v5667_v34 = vld [vmem:[%s7972_s13 + $0xb1] sm:$0xff] }
 0x792   : >> { %v5623_v26 = vld [vmem:[%s7972_s13 + $0x22] sm:$0xff]  ;;  %v5681_v55 = vld [vmem:[%s7972_s13 + $0x9a] sm:$0xff]  ;;  %v5659_v42 = vld [vmem:[%s7972_s13 + $0x51] sm:$0xff] }
 0x793   : >> { %v5673_v52 = vld [vmem:[%s7972_s13 + $0x3a] sm:$0xff]  ;;  %v5666_v17 = vld [vmem:[%s7972_s13 + $0xa9] sm:$0xff] }
 0x794   : >> { %4250 = vrot.lane.b32.xlu1 %v7985_v53, %s6114_s22  ;;  %4234 = vrot.lane.b32.xlu0 %v5590_v46, %s6114_s22  ;;  %v5658_v54 = vld [vmem:[%s7972_s13 + $0x49] sm:$0xff]  ;;  %v5027_v27 = vld [vmem:[%s6204_s16 + $0x18] sm:$0xff] (%p3966_p11) }
 0x795   : >> { %v5682_v0 = vld [vmem:[%s7972_s13 + $0xaa] sm:$0xff]  ;;  %v5028_v39 = vld [vmem:[%s6204_s16 + $0x20] sm:$0xff] (%p3966_p11) }
 0x798   : >> { %4252 = vrot.lane.b32.xlu1 %v7989_v56, %s6114_s22  ;;  %4236 = vrot.lane.b32.xlu0 %v5591_v1, %s6114_s22 }
 0x79c   : >> { %4347 = vrot.lane.b32.xlu1 %v8077_v61, %s6115_s24  ;;  %4331 = vrot.lane.b32.xlu0 %v5606_v24, %s6115_s24 }
 0x7a0   : >> { %4057 = vrot.lane.b32.xlu1 %v8077_v61, %s6112_s18  ;;  %4041 = vrot.lane.b32.xlu0 %v5606_v24, %s6112_s18 }
 0x7a4   : >> { %4349 = vrot.lane.b32.xlu1 %v8087_v14, %s6115_s24  ;;  %4333 = vrot.lane.b32.xlu0 %v5607_v18, %s6115_s24 }
 0x7a8   : >> { %4444 = vrot.lane.b32.xlu1 %v8094_v32, %s6116_s25  ;;  %4428 = vrot.lane.b32.xlu0 %v5622_v35, %s6116_s25 }
 0x7ac   : >> { %4059 = vrot.lane.b32.xlu1 %v8087_v14, %s6112_s18  ;;  %4043 = vrot.lane.b32.xlu0 %v5607_v18, %s6112_s18 }
 0x7b0   : >> { %4154 = vrot.lane.b32.xlu1 %v8094_v32, %s6113_s19  ;;  %4138 = vrot.lane.b32.xlu0 %v5622_v35, %s6113_s19 }
 0x7b4   : >> { %4446 = vrot.lane.b32.xlu1 %v8107_v30, %s6116_s25  ;;  %4430 = vrot.lane.b32.xlu0 %v5623_v26, %s6116_s25 }
 0x7b8   : >> { %4544 = vrot.lane.b32.xlu1 %v8007_v25, %s6117_s26  ;;  %4528 = vrot.lane.b32.xlu0 %v8010_v16, %s6117_s26 }
 0x7bc   : >> { %4156 = vrot.lane.b32.xlu1 %v8107_v30, %s6113_s19  ;;  %4140 = vrot.lane.b32.xlu0 %v5623_v26, %s6113_s19 }
 0x7c0   : >> { %4254 = vrot.lane.b32.xlu1 %v8007_v25, %s6114_s22  ;;  %4238 = vrot.lane.b32.xlu0 %v8010_v16, %s6114_s22  ;;  %v5674_v25 = vld [vmem:[%s7972_s13 + $0x4a] sm:$0xff] }
 0x7c4   : >> { %4546 = vrot.lane.b32.xlu1 %v8013_v2, %s6117_s26  ;;  %4530 = vrot.lane.b32.xlu0 %v8016_v38, %s6117_s26 }
 0x7c8   : >> { %4641 = vrot.lane.b32.xlu1 %v5664_v37, %s6118_s28  ;;  %4625 = vrot.lane.b32.xlu0 %v5656_v47, %s6118_s28 }
 0x7cc   : >> { %4256 = vrot.lane.b32.xlu1 %v8013_v2, %s6114_s22  ;;  %4240 = vrot.lane.b32.xlu0 %v8016_v38, %s6114_s22 }
 0x7d0   : >> { %4351 = vrot.lane.b32.xlu1 %v5664_v37, %s6115_s24  ;;  %4335 = vrot.lane.b32.xlu0 %v5656_v47, %s6115_s24 }
 0x7d4   : >> { %4643 = vrot.lane.b32.xlu1 %v5665_v31, %s6118_s28  ;;  %4627 = vrot.lane.b32.xlu0 %v5657_v50, %s6118_s28 }
 0x7d8   : >> { %4738 = vrot.lane.b32.xlu1 %v5680_v43, %s6119_s14  ;;  %4722 = vrot.lane.b32.xlu0 %v5672_v51, %s6119_s14 }
 0x7dc   : >> { %4061 = vrot.lane.b32.xlu1 %v5664_v37, %s6112_s18  ;;  %4045 = vrot.lane.b32.xlu0 %v5656_v47, %s6112_s18 }
 0x7e0   : >> { %4353 = vrot.lane.b32.xlu1 %v5665_v31, %s6115_s24  ;;  %4337 = vrot.lane.b32.xlu0 %v5657_v50, %s6115_s24 }
 0x7e4   : >> { %4448 = vrot.lane.b32.xlu1 %v5680_v43, %s6116_s25  ;;  %4432 = vrot.lane.b32.xlu0 %v5672_v51, %s6116_s25 }
 0x7e8   : >> { %4740 = vrot.lane.b32.xlu1 %v5681_v55, %s6119_s14  ;;  %4724 = vrot.lane.b32.xlu0 %v5673_v52, %s6119_s14 }
 0x7ec   : >> { %4063 = vrot.lane.b32.xlu1 %v5665_v31, %s6112_s18  ;;  %4047 = vrot.lane.b32.xlu0 %v5657_v50, %s6112_s18 }
 0x7f0   : >> { %4158 = vrot.lane.b32.xlu1 %v5680_v43, %s6113_s19  ;;  %4142 = vrot.lane.b32.xlu0 %v5672_v51, %s6113_s19  ;;  %v5652_v43 = vld [vmem:[%s7972_s13 + $0xc0] sm:$0xff] }
 0x7f4   : >> { %4450 = vrot.lane.b32.xlu1 %v5681_v55, %s6116_s25  ;;  %4434 = vrot.lane.b32.xlu0 %v5673_v52, %s6116_s25 }
 0x7f6   : >> { %v4040_v59 = vpop.permute.xlu1 %4039  ;;  %v4038_v60 = vpop.permute.xlu0 %4037 }
 0x7f7   : >> { %4087 = vst.msk [vmem:[#allocation5 + $0x8] sm:$0xff] %vm922_vm5, %v4040_v59  ;;  %4086 = vst.msk [vmem:[#allocation5] sm:$0xff] %vm922_vm5, %v4038_v60  ;;  %v5653_v60 = vld [vmem:[%s7972_s13 + $0xc8] sm:$0xff] }
 0x7f8   : >> { %4548 = vrot.lane.b32.xlu1 %v8037_v57, %s6117_s26  ;;  %4532 = vrot.lane.b32.xlu0 %v8040_v29, %s6117_s26 }
 0x7fa   : >> { %v4056_v63 = vpop.permute.xlu1 %4055  ;;  %v4054_v8 = vpop.permute.xlu0 %4053 }
 0x7fb   : >> { %4095 = vst.msk [vmem:[#allocation5 + $0x48] sm:$0xff] %vm922_vm5, %v4056_v63  ;;  %4094 = vst.msk [vmem:[#allocation5 + $0x40] sm:$0xff] %vm922_vm5, %v4054_v8 }
 0x7fc   : >> { %4160 = vrot.lane.b32.xlu1 %v5681_v55, %s6113_s19  ;;  %4144 = vrot.lane.b32.xlu0 %v5673_v52, %s6113_s19 }
 0x7fe   : >> { %v4151_v9 = vpop.permute.xlu1 %4150  ;;  %v4135_v10 = vpop.permute.xlu0 %4134 }
 0x7ff   : >> { %4191 = vst.msk [vmem:[#allocation5 + $0x40] sm:$0xff] %vm1019_vm6, %v4151_v9  ;;  %4183 = vst.msk [vmem:[#allocation5] sm:$0xff] %vm1019_vm6, %v4135_v10  ;;  %v5668_v9 = vld [vmem:[%s7972_s13 + $0xc1] sm:$0xff] }
 0x800   : >> { %4258 = vrot.lane.b32.xlu1 %v8037_v57, %s6114_s22  ;;  %4242 = vrot.lane.b32.xlu0 %v8040_v29, %s6114_s22 }
 0x802   : >> { %v4153_v48 = vpop.permute.xlu1 %4152  ;;  %v4137_v13 = vpop.permute.xlu0 %4136 }
 0x803   : >> { %4192 = vst.msk [vmem:[#allocation5 + $0x48] sm:$0xff] %vm1019_vm6, %v4153_v48  ;;  %4184 = vst.msk [vmem:[#allocation5 + $0x8] sm:$0xff] %vm1019_vm6, %v4137_v13 }
 0x804   : >> { %4550 = vrot.lane.b32.xlu1 %v8061_v11, %s6117_s26  ;;  %4534 = vrot.lane.b32.xlu0 %v8064_v15, %s6117_s26 }
 0x806   : >> { %v4251_v58 = vpop.permute.xlu1 %4250  ;;  %v4235_v20 = vpop.permute.xlu0 %4234 }
 0x807   : >> { %4291 = vst.msk [vmem:[#allocation5 + $0x40] sm:$0xff] %vm1119_vm7, %v4251_v58  ;;  %4283 = vst.msk [vmem:[#allocation5] sm:$0xff] %vm1119_vm7, %v4235_v20  ;;  %v5669_v58 = vld [vmem:[%s7972_s13 + $0xc9] sm:$0xff] }
 0x808   : >> { %4645 = vrot.lane.b32.xlu1 %v5666_v17, %s6118_s28  ;;  %4629 = vrot.lane.b32.xlu0 %v5658_v54, %s6118_s28 }
 0x80a   : >> { %v4253_v36 = vpop.permute.xlu1 %4252  ;;  %v4237_v44 = vpop.permute.xlu0 %4236 }
 0x80b   : >> { %4292 = vst.msk [vmem:[#allocation5 + $0x48] sm:$0xff] %vm1119_vm7, %v4253_v36  ;;  %4284 = vst.msk [vmem:[#allocation5 + $0x8] sm:$0xff] %vm1119_vm7, %v4237_v44 }
 0x80c   : >> { %4260 = vrot.lane.b32.xlu1 %v8061_v11, %s6114_s22  ;;  %4244 = vrot.lane.b32.xlu0 %v8064_v15, %s6114_s22  ;;  %v5683_v11 = vld [vmem:[%s7972_s13 + $0xb2] sm:$0xff] }
 0x80d   : >> { %v5675_v15 = vld [vmem:[%s7972_s13 + $0x52] sm:$0xff] }
 0x80e   : >> { %v4348_v45 = vpop.permute.xlu1 %4347  ;;  %v4332_v33 = vpop.permute.xlu0 %4331 }
 0x80f   : >> { %4388 = vst.msk [vmem:[#allocation5 + $0x40] sm:$0xff] %vm1216_vm8, %v4348_v45  ;;  %4380 = vst.msk [vmem:[#allocation5] sm:$0xff] %vm1216_vm8, %v4332_v33 }
 0x810   : >> { %4355 = vrot.lane.b32.xlu1 %v5666_v17, %s6115_s24  ;;  %4339 = vrot.lane.b32.xlu0 %v5658_v54, %s6115_s24 }
 0x812   : >> { %v4058_v46 = vpop.permute.xlu1 %4057  ;;  %v4042_v1 = vpop.permute.xlu0 %4041 }
 0x813   : >> { %4096 = vst.msk [vmem:[#allocation5 + $0x50] sm:$0xff] %vm922_vm5, %v4058_v46  ;;  %4088 = vst.msk [vmem:[#allocation5 + $0x10] sm:$0xff] %vm922_vm5, %v4042_v1 }
 0x814   : >> { %4647 = vrot.lane.b32.xlu1 %v5667_v34, %s6118_s28  ;;  %4631 = vrot.lane.b32.xlu0 %v5659_v42, %s6118_s28 }
 0x816   : >> { %v4350_v16 = vpop.permute.xlu1 %4349  ;;  %v4334_v2 = vpop.permute.xlu0 %4333 }
 0x817   : >> { %4389 = vst.msk [vmem:[#allocation5 + $0x48] sm:$0xff] %vm1216_vm8, %v4350_v16  ;;  %4381 = vst.msk [vmem:[#allocation5 + $0x8] sm:$0xff] %vm1216_vm8, %v4334_v2 }
 0x818   : >> { %4742 = vrot.lane.b32.xlu1 %v5682_v0, %s6119_s14  ;;  %4726 = vrot.lane.b32.xlu0 %v5674_v25, %s6119_s14 }
 0x81a   : >> { %v4445_v38 = vpop.permute.xlu1 %4444  ;;  %v4429_v19 = vpop.permute.xlu0 %4428 }
 0x81b   : >> { %4485 = vst.msk [vmem:[#allocation5 + $0x40] sm:$0xff] %vm1313_vm9, %v4445_v38  ;;  %4477 = vst.msk [vmem:[#allocation5] sm:$0xff] %vm1313_vm9, %v4429_v19  ;;  %v5654_v19 = vld [vmem:[%s7972_s13 + $0xd8] sm:$0xff] }
 0x81c   : >> { %4065 = vrot.lane.b32.xlu1 %v5666_v17, %s6112_s18  ;;  %4049 = vrot.lane.b32.xlu0 %v5658_v54, %s6112_s18 }
 0x81e   : >> { %v4060_v49 = vpop.permute.xlu1 %4059  ;;  %v4044_v28 = vpop.permute.xlu0 %4043 }
 0x81f   : >> { %4097 = vst.msk [vmem:[#allocation5 + $0x58] sm:$0xff] %vm922_vm5, %v4060_v49  ;;  %4089 = vst.msk [vmem:[#allocation5 + $0x18] sm:$0xff] %vm922_vm5, %v4044_v28 }
 0x820   : >> { %4357 = vrot.lane.b32.xlu1 %v5667_v34, %s6115_s24  ;;  %4341 = vrot.lane.b32.xlu0 %v5659_v42, %s6115_s24 }
 0x822   : >> { %v4155_v57 = vpop.permute.xlu1 %4154  ;;  %v4139_v29 = vpop.permute.xlu0 %4138 }
 0x823   : >> { %4193 = vst.msk [vmem:[#allocation5 + $0x50] sm:$0xff] %vm1019_vm6, %v4155_v57  ;;  %4185 = vst.msk [vmem:[#allocation5 + $0x10] sm:$0xff] %vm1019_vm6, %v4139_v29  ;;  %v5655_v57 = vld [vmem:[%s7972_s13 + $0xe0] sm:$0xff] }
 0x824   : >> { %4452 = vrot.lane.b32.xlu1 %v5682_v0, %s6116_s25  ;;  %4436 = vrot.lane.b32.xlu0 %v5674_v25, %s6116_s25 }
 0x826   : >> { %v4447_v24 = vpop.permute.xlu1 %4446  ;;  %v4431_v18 = vpop.permute.xlu0 %4430 }
 0x827   : >> { %4486 = vst.msk [vmem:[#allocation5 + $0x48] sm:$0xff] %vm1313_vm9, %v4447_v24  ;;  %4478 = vst.msk [vmem:[#allocation5 + $0x8] sm:$0xff] %vm1313_vm9, %v4431_v18 }
 0x828   : >> { %4744 = vrot.lane.b32.xlu1 %v5683_v11, %s6119_s14  ;;  %4728 = vrot.lane.b32.xlu0 %v5675_v15, %s6119_s14 }
 0x82a   : >> { %v4545_v35 = vpop.permute.xlu1 %4544  ;;  %v4529_v26 = vpop.permute.xlu0 %4528 }
 0x82b   : >> { %4585 = vst.msk [vmem:[#allocation5 + $0x40] sm:$0xff] %vm1413_vm10, %v4545_v35  ;;  %4577 = vst.msk [vmem:[#allocation5] sm:$0xff] %vm1413_vm10, %v4529_v26 }
 0x82c   : >> { %4067 = vrot.lane.b32.xlu1 %v5667_v34, %s6112_s18  ;;  %4051 = vrot.lane.b32.xlu0 %v5659_v42, %s6112_s18 }
 0x82e   : >> { %v4157_v37 = vpop.permute.xlu1 %4156  ;;  %v4141_v47 = vpop.permute.xlu0 %4140 }
 0x82f   : >> { %4194 = vst.msk [vmem:[#allocation5 + $0x58] sm:$0xff] %vm1019_vm6, %v4157_v37  ;;  %4186 = vst.msk [vmem:[#allocation5 + $0x18] sm:$0xff] %vm1019_vm6, %v4141_v47 }
 0x830   : >> { %4162 = vrot.lane.b32.xlu1 %v5682_v0, %s6113_s19  ;;  %4146 = vrot.lane.b32.xlu0 %v5674_v25, %s6113_s19  ;;  %v5685_v0 = vld [vmem:[%s7972_s13 + $0xca] sm:$0xff] }
 0x832   : >> { %v4255_v31 = vpop.permute.xlu1 %4254  ;;  %v4239_v50 = vpop.permute.xlu0 %4238 }
 0x833   : >> { %4293 = vst.msk [vmem:[#allocation5 + $0x50] sm:$0xff] %vm1119_vm7, %v4255_v31  ;;  %4285 = vst.msk [vmem:[#allocation5 + $0x10] sm:$0xff] %vm1119_vm7, %v4239_v50 }
 0x834   : >> { %4454 = vrot.lane.b32.xlu1 %v5683_v11, %s6116_s25  ;;  %4438 = vrot.lane.b32.xlu0 %v5675_v15, %s6116_s25 }
 0x836   : >> { %v4547_v51 = vpop.permute.xlu1 %4546  ;;  %v4531_v62 = vpop.permute.xlu0 %4530 }
 0x837   : >> { %4586 = vst.msk [vmem:[#allocation5 + $0x48] sm:$0xff] %vm1413_vm10, %v4547_v51  ;;  %4578 = vst.msk [vmem:[#allocation5 + $0x8] sm:$0xff] %vm1413_vm10, %v4531_v62 }
 0x838   : >> { %4552 = vrot.lane.b32.xlu1 %v5652_v43, %s6117_s26  ;;  %4536 = vrot.lane.b32.xlu0 %v8050_v5, %s6117_s26 }
 0x83a   : >> { %v4642_v6 = vpop.permute.xlu1 %4641  ;;  %v4626_v55 = vpop.permute.xlu0 %4625 }
 0x83b   : >> { %4682 = vst.msk [vmem:[#allocation5 + $0x40] sm:$0xff] %vm1510_vm11, %v4642_v6  ;;  %4674 = vst.msk [vmem:[#allocation5] sm:$0xff] %vm1510_vm11, %v4626_v55 }
 0x83c   : >> { %4164 = vrot.lane.b32.xlu1 %v5683_v11, %s6113_s19  ;;  %4148 = vrot.lane.b32.xlu0 %v5675_v15, %s6113_s19 }
 0x83e   : >> { %v4257_v52 = vpop.permute.xlu1 %4256  ;;  %v4241_v59 = vpop.permute.xlu0 %4240 }
 0x83f   : >> { %4294 = vst.msk [vmem:[#allocation5 + $0x58] sm:$0xff] %vm1119_vm7, %v4257_v52  ;;  %4286 = vst.msk [vmem:[#allocation5 + $0x18] sm:$0xff] %vm1119_vm7, %v4241_v59 }
 0x840   : >> { %4262 = vrot.lane.b32.xlu1 %v5652_v43, %s6114_s22  ;;  %4246 = vrot.lane.b32.xlu0 %v8050_v5, %s6114_s22 }
 0x842   : >> { %v4352_v63 = vpop.permute.xlu1 %4351  ;;  %v4336_v8 = vpop.permute.xlu0 %4335 }
 0x843   : >> { %4390 = vst.msk [vmem:[#allocation5 + $0x50] sm:$0xff] %vm1216_vm8, %v4352_v63  ;;  %4382 = vst.msk [vmem:[#allocation5 + $0x10] sm:$0xff] %vm1216_vm8, %v4336_v8 }
 0x844   : >> { %4554 = vrot.lane.b32.xlu1 %v5653_v60, %s6117_s26  ;;  %4538 = vrot.lane.b32.xlu0 %v8047_v12, %s6117_s26 }
 0x846   : >> { %v4644_v10 = vpop.permute.xlu1 %4643  ;;  %v4628_v48 = vpop.permute.xlu0 %4627 }
 0x847   : >> { %4683 = vst.msk [vmem:[#allocation5 + $0x48] sm:$0xff] %vm1510_vm11, %v4644_v10  ;;  %4675 = vst.msk [vmem:[#allocation5 + $0x8] sm:$0xff] %vm1510_vm11, %v4628_v48 }
 0x848   : >> { %4649 = vrot.lane.b32.xlu1 %v5668_v9, %s6118_s28  ;;  %4633 = vrot.lane.b32.xlu0 %v7982_v21, %s6118_s28 }
 0x84a   : >> { %v4739_v5 = vpop.permute.xlu1 %4738  ;;  %v4723_v13 = vpop.permute.xlu0 %4722 }
 0x84b   : >> { %4779 = vst.msk [vmem:[#allocation5 + $0x40] sm:$0xff] %vm1607_vm12, %v4739_v5  ;;  %4771 = vst.msk [vmem:[#allocation5] sm:$0xff] %vm1607_vm12, %v4723_v13 }
 0x84c   : >> { %4264 = vrot.lane.b32.xlu1 %v5653_v60, %s6114_s22  ;;  %4248 = vrot.lane.b32.xlu0 %v8047_v12, %s6114_s22  ;;  %v5684_v12 = vld [vmem:[%s7972_s13 + $0xc2] sm:$0xff] }
 0x84e   : >> { %v4062_v17 = vpop.permute.xlu1 %4061  ;;  %v4046_v54 = vpop.permute.xlu0 %4045 }
 0x84f   : >> { %4098 = vst.msk [vmem:[#allocation5 + $0x60] sm:$0xff] %vm922_vm5, %v4062_v17  ;;  %4090 = vst.msk [vmem:[#allocation5 + $0x20] sm:$0xff] %vm922_vm5, %v4046_v54 }
 0x850   : >> { %4359 = vrot.lane.b32.xlu1 %v5668_v9, %s6115_s24  ;;  %4343 = vrot.lane.b32.xlu0 %v7982_v21, %s6115_s24 }
 0x852   : >> { %v4354_v20 = vpop.permute.xlu1 %4353  ;;  %v4338_v36 = vpop.permute.xlu0 %4337  ;;  %v4787_v44 = vld [vmem:[#allocation5] sm:$0xff] }
 0x853   : >> { %v4795_v45 = vld [vmem:[#allocation5 + $0x40] sm:$0xff]  ;;  %4391 = vst.msk [vmem:[#allocation5 + $0x58] sm:$0xff] %vm1216_vm8, %v4354_v20  ;;  %4383 = vst.msk [vmem:[#allocation5 + $0x18] sm:$0xff] %vm1216_vm8, %v4338_v36  ;;  %5869 = vmatprep.mubr.msk.f32.mxu0 %vm1644_vm13, %v4787_v44 }
 0x854   : >> { %5881 = vmatprep.mubr.msk.f32.mxu1 %vm1644_vm13, %v4795_v45  ;;  %4651 = vrot.lane.b32.xlu1 %v5669_v58, %s6118_s28 }
 0x855   : >> { %4635 = vrot.lane.b32.xlu0 %v7979_v7, %s6118_s28 }
 0x856   : >> { %v4449_v21 = vpop.permute.xlu1 %4448  ;;  %v4433_v33 = vpop.permute.xlu0 %4432 }
 0x857   : >> { %4487 = vst.msk [vmem:[#allocation5 + $0x50] sm:$0xff] %vm1313_vm9, %v4449_v21  ;;  %4479 = vst.msk [vmem:[#allocation5 + $0x10] sm:$0xff] %vm1313_vm9, %v4433_v33 }
 0x858   : >> { %4746 = vrot.lane.b32.xlu1 %v5684_v12, %s6119_s14 }
 0x859   : >> { %4730 = vrot.lane.b32.xlu0 %v8003_v3, %s6119_s14 }
 0x85a   : >> { %v4741_v34 = vpop.permute.xlu1 %4740  ;;  %v4725_v42 = vpop.permute.xlu0 %4724 }
 0x85b   : >> { %4780 = vst.msk [vmem:[#allocation5 + $0x48] sm:$0xff] %vm1607_vm12, %v4741_v34  ;;  %4772 = vst.msk [vmem:[#allocation5 + $0x8] sm:$0xff] %vm1607_vm12, %v4725_v42 }
 0x85c   : >> { %4361 = vrot.lane.b32.xlu1 %v5669_v58, %s6115_s24 }
 0x85d   : >> { %4345 = vrot.lane.b32.xlu0 %v7979_v7, %s6115_s24 }
 0x85e   : >> { %v4064_v46 = vpop.permute.xlu1 %4063  ;;  %v4048_v1 = vpop.permute.xlu0 %4047 }
 0x85f   : >> { %4099 = vst.msk [vmem:[#allocation5 + $0x68] sm:$0xff] %vm922_vm5, %v4064_v46  ;;  %4091 = vst.msk [vmem:[#allocation5 + $0x28] sm:$0xff] %vm922_vm5, %v4048_v1 }
 0x860   : >> { %4456 = vrot.lane.b32.xlu1 %v5684_v12, %s6116_s25 }
 0x861   : >> { %4440 = vrot.lane.b32.xlu0 %v8003_v3, %s6116_s25 }
 0x862   : >> { %v4159_v25 = vpop.permute.xlu1 %4158  ;;  %v4143_v16 = vpop.permute.xlu0 %4142  ;;  %v4788_v2 = vld [vmem:[#allocation5 + $0x8] sm:$0xff] }
 0x863   : >> { %v4796_v38 = vld [vmem:[#allocation5 + $0x48] sm:$0xff]  ;;  %4195 = vst.msk [vmem:[#allocation5 + $0x60] sm:$0xff] %vm1019_vm6, %v4159_v25  ;;  %4187 = vst.msk [vmem:[#allocation5 + $0x20] sm:$0xff] %vm1019_vm6, %v4143_v16  ;;  %5870 = vmatmul.mubr.msk.f32.vlgmr.msra.gmra.mrb[0].mxu0 %vm1644_vm13, %v4788_v2 }
 0x864   : >> { %5882 = vmatmul.mubr.msk.f32.vlgmr.msra.gmra.mrb[0].mxu1 %vm1644_vm13, %v4796_v38  ;;  %4748 = vrot.lane.b32.xlu1 %v5685_v0, %s6119_s14 }
 0x865   : >> { %4732 = vrot.lane.b32.xlu0 %v8030_v41, %s6119_s14 }
 0x866   : >> { %v4451_v7 = vpop.permute.xlu1 %4450  ;;  %v4435_v3 = vpop.permute.xlu0 %4434 }
 0x867   : >> { %4488 = vst.msk [vmem:[#allocation5 + $0x58] sm:$0xff] %vm1313_vm9, %v4451_v7  ;;  %4480 = vst.msk [vmem:[#allocation5 + $0x18] sm:$0xff] %vm1313_vm9, %v4435_v3 }
 0x868   : >> { %4458 = vrot.lane.b32.xlu1 %v5685_v0, %s6116_s25 }
 0x869   : >> { %4442 = vrot.lane.b32.xlu0 %v8030_v41, %s6116_s25  ;;  %v5670_v41 = vld [vmem:[%s7972_s13 + $0xd9] sm:$0xff] }
 0x86a   : >> { %v4549_v49 = vpop.permute.xlu1 %4548  ;;  %v4533_v28 = vpop.permute.xlu0 %4532 }
 0x86b   : >> { %4587 = vst.msk [vmem:[#allocation5 + $0x50] sm:$0xff] %vm1413_vm10, %v4549_v49  ;;  %4579 = vst.msk [vmem:[#allocation5 + $0x10] sm:$0xff] %vm1413_vm10, %v4533_v28 }
 0x86c   : >> { %4556 = vrot.lane.b32.xlu1 %v5654_v19, %s6117_s26 }
 0x86d   : >> { %4540 = vrot.lane.b32.xlu0 %v7985_v53, %s6117_s26  ;;  %v5671_v53 = vld [vmem:[%s7972_s13 + $0xe1] sm:$0xff] }
 0x86e   : >> { %v4161_v29 = vpop.permute.xlu1 %4160  ;;  %v4145_v11 = vpop.permute.xlu0 %4144 }
 0x86f   : >> { %4196 = vst.msk [vmem:[#allocation5 + $0x68] sm:$0xff] %vm1019_vm6, %v4161_v29  ;;  %4188 = vst.msk [vmem:[#allocation5 + $0x28] sm:$0xff] %vm1019_vm6, %v4145_v11 }
 0x870   : >> { %4558 = vrot.lane.b32.xlu1 %v5655_v57, %s6117_s26 }
 0x871   : >> { %4542 = vrot.lane.b32.xlu0 %v7989_v56, %s6117_s26  ;;  %v5686_v56 = vld [vmem:[%s7972_s13 + $0xda] sm:$0xff] }
 0x872   : >> { %v4259_v15 = vpop.permute.xlu1 %4258  ;;  %v4243_v24 = vpop.permute.xlu0 %4242 }
 0x873   : >> { %4295 = vst.msk [vmem:[#allocation5 + $0x60] sm:$0xff] %vm1119_vm7, %v4259_v15  ;;  %4287 = vst.msk [vmem:[#allocation5 + $0x20] sm:$0xff] %vm1119_vm7, %v4243_v24 }
 0x874   : >> { %4653 = vrot.lane.b32.xlu1 %v5670_v41, %s6118_s28 }
 0x875   : >> { %4637 = vrot.lane.b32.xlu0 %v8077_v61, %s6118_s28  ;;  %v5687_v61 = vld [vmem:[%s7972_s13 + $0xe2] sm:$0xff] }
 0x876   : >> { %v4551_v18 = vpop.permute.xlu1 %4550  ;;  %v4535_v35 = vpop.permute.xlu0 %4534 }
 0x877   : >> { %4588 = vst.msk [vmem:[#allocation5 + $0x58] sm:$0xff] %vm1413_vm10, %v4551_v18  ;;  %4580 = vst.msk [vmem:[#allocation5 + $0x18] sm:$0xff] %vm1413_vm10, %v4535_v35 }
 0x878   : >> { %4655 = vrot.lane.b32.xlu1 %v5671_v53, %s6118_s28 }
 0x879   : >> { %4639 = vrot.lane.b32.xlu0 %v8087_v14, %s6118_s28 }
 0x87a   : >> { %v4646_v26 = vpop.permute.xlu1 %4645  ;;  %v4630_v37 = vpop.permute.xlu0 %4629 }
 0x87b   : >> { %4684 = vst.msk [vmem:[#allocation5 + $0x50] sm:$0xff] %vm1510_vm11, %v4646_v26  ;;  %4676 = vst.msk [vmem:[#allocation5 + $0x10] sm:$0xff] %vm1510_vm11, %v4630_v37 }
 0x87c   : >> { %4750 = vrot.lane.b32.xlu1 %v5686_v56, %s6119_s14 }
 0x87d   : >> { %4734 = vrot.lane.b32.xlu0 %v8094_v32, %s6119_s14 }
 0x87e   : >> { %v4261_v47 = vpop.permute.xlu1 %4260  ;;  %v4245_v31 = vpop.permute.xlu0 %4244 }
 0x87f   : >> { %4296 = vst.msk [vmem:[#allocation5 + $0x68] sm:$0xff] %vm1119_vm7, %v4261_v47  ;;  %4288 = vst.msk [vmem:[#allocation5 + $0x28] sm:$0xff] %vm1119_vm7, %v4245_v31 }
 0x880   : >> { %4752 = vrot.lane.b32.xlu1 %v5687_v61, %s6119_s14 }
 0x881   : >> { %4736 = vrot.lane.b32.xlu0 %v8107_v30, %s6119_s14 }
 0x882   : >> { %v4356_v14 = vpop.permute.xlu1 %4355  ;;  %v4340_v50 = vpop.permute.xlu0 %4339 }
 0x883   : >> { %4392 = vst.msk [vmem:[#allocation5 + $0x60] sm:$0xff] %vm1216_vm8, %v4356_v14  ;;  %4384 = vst.msk [vmem:[#allocation5 + $0x20] sm:$0xff] %vm1216_vm8, %v4340_v50 }
 0x886   : >> { %v4648_v43 = vpop.permute.xlu1 %4647  ;;  %v4632_v32 = vpop.permute.xlu0 %4631 }
 0x887   : >> { %4685 = vst.msk [vmem:[#allocation5 + $0x58] sm:$0xff] %vm1510_vm11, %v4648_v43  ;;  %4677 = vst.msk [vmem:[#allocation5 + $0x18] sm:$0xff] %vm1510_vm11, %v4632_v32 }
 0x88a   : >> { %v4743_v51 = vpop.permute.xlu1 %4742  ;;  %v4727_v62 = vpop.permute.xlu0 %4726 }
 0x88b   : >> { %4781 = vst.msk [vmem:[#allocation5 + $0x50] sm:$0xff] %vm1607_vm12, %v4743_v51  ;;  %4773 = vst.msk [vmem:[#allocation5 + $0x10] sm:$0xff] %vm1607_vm12, %v4727_v62 }
 0x88e   : >> { %v4066_v6 = vpop.permute.xlu1 %4065  ;;  %v4050_v30 = vpop.permute.xlu0 %4049 }
 0x88f   : >> { %4100 = vst.msk [vmem:[#allocation5 + $0x70] sm:$0xff] %vm922_vm5, %v4066_v6  ;;  %4092 = vst.msk [vmem:[#allocation5 + $0x30] sm:$0xff] %vm922_vm5, %v4050_v30 }
 0x892   : >> { %v4358_v55 = vpop.permute.xlu1 %4357  ;;  %v4342_v52 = vpop.permute.xlu0 %4341  ;;  %v4789_v59 = vld [vmem:[#allocation5 + $0x10] sm:$0xff] }
 0x893   : >> { %v4797_v60 = vld [vmem:[#allocation5 + $0x50] sm:$0xff]  ;;  %4393 = vst.msk [vmem:[#allocation5 + $0x68] sm:$0xff] %vm1216_vm8, %v4358_v55  ;;  %4385 = vst.msk [vmem:[#allocation5 + $0x28] sm:$0xff] %vm1216_vm8, %v4342_v52  ;;  %5872 = vmatprep.mubr.msk.f32.mxu0 %vm1644_vm13, %v4789_v59 }
 0x894   : >> { %5884 = vmatprep.mubr.msk.f32.mxu1 %vm1644_vm13, %v4797_v60 }
 0x896   : >> { %v4453_v63 = vpop.permute.xlu1 %4452  ;;  %v4437_v8 = vpop.permute.xlu0 %4436 }
 0x897   : >> { %4489 = vst.msk [vmem:[#allocation5 + $0x60] sm:$0xff] %vm1313_vm9, %v4453_v63  ;;  %4481 = vst.msk [vmem:[#allocation5 + $0x20] sm:$0xff] %vm1313_vm9, %v4437_v8 }
 0x89a   : >> { %v4745_v9 = vpop.permute.xlu1 %4744  ;;  %v4729_v10 = vpop.permute.xlu0 %4728 }
 0x89b   : >> { %4782 = vst.msk [vmem:[#allocation5 + $0x58] sm:$0xff] %vm1607_vm12, %v4745_v9  ;;  %4774 = vst.msk [vmem:[#allocation5 + $0x18] sm:$0xff] %vm1607_vm12, %v4729_v10 }
 0x89e   : >> { %v4068_v48 = vpop.permute.xlu1 %4067  ;;  %v4052_v5 = vpop.permute.xlu0 %4051 }
 0x89f   : >> { %4101 = vst.msk [vmem:[#allocation5 + $0x78] sm:$0xff] %vm922_vm5, %v4068_v48  ;;  %4093 = vst.msk [vmem:[#allocation5 + $0x38] sm:$0xff] %vm922_vm5, %v4052_v5 }
 0x8a2   : >> { %v4163_v13 = vpop.permute.xlu1 %4162  ;;  %v4147_v17 = vpop.permute.xlu0 %4146  ;;  %v4790_v54 = vld [vmem:[#allocation5 + $0x18] sm:$0xff] }
 0x8a3   : >> { %v4798_v58 = vld [vmem:[#allocation5 + $0x58] sm:$0xff]  ;;  %4197 = vst.msk [vmem:[#allocation5 + $0x70] sm:$0xff] %vm1019_vm6, %v4163_v13  ;;  %4189 = vst.msk [vmem:[#allocation5 + $0x30] sm:$0xff] %vm1019_vm6, %v4147_v17  ;;  %5873 = vmatmul.mubr.msk.f32.gmra.mrb[2].mxu0 %vm1644_vm13, %v4790_v54 }
 0x8a4   : >> { %5885 = vmatmul.mubr.msk.f32.gmra.mrb[2].mxu1 %vm1644_vm13, %v4798_v58 }
 0x8a6   : >> { %v4455_v20 = vpop.permute.xlu1 %4454  ;;  %v4439_v36 = vpop.permute.xlu0 %4438 }
 0x8a7   : >> { %4490 = vst.msk [vmem:[#allocation5 + $0x68] sm:$0xff] %vm1313_vm9, %v4455_v20  ;;  %4482 = vst.msk [vmem:[#allocation5 + $0x28] sm:$0xff] %vm1313_vm9, %v4439_v36 }
 0x8aa   : >> { %v4553_v44 = vpop.permute.xlu1 %4552  ;;  %v4537_v45 = vpop.permute.xlu0 %4536 }
 0x8ab   : >> { %4589 = vst.msk [vmem:[#allocation5 + $0x60] sm:$0xff] %vm1413_vm10, %v4553_v44  ;;  %4581 = vst.msk [vmem:[#allocation5 + $0x20] sm:$0xff] %vm1413_vm10, %v4537_v45 }
 0x8ae   : >> { %v4165_v12 = vpop.permute.xlu1 %4164  ;;  %v4149_v21 = vpop.permute.xlu0 %4148 }
 0x8af   : >> { %4198 = vst.msk [vmem:[#allocation5 + $0x78] sm:$0xff] %vm1019_vm6, %v4165_v12  ;;  %4190 = vst.msk [vmem:[#allocation5 + $0x38] sm:$0xff] %vm1019_vm6, %v4149_v21 }
 0x8b2   : >> { %v4263_v33 = vpop.permute.xlu1 %4262  ;;  %v4247_v34 = vpop.permute.xlu0 %4246 }
 0x8b3   : >> { %4297 = vst.msk [vmem:[#allocation5 + $0x70] sm:$0xff] %vm1119_vm7, %v4263_v33  ;;  %4289 = vst.msk [vmem:[#allocation5 + $0x30] sm:$0xff] %vm1119_vm7, %v4247_v34 }
 0x8b6   : >> { %v4555_v42 = vpop.permute.xlu1 %4554  ;;  %v4539_v46 = vpop.permute.xlu0 %4538 }
 0x8b7   : >> { %4590 = vst.msk [vmem:[#allocation5 + $0x68] sm:$0xff] %vm1413_vm10, %v4555_v42  ;;  %4582 = vst.msk [vmem:[#allocation5 + $0x28] sm:$0xff] %vm1413_vm10, %v4539_v46 }
 0x8ba   : >> { %v4650_v1 = vpop.permute.xlu1 %4649  ;;  %v4634_v0 = vpop.permute.xlu0 %4633 }
 0x8bb   : >> { %4686 = vst.msk [vmem:[#allocation5 + $0x60] sm:$0xff] %vm1510_vm11, %v4650_v1  ;;  %4678 = vst.msk [vmem:[#allocation5 + $0x20] sm:$0xff] %vm1510_vm11, %v4634_v0 }
 0x8be   : >> { %v4265_v25 = vpop.permute.xlu1 %4264  ;;  %v4249_v16 = vpop.permute.xlu0 %4248 }
 0x8bf   : >> { %4298 = vst.msk [vmem:[#allocation5 + $0x78] sm:$0xff] %vm1119_vm7, %v4265_v25  ;;  %4290 = vst.msk [vmem:[#allocation5 + $0x38] sm:$0xff] %vm1119_vm7, %v4249_v16 }
 0x8c2   : >> { %v4360_v2 = vpop.permute.xlu1 %4359  ;;  %v4344_v38 = vpop.permute.xlu0 %4343 }
 0x8c3   : >> { %4394 = vst.msk [vmem:[#allocation5 + $0x70] sm:$0xff] %vm1216_vm8, %v4360_v2  ;;  %4386 = vst.msk [vmem:[#allocation5 + $0x30] sm:$0xff] %vm1216_vm8, %v4344_v38 }
 0x8c6   : >> { %v4652_v7 = vpop.permute.xlu1 %4651 }
 0x8c7   : >> { %v4636_v3 = vpop.permute.xlu0 %4635  ;;  %4687 = vst.msk [vmem:[#allocation5 + $0x68] sm:$0xff] %vm1510_vm11, %v4652_v7 }
 0x8c8   : >> { %4679 = vst.msk [vmem:[#allocation5 + $0x28] sm:$0xff] %vm1510_vm11, %v4636_v3 }
 0x8ca   : >> { %v4747_v19 = vpop.permute.xlu1 %4746 }
 0x8cb   : >> { %v4731_v49 = vpop.permute.xlu0 %4730  ;;  %4783 = vst.msk [vmem:[#allocation5 + $0x60] sm:$0xff] %vm1607_vm12, %v4747_v19 }
 0x8cc   : >> { %4775 = vst.msk [vmem:[#allocation5 + $0x20] sm:$0xff] %vm1607_vm12, %v4731_v49 }
 0x8ce   : >> { %v4362_v28 = vpop.permute.xlu1 %4361 }
 0x8cf   : >> { %v4346_v57 = vpop.permute.xlu0 %4345  ;;  %4395 = vst.msk [vmem:[#allocation5 + $0x78] sm:$0xff] %vm1216_vm8, %v4362_v28 }
 0x8d0   : >> { %4387 = vst.msk [vmem:[#allocation5 + $0x38] sm:$0xff] %vm1216_vm8, %v4346_v57 }
 0x8d2   : >> { %v4457_v29 = vpop.permute.xlu1 %4456  ;;  %v4799_v15 = vld [vmem:[#allocation5 + $0x60] sm:$0xff] }
 0x8d3   : >> { %v4441_v11 = vpop.permute.xlu0 %4440  ;;  %v4791_v41 = vld [vmem:[#allocation5 + $0x20] sm:$0xff]  ;;  %4491 = vst.msk [vmem:[#allocation5 + $0x70] sm:$0xff] %vm1313_vm9, %v4457_v29  ;;  %5887 = vmatprep.mubr.msk.f32.mxu1 %vm1644_vm13, %v4799_v15  ;;  %v5024_v29 = vld [vmem:[%s6204_s16] sm:$0xff] (%p3966_p11) }
 0x8d4   : >> { %4483 = vst.msk [vmem:[#allocation5 + $0x30] sm:$0xff] %vm1313_vm9, %v4441_v11  ;;  %5875 = vmatprep.mubr.msk.f32.mxu0 %vm1644_vm13, %v4791_v41  ;;  %v5025_v41 = vld [vmem:[%s6204_s16 + $0x8] sm:$0xff] (%p3966_p11) }
 0x8d6   : >> { %v4749_v24 = vpop.permute.xlu1 %4748 }
 0x8d7   : >> { %v4733_v53 = vpop.permute.xlu0 %4732  ;;  %4784 = vst.msk [vmem:[#allocation5 + $0x68] sm:$0xff] %vm1607_vm12, %v4749_v24 }
 0x8d8   : >> { %4776 = vst.msk [vmem:[#allocation5 + $0x28] sm:$0xff] %vm1607_vm12, %v4733_v53  ;;  %v5026_v53 = vld [vmem:[%s6204_s16 + $0x10] sm:$0xff] (%p3966_p11) }
 0x8da   : >> { %v4459_v18 = vpop.permute.xlu1 %4458 }
 0x8db   : >> { %v4443_v35 = vpop.permute.xlu0 %4442  ;;  %4492 = vst.msk [vmem:[#allocation5 + $0x78] sm:$0xff] %vm1313_vm9, %v4459_v18 }
 0x8dc   : >> { %4484 = vst.msk [vmem:[#allocation5 + $0x38] sm:$0xff] %vm1313_vm9, %v4443_v35 }
 0x8de   : >> { %v4557_v56 = vpop.permute.xlu1 %4556  ;;  %v4800_v61 = vld [vmem:[#allocation5 + $0x68] sm:$0xff] }
 0x8df   : >> { %v4541_v26 = vpop.permute.xlu0 %4540  ;;  %v4792_v37 = vld [vmem:[#allocation5 + $0x28] sm:$0xff]  ;;  %4591 = vst.msk [vmem:[#allocation5 + $0x70] sm:$0xff] %vm1413_vm10, %v4557_v56  ;;  %5888 = vmatmul.mubr.msk.f32.gmra.mrb[4].mxu1 %vm1644_vm13, %v4800_v61 }
 0x8e0   : >> { %4583 = vst.msk [vmem:[#allocation5 + $0x30] sm:$0xff] %vm1413_vm10, %v4541_v26  ;;  %5876 = vmatmul.mubr.msk.f32.gmra.mrb[4].mxu0 %vm1644_vm13, %v4792_v37 }
 0x8e2   : >> { %v4559_v47 = vpop.permute.xlu1 %4558 }
 0x8e3   : >> { %v4543_v31 = vpop.permute.xlu0 %4542  ;;  %4592 = vst.msk [vmem:[#allocation5 + $0x78] sm:$0xff] %vm1413_vm10, %v4559_v47  ;;  %v5030_v47 = vld [vmem:[%s6204_s16 + $0x30] sm:$0xff] (%p3966_p11) }
 0x8e4   : >> { %4584 = vst.msk [vmem:[#allocation5 + $0x38] sm:$0xff] %vm1413_vm10, %v4543_v31 }
 0x8e6   : >> { %v4654_v14 = vpop.permute.xlu1 %4653 }
 0x8e7   : >> { %v4638_v50 = vpop.permute.xlu0 %4637  ;;  %4688 = vst.msk [vmem:[#allocation5 + $0x70] sm:$0xff] %vm1510_vm11, %v4654_v14  ;;  %v5031_v14 = vld [vmem:[%s6204_s16 + $0x38] sm:$0xff] (%p3966_p11) }
 0x8e8   : >> { %4680 = vst.msk [vmem:[#allocation5 + $0x30] sm:$0xff] %vm1510_vm11, %v4638_v50 }
 0x8ea   : >> { %v4656_v43 = vpop.permute.xlu1 %4655 }
 0x8eb   : >> { %v4640_v32 = vpop.permute.xlu0 %4639  ;;  %4689 = vst.msk [vmem:[#allocation5 + $0x78] sm:$0xff] %vm1510_vm11, %v4656_v43 }
 0x8ec   : >> { %4681 = vst.msk [vmem:[#allocation5 + $0x38] sm:$0xff] %vm1510_vm11, %v4640_v32  ;;  %v5032_v32 = vld [vmem:[%s6204_s16 + $0x40] sm:$0xff] (%p3966_p11) }
 0x8ee   : >> { %v4751_v51 = vpop.permute.xlu1 %4750 }
 0x8ef   : >> { %v4735_v62 = vpop.permute.xlu0 %4734  ;;  %4785 = vst.msk [vmem:[#allocation5 + $0x70] sm:$0xff] %vm1607_vm12, %v4751_v51 }
 0x8f0   : >> { %4777 = vst.msk [vmem:[#allocation5 + $0x30] sm:$0xff] %vm1607_vm12, %v4735_v62 }
 0x8f2   : >> { %v4753_v6 = vpop.permute.xlu1 %4752 }
 0x8f3   : >> { %v4737_v30 = vpop.permute.xlu0 %4736  ;;  %4786 = vst.msk [vmem:[#allocation5 + $0x78] sm:$0xff] %vm1607_vm12, %v4753_v6 }
 0x8f4   : >> { %4778 = vst.msk [vmem:[#allocation5 + $0x38] sm:$0xff] %vm1607_vm12, %v4737_v30  ;;  %v5033_v30 = vld [vmem:[%s6204_s16 + $0x48] sm:$0xff] (%p3966_p11) }
 0x8f6   : >> { %v4801_v52 = vld [vmem:[#allocation5 + $0x70] sm:$0xff] }
 0x8f7   : >> { %v4793_v55 = vld [vmem:[#allocation5 + $0x30] sm:$0xff]  ;;  %5890 = vmatprep.mubr.msk.f32.mxu1 %vm1644_vm13, %v4801_v52  ;;  %v5034_v52 = vld [vmem:[%s6204_s16 + $0x50] sm:$0xff] (%p3966_p11) }
 0x8f8   : >> { %5878 = vmatprep.mubr.msk.f32.mxu0 %vm1644_vm13, %v4793_v55 }
 0x8fa   : >> { %v4802_v60 = vld [vmem:[#allocation5 + $0x78] sm:$0xff] }
 0x8fb   : >> { %v4794_v59 = vld [vmem:[#allocation5 + $0x38] sm:$0xff]  ;;  %5891 = vmatmul.mubr.msk.f32.gmra.mrb[6].mxu1 %vm1644_vm13, %v4802_v60 }
 0x8fc   : >> { %5879 = vmatmul.mubr.msk.f32.gmra.mrb[6].mxu0 %vm1644_vm13, %v4794_v59 }
 0x936   : >> { %v5871_v63 = vpop.f32.mrb[0].mxu0 }
 0x937   : >> { %v5883_v8 = vpop.f32.mrb[0].mxu1  ;;  %v4933_v9 = vadd.f32 %v5871_v63, %v7862_v4  ;;  %v4927_v48 = vpop.f32.mrb[1].mxu0  ;;  %v5035_v63 = vld [vmem:[%s6204_s16 + $0x58] sm:$0xff] (%p3966_p11) }
 0x938   : >> { %v4973_v10 = vadd.f32 %v5883_v8, %v7862_v4  ;;  %v4967_v5 = vpop.f32.mrb[1].mxu1  ;;  %v4928_v13 = vadd.f32 %v7862_v4, %v4927_v48  ;;  %v5036_v48 = vld [vmem:[%s6204_s16 + $0x60] sm:$0xff] (%p3966_p11) }
 0x939   : >> { %v4968_v17 = vadd.f32 %v7862_v4, %v4967_v5  ;;  %5009 = vst.msk [vmem:[%s8439_s17 + $0x8] sm:$0xff] %vm744_vm2, %v4933_v9 }
 0x93a   : >> { %5017 = vst.msk [vmem:[%s8439_s17 + $0x48] sm:$0xff] %vm744_vm2, %v4973_v10  ;;  %5008 = vst.msk [vmem:[%s8439_s17] sm:$0xff] %vm744_vm2, %v4928_v13  ;;  %v5037_v13 = vld [vmem:[%s6204_s16 + $0x68] sm:$0xff] (%p3966_p11) }
 0x93b   : >> { %5016 = vst.msk [vmem:[%s8439_s17 + $0x40] sm:$0xff] %vm744_vm2, %v4968_v17 }
 0x976   : >> { %v5874_v54 = vpop.f32.mrb[2].mxu0 }
 0x977   : >> { %v5886_v58 = vpop.f32.mrb[2].mxu1  ;;  %v4943_v20 = vadd.f32 %v5874_v54, %v7862_v4  ;;  %v4937_v44 = vpop.f32.mrb[3].mxu0 }
 0x978   : >> { %v4983_v36 = vadd.f32 %v5886_v58, %v7862_v4  ;;  %v4977_v45 = vpop.f32.mrb[3].mxu1  ;;  %v4938_v12 = vadd.f32 %v7862_v4, %v4937_v44  ;;  %v5038_v58 = vld [vmem:[%s6204_s16 + $0x70] sm:$0xff] (%p3966_p11) }
 0x979   : >> { %v4978_v21 = vadd.f32 %v7862_v4, %v4977_v45  ;;  %5011 = vst.msk [vmem:[%s8439_s17 + $0x18] sm:$0xff] %vm744_vm2, %v4943_v20  ;;  %v5039_v45 = vld [vmem:[%s6204_s16 + $0x78] sm:$0xff] (%p3966_p11) }
 0x97a   : >> { %5019 = vst.msk [vmem:[%s8439_s17 + $0x58] sm:$0xff] %vm744_vm2, %v4983_v36  ;;  %5010 = vst.msk [vmem:[%s8439_s17 + $0x10] sm:$0xff] %vm744_vm2, %v4938_v12 }
 0x97b   : >> { %5018 = vst.msk [vmem:[%s8439_s17 + $0x50] sm:$0xff] %vm744_vm2, %v4978_v21  ;;  %v5040_v21 = vld [vmem:[%s6204_s16 + $0x80] sm:$0xff] (%p3966_p11) }
 0x9b2   : >> { %v5889_v34 = vpop.f32.mrb[4].mxu1 }
 0x9b3   : >> { %v5877_v33 = vpop.f32.mrb[4].mxu0  ;;  %v4993_v46 = vadd.f32 %v5889_v34, %v7862_v4  ;;  %v4987_v0 = vpop.f32.mrb[5].mxu1 }
 0x9b4   : >> { %v4953_v42 = vadd.f32 %v5877_v33, %v7862_v4  ;;  %v4947_v1 = vpop.f32.mrb[5].mxu0  ;;  %v4988_v16 = vadd.f32 %v7862_v4, %v4987_v0 }
 0x9b5   : >> { %v4948_v25 = vadd.f32 %v7862_v4, %v4947_v1  ;;  %5021 = vst.msk [vmem:[%s8439_s17 + $0x68] sm:$0xff] %vm744_vm2, %v4993_v46 }
 0x9b6   : >> { %5013 = vst.msk [vmem:[%s8439_s17 + $0x28] sm:$0xff] %vm744_vm2, %v4953_v42  ;;  %5020 = vst.msk [vmem:[%s8439_s17 + $0x60] sm:$0xff] %vm744_vm2, %v4988_v16  ;;  %v5041_v42 = vld [vmem:[%s6204_s16 + $0x88] sm:$0xff] (%p3966_p11) }
 0x9b7   : >> { %5012 = vst.msk [vmem:[%s8439_s17 + $0x20] sm:$0xff] %vm744_vm2, %v4948_v25  ;;  %v5042_v25 = vld [vmem:[%s6204_s16 + $0x90] sm:$0xff] (%p3966_p11) }
 0x9cd   : > { %3968 = sbr.rel (!%p3966_p11) target bundleno = 1917 (0x77d), region = 162 }
 0x9ce   : >> { %v5892_v38 = vpop.f32.mrb[6].mxu1 }
 0x9cf   : >> { %v5880_v2 = vpop.f32.mrb[6].mxu0  ;;  %v5003_v3 = vadd.f32 %v5892_v38, %v7862_v4  ;;  %v4997_v49 = vpop.f32.mrb[7].mxu1 }
 0x9d0   : >> { %v4963_v7 = vadd.f32 %v5880_v2, %v7862_v4  ;;  %v4957_v19 = vpop.f32.mrb[7].mxu0  ;;  %v4998_v57 = vadd.f32 %v7862_v4, %v4997_v49  ;;  %v5043_v2 = vld [vmem:[%s6204_s16 + $0x98] sm:$0xff] (%p3966_p11) }
 0x9d1   : >> { %v4958_v28 = vadd.f32 %v7862_v4, %v4957_v19  ;;  %5023 = vst.msk [vmem:[%s8439_s17 + $0x78] sm:$0xff] %vm744_vm2, %v5003_v3  ;;  %v5029_v4 = vld [vmem:[%s6204_s16 + $0x28] sm:$0xff] (%p3966_p11)  ;;  %v5044_v3 = vld [vmem:[%s6204_s16 + $0xa0] sm:$0xff] (%p3966_p11) }
 0x9d2   : >> { %5015 = vst.msk [vmem:[%s8439_s17 + $0x38] sm:$0xff] %vm744_vm2, %v4963_v7  ;;  %5022 = vst.msk [vmem:[%s8439_s17 + $0x70] sm:$0xff] %vm744_vm2, %v4998_v57  ;;  %v5045_v57 = vld [vmem:[%s6204_s16 + $0xa8] sm:$0xff] (%p3966_p11) }
 0x9d3   : >> { %5014 = vst.msk [vmem:[%s8439_s17 + $0x30] sm:$0xff] %vm744_vm2, %v4958_v28 }
 0x9da   : > { %v5056_v11 = vld [vmem:[#allocation3] sm:$0xff]  ;;  %v5057_v24 = vld [vmem:[#allocation3 + $0x8] sm:$0xff]  ;;  %v5058_v18 = vld [vmem:[#allocation3 + $0x10] sm:$0xff] }
 0x9db   : > { %v5088_v15 = vadd.f32 %v5056_v11, %v5024_v29  ;;  %v5089_v35 = vadd.f32 %v5057_v24, %v5025_v41  ;;  %v5090_v56 = vadd.f32 %v5058_v18, %v5026_v53  ;;  %v5059_v22 = vld [vmem:[#allocation3 + $0x18] sm:$0xff]  ;;  %v5060_v23 = vld [vmem:[#allocation3 + $0x20] sm:$0xff]  ;;  %v5061_v26 = vld [vmem:[#allocation3 + $0x28] sm:$0xff] }
 0x9dc   : > { %v5091_v40 = vadd.f32 %v5059_v22, %v5027_v27  ;;  %v5092_v37 = vadd.f32 %v5060_v23, %v5028_v39  ;;  %v5093_v61 = vadd.f32 %v5061_v26, %v5029_v4  ;;  %v5062_v31 = vld [vmem:[#allocation3 + $0x30] sm:$0xff]  ;;  %v5063_v43 = vld [vmem:[#allocation3 + $0x38] sm:$0xff]  ;;  %v5064_v51 = vld [vmem:[#allocation3 + $0x40] sm:$0xff] }
 0x9dd   : > { %5120 = vst.msk [vmem:[%s6236_s23] sm:$0xff] %vm744_vm2, %v5088_v15  ;;  %5121 = vst.msk [vmem:[%s6236_s23 + $0x8] sm:$0xff] %vm744_vm2, %v5089_v35  ;;  %v5094_v50 = vadd.f32 %v5062_v31, %v5030_v47  ;;  %v5095_v62 = vadd.f32 %v5063_v43, %v5031_v14  ;;  %v5096_v6 = vadd.f32 %v5064_v51, %v5032_v32  ;;  %v5065_v55 = vld [vmem:[#allocation3 + $0x48] sm:$0xff]  ;;  %v5066_v60 = vld [vmem:[#allocation3 + $0x50] sm:$0xff] }
 0x9de   : > { %5122 = vst.msk [vmem:[%s6236_s23 + $0x10] sm:$0xff] %vm744_vm2, %v5090_v56  ;;  %5123 = vst.msk [vmem:[%s6236_s23 + $0x18] sm:$0xff] %vm744_vm2, %v5091_v40  ;;  %v5097_v59 = vadd.f32 %v5065_v55, %v5033_v30  ;;  %v5067_v8 = vld [vmem:[#allocation3 + $0x58] sm:$0xff]  ;;  %v5098_v9 = vadd.f32 %v5066_v60, %v5034_v52  ;;  %v5068_v5 = vld [vmem:[#allocation3 + $0x60] sm:$0xff] }
 0x9df   : > { %5124 = vst.msk [vmem:[%s6236_s23 + $0x20] sm:$0xff] %vm744_vm2, %v5092_v37  ;;  %5125 = vst.msk [vmem:[%s6236_s23 + $0x28] sm:$0xff] %vm744_vm2, %v5093_v61  ;;  %v5099_v10 = vadd.f32 %v5067_v8, %v5035_v63  ;;  %v5100_v17 = vadd.f32 %v5068_v5, %v5036_v48  ;;  %v5069_v54 = vld [vmem:[#allocation3 + $0x68] sm:$0xff]  ;;  %v5070_v20 = vld [vmem:[#allocation3 + $0x70] sm:$0xff] }
 0x9e0   : > { %5126 = vst.msk [vmem:[%s6236_s23 + $0x30] sm:$0xff] %vm744_vm2, %v5094_v50  ;;  %5127 = vst.msk [vmem:[%s6236_s23 + $0x38] sm:$0xff] %vm744_vm2, %v5095_v62  ;;  %v5101_v36 = vadd.f32 %v5069_v54, %v5037_v13  ;;  %v5102_v44 = vadd.f32 %v5070_v20, %v5038_v58  ;;  %v5071_v12 = vld [vmem:[#allocation3 + $0x78] sm:$0xff]  ;;  %v5072_v34 = vld [vmem:[#allocation3 + $0x80] sm:$0xff] }
 0x9e1   : > { %5128 = vst.msk [vmem:[%s6236_s23 + $0x40] sm:$0xff] %vm744_vm2, %v5096_v6  ;;  %5129 = vst.msk [vmem:[%s6236_s23 + $0x48] sm:$0xff] %vm744_vm2, %v5097_v59  ;;  %v5103_v33 = vadd.f32 %v5071_v12, %v5039_v45  ;;  %v5073_v46 = vld [vmem:[#allocation3 + $0x88] sm:$0xff]  ;;  %v5104_v1 = vadd.f32 %v5072_v34, %v5040_v21  ;;  %v5074_v16 = vld [vmem:[#allocation3 + $0x90] sm:$0xff] }
 0x9e2   : > { %5130 = vst.msk [vmem:[%s6236_s23 + $0x50] sm:$0xff] %vm744_vm2, %v5098_v9  ;;  %5131 = vst.msk [vmem:[%s6236_s23 + $0x58] sm:$0xff] %vm744_vm2, %v5099_v10  ;;  %v5105_v0 = vadd.f32 %v5073_v46, %v5041_v42  ;;  %v5106_v38 = vadd.f32 %v5074_v16, %v5042_v25  ;;  %v5075_v7 = vld [vmem:[#allocation3 + $0x98] sm:$0xff]  ;;  %v5076_v19 = vld [vmem:[#allocation3 + $0xa0] sm:$0xff] }
 0x9e3   : > { %5132 = vst.msk [vmem:[%s6236_s23 + $0x60] sm:$0xff] %vm744_vm2, %v5100_v17  ;;  %5133 = vst.msk [vmem:[%s6236_s23 + $0x68] sm:$0xff] %vm744_vm2, %v5101_v36  ;;  %v5107_v49 = vadd.f32 %v5075_v7, %v5043_v2  ;;  %v5108_v28 = vadd.f32 %v5076_v19, %v5044_v3  ;;  %v5077_v29 = vld [vmem:[#allocation3 + $0xa8] sm:$0xff]  ;;  %v5046_v11 = vld [vmem:[%s6204_s16 + $0xb0] sm:$0xff] }
 0x9e4   : > { %5134 = vst.msk [vmem:[%s6236_s23 + $0x70] sm:$0xff] %vm744_vm2, %v5102_v44  ;;  %5135 = vst.msk [vmem:[%s6236_s23 + $0x78] sm:$0xff] %vm744_vm2, %v5103_v33  ;;  %v5109_v41 = vadd.f32 %v5077_v29, %v5045_v57  ;;  %v5078_v15 = vld [vmem:[#allocation3 + $0xb0] sm:$0xff]  ;;  %v5047_v24 = vld [vmem:[%s6204_s16 + $0xb8] sm:$0xff] }
 0x9e5   : > { %5136 = vst.msk [vmem:[%s6236_s23 + $0x80] sm:$0xff] %vm744_vm2, %v5104_v1  ;;  %5137 = vst.msk [vmem:[%s6236_s23 + $0x88] sm:$0xff] %vm744_vm2, %v5105_v0  ;;  %v5079_v53 = vld [vmem:[#allocation3 + $0xb8] sm:$0xff]  ;;  %v5110_v18 = vadd.f32 %v5078_v15, %v5046_v11  ;;  %v5048_v56 = vld [vmem:[%s6204_s16 + $0xc0] sm:$0xff] }
 0x9e6   : > { %5138 = vst.msk [vmem:[%s6236_s23 + $0x90] sm:$0xff] %vm744_vm2, %v5106_v38  ;;  %5139 = vst.msk [vmem:[%s6236_s23 + $0x98] sm:$0xff] %vm744_vm2, %v5107_v49  ;;  %v5111_v35 = vadd.f32 %v5079_v53, %v5047_v24  ;;  %v5080_v27 = vld [vmem:[#allocation3 + $0xc0] sm:$0xff]  ;;  %v5049_v22 = vld [vmem:[%s6204_s16 + $0xc8] sm:$0xff] }
 0x9e7   : > { %5140 = vst.msk [vmem:[%s6236_s23 + $0xa0] sm:$0xff] %vm744_vm2, %v5108_v28  ;;  %5141 = vst.msk [vmem:[%s6236_s23 + $0xa8] sm:$0xff] %vm744_vm2, %v5109_v41  ;;  %v5112_v39 = vadd.f32 %v5080_v27, %v5048_v56  ;;  %v5081_v40 = vld [vmem:[#allocation3 + $0xc8] sm:$0xff]  ;;  %v5050_v23 = vld [vmem:[%s6204_s16 + $0xd0] sm:$0xff] }
 0x9e8   : > { %v5082_v4 = vld [vmem:[#allocation3 + $0xd0] sm:$0xff]  ;;  %5142 = vst.msk [vmem:[%s6236_s23 + $0xb0] sm:$0xff] %vm744_vm2, %v5110_v18  ;;  %5143 = vst.msk [vmem:[%s6236_s23 + $0xb8] sm:$0xff] %vm744_vm2, %v5111_v35  ;;  %v5113_v26 = vadd.f32 %v5081_v40, %v5049_v22  ;;  %v5051_v61 = vld [vmem:[%s6204_s16 + $0xd8] sm:$0xff] }
 0x9e9   : > { %v5114_v37 = vadd.f32 %v5082_v4, %v5050_v23  ;;  %v5083_v47 = vld [vmem:[#allocation3 + $0xd8] sm:$0xff]  ;;  %v5052_v31 = vld [vmem:[%s6204_s16 + $0xe0] sm:$0xff]  ;;  %5144 = vst.msk [vmem:[%s6236_s23 + $0xc0] sm:$0xff] %vm744_vm2, %v5112_v39  ;;  %v5053_v43 = vld [vmem:[%s6204_s16 + $0xe8] sm:$0xff] }
 0x9ea   : > { %v5115_v14 = vadd.f32 %v5083_v47, %v5051_v61  ;;  %v5084_v50 = vld [vmem:[#allocation3 + $0xe0] sm:$0xff]  ;;  %v5085_v32 = vld [vmem:[#allocation3 + $0xe8] sm:$0xff]  ;;  %5145 = vst.msk [vmem:[%s6236_s23 + $0xc8] sm:$0xff] %vm744_vm2, %v5113_v26  ;;  %v5054_v6 = vld [vmem:[%s6204_s16 + $0xf0] sm:$0xff] }
 0x9eb   : > { %5146 = vst.msk [vmem:[%s6236_s23 + $0xd0] sm:$0xff] %vm744_vm2, %v5114_v37  ;;  %v5116_v51 = vadd.f32 %v5084_v50, %v5052_v31  ;;  %v5117_v62 = vadd.f32 %v5085_v32, %v5053_v43  ;;  %v5086_v30 = vld [vmem:[#allocation3 + $0xf0] sm:$0xff]  ;;  %v5055_v55 = vld [vmem:[%s6204_s16 + $0xf8] sm:$0xff] }
 0x9ec   : > { %5147 = vst.msk [vmem:[%s6236_s23 + $0xd8] sm:$0xff] %vm744_vm2, %v5115_v14  ;;  %v5118_v52 = vadd.f32 %v5086_v30, %v5054_v6  ;;  %v5087_v59 = vld [vmem:[#allocation3 + $0xf8] sm:$0xff] }
 0x9ed   : > { %5148 = vst.msk [vmem:[%s6236_s23 + $0xe0] sm:$0xff] %vm744_vm2, %v5116_v51  ;;  %5149 = vst.msk [vmem:[%s6236_s23 + $0xe8] sm:$0xff] %vm744_vm2, %v5117_v62  ;;  %v5119_v60 = vadd.f32 %v5087_v59, %v5055_v55 }
 0x9ee   : > { %5150 = vst.msk [vmem:[%s6236_s23 + $0xf0] sm:$0xff] %vm744_vm2, %v5118_v52 }
 0x9ef   : > { %5151 = vst.msk [vmem:[%s6236_s23 + $0xf8] sm:$0xff] %vm744_vm2, %v5119_v60 }
 0x9f0 PF: > { %s18_s9 = sadd.s32 1, %s6080_s9   ;;  %s8626_s28 = sld [smem:[#allocation6_spill]] }
 0x9f1   : > { %p15_p12 = scmp.ge.s32.totalorder %s18_s9, 6   ;;  %s8627_s16 = sld [smem:[#allocation7_spill]] }
 0x9f2   : > { %s8628_s30 = sld [smem:[#allocation8_spill]]  ;;  %s8629_s27 = smov %s6072_s29 }
 0x9f3   :  { %17 = sbr.rel (!%p15_p12) target bundleno = 3 (0x3), region = 173 }
 0x9f7   : > { %s8630_s29 = smov %s8627_s16 }

</bundles_post_ra>
